<compile_context>
chip_gen: v7x
topology: tpu7x:2x2x1
jax: 0.10.0
libtpu: 0.0.40
codegen_flags: <defaults>
</compile_context>

<pallas_src>
import jax
import jax.numpy as jnp
from jax import lax
from jax.experimental import pallas as pl
from jax.experimental.pallas import tpu as pltpu

# (kernel_size, stride, padding) for cnn1 / cnn2 / cnn3 -- fixed by the module.
_LAYER_CFG = ((8, 4, 3), (10, 5, 4), (10, 5, 4))
_LEFT = 8   # sublane-aligned left margin in the padded VMEM buffers (>= max padding)


# ---------------------------------------------------------------------------
# Fused 3-layer conv stack (single pallas_call, VMEM-resident intermediates)
# ---------------------------------------------------------------------------
def _fused_conv_stack(emb, w1, b1, w2, b2, w3, b3):
    """emb: (B, L, C1) f32 channels-last; w_i: (K, C_in, C_out) bf16; b_i: (1, C_out) f32.
    Returns relu(conv3(relu(conv2(relu(conv1(emb)))))) as (B, L_out3, C_out3) f32."""
    B, L, C1 = emb.shape
    C2 = w2.shape[1]
    C3 = w3.shape[1]
    n_out = w3.shape[2]

    # Static per-layer lengths: stride-1 ("full") conv length and strided output length.
    dims = []
    Lc = L
    for (K, s, p) in _LAYER_CFG:
        Lf = Lc + 2 * p - K + 1
        Lo = (Lc + 2 * p - K) // s + 1        # PyTorch Conv1d output-length formula
        dims.append((Lc, Lf, Lo))
        Lc = Lo
    (L1, Lf1, Lo1), (L2, Lf2, Lo2), (L3, Lf3, Lo3) = dims

    def kernel(x_ref, w1_ref, b1_ref, w2_ref, b2_ref, w3_ref, b3_ref,
               o_ref, buf1, buf2, buf3):

        def conv_relu(xp_ref, x_val, data_len, w_ref, b_ref, cfg, Lf, Lo):
            K, s, p = cfg
            # Stage the channels-last input in a zero-padded VMEM buffer. Data is
            # written at the sublane-aligned offset _LEFT (aligned stores); the
            # conv's left padding is folded into the per-tap load offsets below.
            xp_ref[...] = jnp.zeros_like(xp_ref)
            xp_ref[pl.ds(_LEFT, data_len), :] = x_val
            # Stride-1 conv: K unrolled tap matmuls, bf16 inputs / f32 MXU accumulate.
            acc = None
            for k in range(K):
                lhs = xp_ref[pl.ds(_LEFT - p + k, Lf), :].astype(jnp.bfloat16)
                t = jnp.dot(lhs, w_ref[k], preferred_element_type=jnp.float32)
                acc = t if acc is None else acc + t
            # Exact stride-s row selection as a 0/1 matmul (keeps everything on
            # well-supported MXU/VPU ops; no strided VMEM access required).
            rows = lax.broadcasted_iota(jnp.int32, (Lo, Lf), 0)
            cols = lax.broadcasted_iota(jnp.int32, (Lo, Lf), 1)
            sel = (cols == rows * s).astype(jnp.float32)
            y = jnp.dot(sel, acc, preferred_element_type=jnp.float32)
            return jnp.maximum(y + b_ref[...], 0.0)        # (Lo, C_out) f32

        y1 = conv_relu(buf1, x_ref[0], L1, w1_ref, b1_ref, _LAYER_CFG[0], Lf1, Lo1)
        y2 = conv_relu(buf2, y1, L2, w2_ref, b2_ref, _LAYER_CFG[1], Lf2, Lo2)
        y3 = conv_relu(buf3, y2, L3, w3_ref, b3_ref, _LAYER_CFG[2], Lf3, Lo3)
        # TODO(synk): final store is (Lo3, n_embd=32) -> lane-sparse; packing it
        # lane-dense is not worth it at this output size (a few hundred floats).
        o_ref[0] = y3.astype(o_ref.dtype)

    return pl.pallas_call(
        kernel,
        out_shape=jax.ShapeDtypeStruct((B, Lo3, n_out), jnp.float32),
        grid_spec=pltpu.PrefetchScalarGridSpec(
            num_scalar_prefetch=0,
            grid=(B,),
            in_specs=[
                pl.BlockSpec((1, L1, C1), lambda b: (b, 0, 0)),   # embedded input
                pl.BlockSpec(w1.shape, lambda b: (0, 0, 0)),      # full weights (fetched once)
                pl.BlockSpec(b1.shape, lambda b: (0, 0)),
                pl.BlockSpec(w2.shape, lambda b: (0, 0, 0)),
                pl.BlockSpec(b2.shape, lambda b: (0, 0)),
                pl.BlockSpec(w3.shape, lambda b: (0, 0, 0)),
                pl.BlockSpec(b3.shape, lambda b: (0, 0)),
            ],
            out_specs=pl.BlockSpec((1, Lo3, n_out), lambda b: (b, 0, 0)),
            scratch_shapes=[                                      # padded activations (VMEM)
                pltpu.VMEM((L1 + 2 * _LEFT, C1), jnp.float32),
                pltpu.VMEM((L2 + 2 * _LEFT, C2), jnp.float32),
                pltpu.VMEM((L3 + 2 * _LEFT, C3), jnp.float32),
            ],
        ),
        compiler_params=pltpu.CompilerParams(
            dimension_semantics=("parallel",)),
    )(emb, w1, b1, w2, b2, w3, b3)


# ---------------------------------------------------------------------------
# Parameters
# ---------------------------------------------------------------------------
def init_params(key, n_encod, n_embd):
    # PyTorch-layout float32 parameters (also used by the pure-JAX reference).
    ks = jax.random.split(key, 7)

    def uniform(k, shape, fan_in):
        bound = 1.0 / float(fan_in) ** 0.5
        return jax.random.uniform(k, shape, jnp.float32, -bound, bound)

    return {
        "embed": jax.random.normal(ks[0], (n_encod, n_encod), jnp.float32),
        "w1": uniform(ks[1], (64, n_encod, 8), n_encod * 8),
        "b1": uniform(ks[2], (64,), n_encod * 8),
        "w2": uniform(ks[3], (256, 64, 10), 64 * 10),
        "b2": uniform(ks[4], (256,), 64 * 10),
        "w3": uniform(ks[5], (n_embd, 256, 10), 256 * 10),
        "b3": uniform(ks[6], (n_embd,), 256 * 10),
    }


def prepare_kernel_params(params):
    # One-time layout prep (kept out of the forward graph): per-tap (K, C_in, C_out)
    # bf16 weights, (1, C_out) f32 biases.
    def taps(w):  # (C_out, C_in, K) -> (K, C_in, C_out) bf16
        return jnp.transpose(w, (2, 1, 0)).astype(jnp.bfloat16)

    return {
        "embed": params["embed"],
        "w1": taps(params["w1"]), "b1": params["b1"].reshape(1, -1),
        "w2": taps(params["w2"]), "b2": params["b2"].reshape(1, -1),
        "w3": taps(params["w3"]), "b3": params["b3"].reshape(1, -1),
    }


@jax.jit
def conv_embedding_forward(kparams, x_ids):
    # x_ids: (B, 1, L) int32 token indices (same input as the PyTorch forward).
    B, _, L = x_ids.shape
    # TODO(synk): nn.Embedding is a pure gather (no matmul/reduction hot path);
    # kept as plain-JAX glue feeding the fused Pallas kernel. (An optional further
    # optimization folds embedding+conv1 into a table lookup since both are linear.)
    emb = jnp.take(kparams["embed"], x_ids.reshape(B, L), axis=0)  # (B, L, n_encod)
    return _fused_conv_stack(emb, kparams["w1"], kparams["b1"],
                             kparams["w2"], kparams["b2"],
                             kparams["w3"], kparams["b3"])


# ---------------------------------------------------------------------------
# Pure-JAX f32 reference (lax.conv) for correctness check
# ---------------------------------------------------------------------------
def _conv1d_relu_ref(x, w, b, stride, padding):
    y = lax.conv_general_dilated(x, w, (stride,), [(padding, padding)],
                                 dimension_numbers=("NCH", "OIH", "NCH"))
    return jnp.maximum(y + b[None, :, None], 0.0)


def conv_embedding_ref(params, x_ids):
    B, _, L = x_ids.shape
    emb = jnp.take(params["embed"], x_ids.reshape(B, L), axis=0)
    h = jnp.transpose(emb, (0, 2, 1))
    h = _conv1d_relu_ref(h, params["w1"], params["b1"], 4, 3)
    h = _conv1d_relu_ref(h, params["w2"], params["b2"], 5, 4)
    h = _conv1d_relu_ref(h, params["w3"], params["b3"], 5, 4)
    return jnp.transpose(h, (0, 2, 1))


if __name__ == "__main__":
    key = jax.random.PRNGKey(0)
    n_encod, n_embd = 8, 32
    B, L = 2, 400   # L -> 100 -> 20 -> 4 after the three strided convs

    pkey, xkey = jax.random.split(key)
    params = init_params(pkey, n_encod, n_embd)
    kparams = prepare_kernel_params(params)
    x_ids = jax.random.randint(xkey, (B, 1, L), 0, n_encod, dtype=jnp.int32)

    out = jax.block_until_ready(conv_embedding_forward(kparams, x_ids))
    ref = jax.block_until_ready(conv_embedding_ref(params, x_ids))

    assert out.shape == ref.shape == (B, 4, n_embd), (out.shape, ref.shape)
    # Kernel feeds bf16 into the MXU (f32 accumulation); reference is pure f32,
    # so compare with a bf16-appropriate tolerance.
    if not jnp.allclose(out, ref, atol=2e-2, rtol=2e-2):
        err = float(jnp.max(jnp.abs(out - ref)))
        raise AssertionError(f"Pallas result does not match reference (max abs err {err})")
    print("KERNEL_OK")
</pallas_src>

<mosaic_0001>
module attributes {stable_mosaic.version = 11 : i64} {
  func.func @kernel(%arg0: i32, %arg1: memref<1x400x8xf32, #tpu.memory_space<vmem>>, %arg2: memref<8x8x64xbf16, #tpu.memory_space<vmem>>, %arg3: memref<1x64xf32, #tpu.memory_space<vmem>>, %arg4: memref<10x64x256xbf16, #tpu.memory_space<vmem>>, %arg5: memref<1x256xf32, #tpu.memory_space<vmem>>, %arg6: memref<10x256x32xbf16, #tpu.memory_space<vmem>>, %arg7: memref<1x32xf32, #tpu.memory_space<vmem>>, %arg8: memref<1x4x32xf32, #tpu.memory_space<vmem>>, %arg9: memref<416x8xf32, #tpu.memory_space<vmem>>, %arg10: memref<116x64xf32, #tpu.memory_space<vmem>>, %arg11: memref<36x256xf32, #tpu.memory_space<vmem>>) attributes {dimension_semantics = [#tpu.dimension_semantics<parallel>], iteration_bounds = array<i64: 2>, scalar_prefetch = 0 : i64, scratch_operands = 3 : i64, tpu.core_type = #tpu.core_type<tc>, window_params = [{transform_indices = @transform_0, window_bounds = array<i64: 1, 400, 8>}, {pipeline_mode = #tpu.pipeline_mode<synchronous>, transform_indices = @transform_1, window_bounds = array<i64: 8, 8, 64>}, {pipeline_mode = #tpu.pipeline_mode<synchronous>, transform_indices = @transform_2, window_bounds = array<i64: 1, 64>}, {pipeline_mode = #tpu.pipeline_mode<synchronous>, transform_indices = @transform_3, window_bounds = array<i64: 10, 64, 256>}, {pipeline_mode = #tpu.pipeline_mode<synchronous>, transform_indices = @transform_4, window_bounds = array<i64: 1, 256>}, {pipeline_mode = #tpu.pipeline_mode<synchronous>, transform_indices = @transform_5, window_bounds = array<i64: 10, 256, 32>}, {pipeline_mode = #tpu.pipeline_mode<synchronous>, transform_indices = @transform_6, window_bounds = array<i64: 1, 32>}, {transform_indices = @transform_7, window_bounds = array<i64: 1, 4, 32>}]} {
    %c0 = arith.constant 0 : index
    %c0_0 = arith.constant 0 : index
    %c0_1 = arith.constant 0 : index
    %0 = vector.load %arg1[%c0, %c0_0, %c0_1] : memref<1x400x8xf32, #tpu.memory_space<vmem>>, vector<1x400x8xf32>
    %1 = vector.shape_cast %0 : vector<1x400x8xf32> to vector<400x8xf32>
    %cst = arith.constant 0.000000e+00 : f32
    %2 = vector.broadcast %cst : f32 to vector<416x8xf32>
    %c0_2 = arith.constant 0 : index
    %c0_3 = arith.constant 0 : index
    %3 = vector.load %arg9[%c0_2, %c0_3] : memref<416x8xf32, #tpu.memory_space<vmem>>, vector<416x8xf32>
    tpu.vector_store %arg9[%c0_2, %c0_3], %2 {strides = array<i32>} : memref<416x8xf32, #tpu.memory_space<vmem>>, vector<416x8xf32>,
    %c8 = arith.constant 8 : index
    %c0_4 = arith.constant 0 : index
    %4 = vector.load %arg9[%c8, %c0_4] : memref<416x8xf32, #tpu.memory_space<vmem>>, vector<400x8xf32>
    tpu.vector_store %arg9[%c8, %c0_4], %1 {strides = array<i32>} : memref<416x8xf32, #tpu.memory_space<vmem>>, vector<400x8xf32>,
    %c5 = arith.constant 5 : index
    %c0_5 = arith.constant 0 : index
    %5 = vector.load %arg9[%c5, %c0_5] : memref<416x8xf32, #tpu.memory_space<vmem>>, vector<399x8xf32>
    %6 = arith.truncf %5 : vector<399x8xf32> to vector<399x8xbf16>
    %c0_6 = arith.constant 0 : index
    %c0_7 = arith.constant 0 : index
    %c0_8 = arith.constant 0 : index
    %7 = vector.load %arg2[%c0_6, %c0_7, %c0_8] : memref<8x8x64xbf16, #tpu.memory_space<vmem>>, vector<1x8x64xbf16>
    %8 = vector.shape_cast %7 : vector<1x8x64xbf16> to vector<8x64xbf16>
    %cst_9 = arith.constant dense<0.000000e+00> : vector<399x64xf32>
    %9 = tpu.matmul %6, %8, %cst_9 {dimension_numbers = #tpu.dot_dimension_numbers<[1], [0], [0], [1], [0, 0, 1, 1], [], []>} : vector<399x8xbf16>, vector<8x64xbf16>, vector<399x64xf32> -> vector<399x64xf32>
    %c6 = arith.constant 6 : index
    %c0_10 = arith.constant 0 : index
    %10 = vector.load %arg9[%c6, %c0_10] : memref<416x8xf32, #tpu.memory_space<vmem>>, vector<399x8xf32>
    %11 = arith.truncf %10 : vector<399x8xf32> to vector<399x8xbf16>
    %c1 = arith.constant 1 : index
    %c0_11 = arith.constant 0 : index
    %c0_12 = arith.constant 0 : index
    %12 = vector.load %arg2[%c1, %c0_11, %c0_12] : memref<8x8x64xbf16, #tpu.memory_space<vmem>>, vector<1x8x64xbf16>
    %13 = vector.shape_cast %12 : vector<1x8x64xbf16> to vector<8x64xbf16>
    %cst_13 = arith.constant dense<0.000000e+00> : vector<399x64xf32>
    %14 = tpu.matmul %11, %13, %cst_13 {dimension_numbers = #tpu.dot_dimension_numbers<[1], [0], [0], [1], [0, 0, 1, 1], [], []>} : vector<399x8xbf16>, vector<8x64xbf16>, vector<399x64xf32> -> vector<399x64xf32>
    %15 = arith.addf %9, %14 : vector<399x64xf32>
    %c7 = arith.constant 7 : index
    %c0_14 = arith.constant 0 : index
    %16 = vector.load %arg9[%c7, %c0_14] : memref<416x8xf32, #tpu.memory_space<vmem>>, vector<399x8xf32>
    %17 = arith.truncf %16 : vector<399x8xf32> to vector<399x8xbf16>
    %c2 = arith.constant 2 : index
    %c0_15 = arith.constant 0 : index
    %c0_16 = arith.constant 0 : index
    %18 = vector.load %arg2[%c2, %c0_15, %c0_16] : memref<8x8x64xbf16, #tpu.memory_space<vmem>>, vector<1x8x64xbf16>
    %19 = vector.shape_cast %18 : vector<1x8x64xbf16> to vector<8x64xbf16>
    %cst_17 = arith.constant dense<0.000000e+00> : vector<399x64xf32>
    %20 = tpu.matmul %17, %19, %cst_17 {dimension_numbers = #tpu.dot_dimension_numbers<[1], [0], [0], [1], [0, 0, 1, 1], [], []>} : vector<399x8xbf16>, vector<8x64xbf16>, vector<399x64xf32> -> vector<399x64xf32>
    %21 = arith.addf %15, %20 : vector<399x64xf32>
    %c8_18 = arith.constant 8 : index
    %c0_19 = arith.constant 0 : index
    %22 = vector.load %arg9[%c8_18, %c0_19] : memref<416x8xf32, #tpu.memory_space<vmem>>, vector<399x8xf32>
    %23 = arith.truncf %22 : vector<399x8xf32> to vector<399x8xbf16>
    %c3 = arith.constant 3 : index
    %c0_20 = arith.constant 0 : index
    %c0_21 = arith.constant 0 : index
    %24 = vector.load %arg2[%c3, %c0_20, %c0_21] : memref<8x8x64xbf16, #tpu.memory_space<vmem>>, vector<1x8x64xbf16>
    %25 = vector.shape_cast %24 : vector<1x8x64xbf16> to vector<8x64xbf16>
    %cst_22 = arith.constant dense<0.000000e+00> : vector<399x64xf32>
    %26 = tpu.matmul %23, %25, %cst_22 {dimension_numbers = #tpu.dot_dimension_numbers<[1], [0], [0], [1], [0, 0, 1, 1], [], []>} : vector<399x8xbf16>, vector<8x64xbf16>, vector<399x64xf32> -> vector<399x64xf32>
    %27 = arith.addf %21, %26 : vector<399x64xf32>
    %c9 = arith.constant 9 : index
    %c0_23 = arith.constant 0 : index
    %28 = vector.load %arg9[%c9, %c0_23] : memref<416x8xf32, #tpu.memory_space<vmem>>, vector<399x8xf32>
    %29 = arith.truncf %28 : vector<399x8xf32> to vector<399x8xbf16>
    %c4 = arith.constant 4 : index
    %c0_24 = arith.constant 0 : index
    %c0_25 = arith.constant 0 : index
    %30 = vector.load %arg2[%c4, %c0_24, %c0_25] : memref<8x8x64xbf16, #tpu.memory_space<vmem>>, vector<1x8x64xbf16>
    %31 = vector.shape_cast %30 : vector<1x8x64xbf16> to vector<8x64xbf16>
    %cst_26 = arith.constant dense<0.000000e+00> : vector<399x64xf32>
    %32 = tpu.matmul %29, %31, %cst_26 {dimension_numbers = #tpu.dot_dimension_numbers<[1], [0], [0], [1], [0, 0, 1, 1], [], []>} : vector<399x8xbf16>, vector<8x64xbf16>, vector<399x64xf32> -> vector<399x64xf32>
    %33 = arith.addf %27, %32 : vector<399x64xf32>
    %c10 = arith.constant 10 : index
    %c0_27 = arith.constant 0 : index
    %34 = vector.load %arg9[%c10, %c0_27] : memref<416x8xf32, #tpu.memory_space<vmem>>, vector<399x8xf32>
    %35 = arith.truncf %34 : vector<399x8xf32> to vector<399x8xbf16>
    %c5_28 = arith.constant 5 : index
    %c0_29 = arith.constant 0 : index
    %c0_30 = arith.constant 0 : index
    %36 = vector.load %arg2[%c5_28, %c0_29, %c0_30] : memref<8x8x64xbf16, #tpu.memory_space<vmem>>, vector<1x8x64xbf16>
    %37 = vector.shape_cast %36 : vector<1x8x64xbf16> to vector<8x64xbf16>
    %cst_31 = arith.constant dense<0.000000e+00> : vector<399x64xf32>
    %38 = tpu.matmul %35, %37, %cst_31 {dimension_numbers = #tpu.dot_dimension_numbers<[1], [0], [0], [1], [0, 0, 1, 1], [], []>} : vector<399x8xbf16>, vector<8x64xbf16>, vector<399x64xf32> -> vector<399x64xf32>
    %39 = arith.addf %33, %38 : vector<399x64xf32>
    %c11 = arith.constant 11 : index
    %c0_32 = arith.constant 0 : index
    %40 = vector.load %arg9[%c11, %c0_32] : memref<416x8xf32, #tpu.memory_space<vmem>>, vector<399x8xf32>
    %41 = arith.truncf %40 : vector<399x8xf32> to vector<399x8xbf16>
    %c6_33 = arith.constant 6 : index
    %c0_34 = arith.constant 0 : index
    %c0_35 = arith.constant 0 : index
    %42 = vector.load %arg2[%c6_33, %c0_34, %c0_35] : memref<8x8x64xbf16, #tpu.memory_space<vmem>>, vector<1x8x64xbf16>
    %43 = vector.shape_cast %42 : vector<1x8x64xbf16> to vector<8x64xbf16>
    %cst_36 = arith.constant dense<0.000000e+00> : vector<399x64xf32>
    %44 = tpu.matmul %41, %43, %cst_36 {dimension_numbers = #tpu.dot_dimension_numbers<[1], [0], [0], [1], [0, 0, 1, 1], [], []>} : vector<399x8xbf16>, vector<8x64xbf16>, vector<399x64xf32> -> vector<399x64xf32>
    %45 = arith.addf %39, %44 : vector<399x64xf32>
    %c12 = arith.constant 12 : index
    %c0_37 = arith.constant 0 : index
    %46 = vector.load %arg9[%c12, %c0_37] : memref<416x8xf32, #tpu.memory_space<vmem>>, vector<399x8xf32>
    %47 = arith.truncf %46 : vector<399x8xf32> to vector<399x8xbf16>
    %c7_38 = arith.constant 7 : index
    %c0_39 = arith.constant 0 : index
    %c0_40 = arith.constant 0 : index
    %48 = vector.load %arg2[%c7_38, %c0_39, %c0_40] : memref<8x8x64xbf16, #tpu.memory_space<vmem>>, vector<1x8x64xbf16>
    %49 = vector.shape_cast %48 : vector<1x8x64xbf16> to vector<8x64xbf16>
    %cst_41 = arith.constant dense<0.000000e+00> : vector<399x64xf32>
    %50 = tpu.matmul %47, %49, %cst_41 {dimension_numbers = #tpu.dot_dimension_numbers<[1], [0], [0], [1], [0, 0, 1, 1], [], []>} : vector<399x8xbf16>, vector<8x64xbf16>, vector<399x64xf32> -> vector<399x64xf32>
    %51 = arith.addf %45, %50 : vector<399x64xf32>
    %52 = tpu.iota {dimensions = array<i32: 0>} : vector<100x399xi32>
    %53 = tpu.iota {dimensions = array<i32: 1>} : vector<100x399xi32>
    %c4_i32 = arith.constant 4 : i32
    %54 = vector.broadcast %c4_i32 : i32 to vector<100x399xi32>
    %55 = arith.muli %52, %54 : vector<100x399xi32>
    %56 = arith.cmpi eq, %53, %55 : vector<100x399xi32>
    %57 = arith.extui %56 : vector<100x399xi1> to vector<100x399xi32>
    %58 = arith.sitofp %57 : vector<100x399xi32> to vector<100x399xf32>
    %cst_42 = arith.constant dense<0.000000e+00> : vector<100x64xf32>
    %59 = tpu.matmul %58, %51, %cst_42 {dimension_numbers = #tpu.dot_dimension_numbers<[1], [0], [0], [1], [0, 0, 1, 1], [], []>} : vector<100x399xf32>, vector<399x64xf32>, vector<100x64xf32> -> vector<100x64xf32>
    %c0_43 = arith.constant 0 : index
    %c0_44 = arith.constant 0 : index
    %60 = vector.load %arg3[%c0_43, %c0_44] : memref<1x64xf32, #tpu.memory_space<vmem>>, vector<1x64xf32>
    %61 = vector.broadcast %60 : vector<1x64xf32> to vector<100x64xf32>
    %62 = arith.addf %59, %61 : vector<100x64xf32>
    %cst_45 = arith.constant 0.000000e+00 : f32
    %63 = vector.broadcast %cst_45 : f32 to vector<100x64xf32>
    %64 = arith.maximumf %62, %63 : vector<100x64xf32>
    %cst_46 = arith.constant 0.000000e+00 : f32
    %65 = vector.broadcast %cst_46 : f32 to vector<116x64xf32>
    %c0_47 = arith.constant 0 : index
    %c0_48 = arith.constant 0 : index
    %66 = vector.load %arg10[%c0_47, %c0_48] : memref<116x64xf32, #tpu.memory_space<vmem>>, vector<116x64xf32>
    tpu.vector_store %arg10[%c0_47, %c0_48], %65 {strides = array<i32>} : memref<116x64xf32, #tpu.memory_space<vmem>>, vector<116x64xf32>,
    %c8_49 = arith.constant 8 : index
    %c0_50 = arith.constant 0 : index
    %67 = vector.load %arg10[%c8_49, %c0_50] : memref<116x64xf32, #tpu.memory_space<vmem>>, vector<100x64xf32>
    tpu.vector_store %arg10[%c8_49, %c0_50], %64 {strides = array<i32>} : memref<116x64xf32, #tpu.memory_space<vmem>>, vector<100x64xf32>,
    %c4_51 = arith.constant 4 : index
    %c0_52 = arith.constant 0 : index
    %68 = vector.load %arg10[%c4_51, %c0_52] : memref<116x64xf32, #tpu.memory_space<vmem>>, vector<99x64xf32>
    %69 = arith.truncf %68 : vector<99x64xf32> to vector<99x64xbf16>
    %c0_53 = arith.constant 0 : index
    %c0_54 = arith.constant 0 : index
    %c0_55 = arith.constant 0 : index
    %70 = vector.load %arg4[%c0_53, %c0_54, %c0_55] : memref<10x64x256xbf16, #tpu.memory_space<vmem>>, vector<1x64x256xbf16>
    %71 = vector.shape_cast %70 : vector<1x64x256xbf16> to vector<64x256xbf16>
    %cst_56 = arith.constant dense<0.000000e+00> : vector<99x256xf32>
    %72 = tpu.matmul %69, %71, %cst_56 {dimension_numbers = #tpu.dot_dimension_numbers<[1], [0], [0], [1], [0, 0, 1, 1], [], []>} : vector<99x64xbf16>, vector<64x256xbf16>, vector<99x256xf32> -> vector<99x256xf32>
    %c5_57 = arith.constant 5 : index
    %c0_58 = arith.constant 0 : index
    %73 = vector.load %arg10[%c5_57, %c0_58] : memref<116x64xf32, #tpu.memory_space<vmem>>, vector<99x64xf32>
    %74 = arith.truncf %73 : vector<99x64xf32> to vector<99x64xbf16>
    %c1_59 = arith.constant 1 : index
    %c0_60 = arith.constant 0 : index
    %c0_61 = arith.constant 0 : index
    %75 = vector.load %arg4[%c1_59, %c0_60, %c0_61] : memref<10x64x256xbf16, #tpu.memory_space<vmem>>, vector<1x64x256xbf16>
    %76 = vector.shape_cast %75 : vector<1x64x256xbf16> to vector<64x256xbf16>
    %cst_62 = arith.constant dense<0.000000e+00> : vector<99x256xf32>
    %77 = tpu.matmul %74, %76, %cst_62 {dimension_numbers = #tpu.dot_dimension_numbers<[1], [0], [0], [1], [0, 0, 1, 1], [], []>} : vector<99x64xbf16>, vector<64x256xbf16>, vector<99x256xf32> -> vector<99x256xf32>
    %78 = arith.addf %72, %77 : vector<99x256xf32>
    %c6_63 = arith.constant 6 : index
    %c0_64 = arith.constant 0 : index
    %79 = vector.load %arg10[%c6_63, %c0_64] : memref<116x64xf32, #tpu.memory_space<vmem>>, vector<99x64xf32>
    %80 = arith.truncf %79 : vector<99x64xf32> to vector<99x64xbf16>
    %c2_65 = arith.constant 2 : index
    %c0_66 = arith.constant 0 : index
    %c0_67 = arith.constant 0 : index
    %81 = vector.load %arg4[%c2_65, %c0_66, %c0_67] : memref<10x64x256xbf16, #tpu.memory_space<vmem>>, vector<1x64x256xbf16>
    %82 = vector.shape_cast %81 : vector<1x64x256xbf16> to vector<64x256xbf16>
    %cst_68 = arith.constant dense<0.000000e+00> : vector<99x256xf32>
    %83 = tpu.matmul %80, %82, %cst_68 {dimension_numbers = #tpu.dot_dimension_numbers<[1], [0], [0], [1], [0, 0, 1, 1], [], []>} : vector<99x64xbf16>, vector<64x256xbf16>, vector<99x256xf32> -> vector<99x256xf32>
    %84 = arith.addf %78, %83 : vector<99x256xf32>
    %c7_69 = arith.constant 7 : index
    %c0_70 = arith.constant 0 : index
    %85 = vector.load %arg10[%c7_69, %c0_70] : memref<116x64xf32, #tpu.memory_space<vmem>>, vector<99x64xf32>
    %86 = arith.truncf %85 : vector<99x64xf32> to vector<99x64xbf16>
    %c3_71 = arith.constant 3 : index
    %c0_72 = arith.constant 0 : index
    %c0_73 = arith.constant 0 : index
    %87 = vector.load %arg4[%c3_71, %c0_72, %c0_73] : memref<10x64x256xbf16, #tpu.memory_space<vmem>>, vector<1x64x256xbf16>
    %88 = vector.shape_cast %87 : vector<1x64x256xbf16> to vector<64x256xbf16>
    %cst_74 = arith.constant dense<0.000000e+00> : vector<99x256xf32>
    %89 = tpu.matmul %86, %88, %cst_74 {dimension_numbers = #tpu.dot_dimension_numbers<[1], [0], [0], [1], [0, 0, 1, 1], [], []>} : vector<99x64xbf16>, vector<64x256xbf16>, vector<99x256xf32> -> vector<99x256xf32>
    %90 = arith.addf %84, %89 : vector<99x256xf32>
    %c8_75 = arith.constant 8 : index
    %c0_76 = arith.constant 0 : index
    %91 = vector.load %arg10[%c8_75, %c0_76] : memref<116x64xf32, #tpu.memory_space<vmem>>, vector<99x64xf32>
    %92 = arith.truncf %91 : vector<99x64xf32> to vector<99x64xbf16>
    %c4_77 = arith.constant 4 : index
    %c0_78 = arith.constant 0 : index
    %c0_79 = arith.constant 0 : index
    %93 = vector.load %arg4[%c4_77, %c0_78, %c0_79] : memref<10x64x256xbf16, #tpu.memory_space<vmem>>, vector<1x64x256xbf16>
    %94 = vector.shape_cast %93 : vector<1x64x256xbf16> to vector<64x256xbf16>
    %cst_80 = arith.constant dense<0.000000e+00> : vector<99x256xf32>
    %95 = tpu.matmul %92, %94, %cst_80 {dimension_numbers = #tpu.dot_dimension_numbers<[1], [0], [0], [1], [0, 0, 1, 1], [], []>} : vector<99x64xbf16>, vector<64x256xbf16>, vector<99x256xf32> -> vector<99x256xf32>
    %96 = arith.addf %90, %95 : vector<99x256xf32>
    %c9_81 = arith.constant 9 : index
    %c0_82 = arith.constant 0 : index
    %97 = vector.load %arg10[%c9_81, %c0_82] : memref<116x64xf32, #tpu.memory_space<vmem>>, vector<99x64xf32>
    %98 = arith.truncf %97 : vector<99x64xf32> to vector<99x64xbf16>
    %c5_83 = arith.constant 5 : index
    %c0_84 = arith.constant 0 : index
    %c0_85 = arith.constant 0 : index
    %99 = vector.load %arg4[%c5_83, %c0_84, %c0_85] : memref<10x64x256xbf16, #tpu.memory_space<vmem>>, vector<1x64x256xbf16>
    %100 = vector.shape_cast %99 : vector<1x64x256xbf16> to vector<64x256xbf16>
    %cst_86 = arith.constant dense<0.000000e+00> : vector<99x256xf32>
    %101 = tpu.matmul %98, %100, %cst_86 {dimension_numbers = #tpu.dot_dimension_numbers<[1], [0], [0], [1], [0, 0, 1, 1], [], []>} : vector<99x64xbf16>, vector<64x256xbf16>, vector<99x256xf32> -> vector<99x256xf32>
    %102 = arith.addf %96, %101 : vector<99x256xf32>
    %c10_87 = arith.constant 10 : index
    %c0_88 = arith.constant 0 : index
    %103 = vector.load %arg10[%c10_87, %c0_88] : memref<116x64xf32, #tpu.memory_space<vmem>>, vector<99x64xf32>
    %104 = arith.truncf %103 : vector<99x64xf32> to vector<99x64xbf16>
    %c6_89 = arith.constant 6 : index
    %c0_90 = arith.constant 0 : index
    %c0_91 = arith.constant 0 : index
    %105 = vector.load %arg4[%c6_89, %c0_90, %c0_91] : memref<10x64x256xbf16, #tpu.memory_space<vmem>>, vector<1x64x256xbf16>
    %106 = vector.shape_cast %105 : vector<1x64x256xbf16> to vector<64x256xbf16>
    %cst_92 = arith.constant dense<0.000000e+00> : vector<99x256xf32>
    %107 = tpu.matmul %104, %106, %cst_92 {dimension_numbers = #tpu.dot_dimension_numbers<[1], [0], [0], [1], [0, 0, 1, 1], [], []>} : vector<99x64xbf16>, vector<64x256xbf16>, vector<99x256xf32> -> vector<99x256xf32>
    %108 = arith.addf %102, %107 : vector<99x256xf32>
    %c11_93 = arith.constant 11 : index
    %c0_94 = arith.constant 0 : index
    %109 = vector.load %arg10[%c11_93, %c0_94] : memref<116x64xf32, #tpu.memory_space<vmem>>, vector<99x64xf32>
    %110 = arith.truncf %109 : vector<99x64xf32> to vector<99x64xbf16>
    %c7_95 = arith.constant 7 : index
    %c0_96 = arith.constant 0 : index
    %c0_97 = arith.constant 0 : index
    %111 = vector.load %arg4[%c7_95, %c0_96, %c0_97] : memref<10x64x256xbf16, #tpu.memory_space<vmem>>, vector<1x64x256xbf16>
    %112 = vector.shape_cast %111 : vector<1x64x256xbf16> to vector<64x256xbf16>
    %cst_98 = arith.constant dense<0.000000e+00> : vector<99x256xf32>
    %113 = tpu.matmul %110, %112, %cst_98 {dimension_numbers = #tpu.dot_dimension_numbers<[1], [0], [0], [1], [0, 0, 1, 1], [], []>} : vector<99x64xbf16>, vector<64x256xbf16>, vector<99x256xf32> -> vector<99x256xf32>
    %114 = arith.addf %108, %113 : vector<99x256xf32>
    %c12_99 = arith.constant 12 : index
    %c0_100 = arith.constant 0 : index
    %115 = vector.load %arg10[%c12_99, %c0_100] : memref<116x64xf32, #tpu.memory_space<vmem>>, vector<99x64xf32>
    %116 = arith.truncf %115 : vector<99x64xf32> to vector<99x64xbf16>
    %c8_101 = arith.constant 8 : index
    %c0_102 = arith.constant 0 : index
    %c0_103 = arith.constant 0 : index
    %117 = vector.load %arg4[%c8_101, %c0_102, %c0_103] : memref<10x64x256xbf16, #tpu.memory_space<vmem>>, vector<1x64x256xbf16>
    %118 = vector.shape_cast %117 : vector<1x64x256xbf16> to vector<64x256xbf16>
    %cst_104 = arith.constant dense<0.000000e+00> : vector<99x256xf32>
    %119 = tpu.matmul %116, %118, %cst_104 {dimension_numbers = #tpu.dot_dimension_numbers<[1], [0], [0], [1], [0, 0, 1, 1], [], []>} : vector<99x64xbf16>, vector<64x256xbf16>, vector<99x256xf32> -> vector<99x256xf32>
    %120 = arith.addf %114, %119 : vector<99x256xf32>
    %c13 = arith.constant 13 : index
    %c0_105 = arith.constant 0 : index
    %121 = vector.load %arg10[%c13, %c0_105] : memref<116x64xf32, #tpu.memory_space<vmem>>, vector<99x64xf32>
    %122 = arith.truncf %121 : vector<99x64xf32> to vector<99x64xbf16>
    %c9_106 = arith.constant 9 : index
    %c0_107 = arith.constant 0 : index
    %c0_108 = arith.constant 0 : index
    %123 = vector.load %arg4[%c9_106, %c0_107, %c0_108] : memref<10x64x256xbf16, #tpu.memory_space<vmem>>, vector<1x64x256xbf16>
    %124 = vector.shape_cast %123 : vector<1x64x256xbf16> to vector<64x256xbf16>
    %cst_109 = arith.constant dense<0.000000e+00> : vector<99x256xf32>
    %125 = tpu.matmul %122, %124, %cst_109 {dimension_numbers = #tpu.dot_dimension_numbers<[1], [0], [0], [1], [0, 0, 1, 1], [], []>} : vector<99x64xbf16>, vector<64x256xbf16>, vector<99x256xf32> -> vector<99x256xf32>
    %126 = arith.addf %120, %125 : vector<99x256xf32>
    %127 = tpu.iota {dimensions = array<i32: 0>} : vector<20x99xi32>
    %128 = tpu.iota {dimensions = array<i32: 1>} : vector<20x99xi32>
    %c5_i32 = arith.constant 5 : i32
    %129 = vector.broadcast %c5_i32 : i32 to vector<20x99xi32>
    %130 = arith.muli %127, %129 : vector<20x99xi32>
    %131 = arith.cmpi eq, %128, %130 : vector<20x99xi32>
    %132 = arith.extui %131 : vector<20x99xi1> to vector<20x99xi32>
    %133 = arith.sitofp %132 : vector<20x99xi32> to vector<20x99xf32>
    %cst_110 = arith.constant dense<0.000000e+00> : vector<20x256xf32>
    %134 = tpu.matmul %133, %126, %cst_110 {dimension_numbers = #tpu.dot_dimension_numbers<[1], [0], [0], [1], [0, 0, 1, 1], [], []>} : vector<20x99xf32>, vector<99x256xf32>, vector<20x256xf32> -> vector<20x256xf32>
    %c0_111 = arith.constant 0 : index
    %c0_112 = arith.constant 0 : index
    %135 = vector.load %arg5[%c0_111, %c0_112] : memref<1x256xf32, #tpu.memory_space<vmem>>, vector<1x256xf32>
    %136 = vector.broadcast %135 : vector<1x256xf32> to vector<20x256xf32>
    %137 = arith.addf %134, %136 : vector<20x256xf32>
    %cst_113 = arith.constant 0.000000e+00 : f32
    %138 = vector.broadcast %cst_113 : f32 to vector<20x256xf32>
    %139 = arith.maximumf %137, %138 : vector<20x256xf32>
    %cst_114 = arith.constant 0.000000e+00 : f32
    %140 = vector.broadcast %cst_114 : f32 to vector<36x256xf32>
    %c0_115 = arith.constant 0 : index
    %c0_116 = arith.constant 0 : index
    %141 = vector.load %arg11[%c0_115, %c0_116] : memref<36x256xf32, #tpu.memory_space<vmem>>, vector<36x256xf32>
    tpu.vector_store %arg11[%c0_115, %c0_116], %140 {strides = array<i32>} : memref<36x256xf32, #tpu.memory_space<vmem>>, vector<36x256xf32>,
    %c8_117 = arith.constant 8 : index
    %c0_118 = arith.constant 0 : index
    %142 = vector.load %arg11[%c8_117, %c0_118] : memref<36x256xf32, #tpu.memory_space<vmem>>, vector<20x256xf32>
    tpu.vector_store %arg11[%c8_117, %c0_118], %139 {strides = array<i32>} : memref<36x256xf32, #tpu.memory_space<vmem>>, vector<20x256xf32>,
    %c4_119 = arith.constant 4 : index
    %c0_120 = arith.constant 0 : index
    %143 = vector.load %arg11[%c4_119, %c0_120] : memref<36x256xf32, #tpu.memory_space<vmem>>, vector<19x256xf32>
    %144 = arith.truncf %143 : vector<19x256xf32> to vector<19x256xbf16>
    %c0_121 = arith.constant 0 : index
    %c0_122 = arith.constant 0 : index
    %c0_123 = arith.constant 0 : index
    %145 = vector.load %arg6[%c0_121, %c0_122, %c0_123] : memref<10x256x32xbf16, #tpu.memory_space<vmem>>, vector<1x256x32xbf16>
    %146 = vector.shape_cast %145 : vector<1x256x32xbf16> to vector<256x32xbf16>
    %cst_124 = arith.constant dense<0.000000e+00> : vector<19x32xf32>
    %147 = tpu.matmul %144, %146, %cst_124 {dimension_numbers = #tpu.dot_dimension_numbers<[1], [0], [0], [1], [0, 0, 1, 1], [], []>} : vector<19x256xbf16>, vector<256x32xbf16>, vector<19x32xf32> -> vector<19x32xf32>
    %c5_125 = arith.constant 5 : index
    %c0_126 = arith.constant 0 : index
    %148 = vector.load %arg11[%c5_125, %c0_126] : memref<36x256xf32, #tpu.memory_space<vmem>>, vector<19x256xf32>
    %149 = arith.truncf %148 : vector<19x256xf32> to vector<19x256xbf16>
    %c1_127 = arith.constant 1 : index
    %c0_128 = arith.constant 0 : index
    %c0_129 = arith.constant 0 : index
    %150 = vector.load %arg6[%c1_127, %c0_128, %c0_129] : memref<10x256x32xbf16, #tpu.memory_space<vmem>>, vector<1x256x32xbf16>
    %151 = vector.shape_cast %150 : vector<1x256x32xbf16> to vector<256x32xbf16>
    %cst_130 = arith.constant dense<0.000000e+00> : vector<19x32xf32>
    %152 = tpu.matmul %149, %151, %cst_130 {dimension_numbers = #tpu.dot_dimension_numbers<[1], [0], [0], [1], [0, 0, 1, 1], [], []>} : vector<19x256xbf16>, vector<256x32xbf16>, vector<19x32xf32> -> vector<19x32xf32>
    %153 = arith.addf %147, %152 : vector<19x32xf32>
    %c6_131 = arith.constant 6 : index
    %c0_132 = arith.constant 0 : index
    %154 = vector.load %arg11[%c6_131, %c0_132] : memref<36x256xf32, #tpu.memory_space<vmem>>, vector<19x256xf32>
    %155 = arith.truncf %154 : vector<19x256xf32> to vector<19x256xbf16>
    %c2_133 = arith.constant 2 : index
    %c0_134 = arith.constant 0 : index
    %c0_135 = arith.constant 0 : index
    %156 = vector.load %arg6[%c2_133, %c0_134, %c0_135] : memref<10x256x32xbf16, #tpu.memory_space<vmem>>, vector<1x256x32xbf16>
    %157 = vector.shape_cast %156 : vector<1x256x32xbf16> to vector<256x32xbf16>
    %cst_136 = arith.constant dense<0.000000e+00> : vector<19x32xf32>
    %158 = tpu.matmul %155, %157, %cst_136 {dimension_numbers = #tpu.dot_dimension_numbers<[1], [0], [0], [1], [0, 0, 1, 1], [], []>} : vector<19x256xbf16>, vector<256x32xbf16>, vector<19x32xf32> -> vector<19x32xf32>
    %159 = arith.addf %153, %158 : vector<19x32xf32>
    %c7_137 = arith.constant 7 : index
    %c0_138 = arith.constant 0 : index
    %160 = vector.load %arg11[%c7_137, %c0_138] : memref<36x256xf32, #tpu.memory_space<vmem>>, vector<19x256xf32>
    %161 = arith.truncf %160 : vector<19x256xf32> to vector<19x256xbf16>
    %c3_139 = arith.constant 3 : index
    %c0_140 = arith.constant 0 : index
    %c0_141 = arith.constant 0 : index
    %162 = vector.load %arg6[%c3_139, %c0_140, %c0_141] : memref<10x256x32xbf16, #tpu.memory_space<vmem>>, vector<1x256x32xbf16>
    %163 = vector.shape_cast %162 : vector<1x256x32xbf16> to vector<256x32xbf16>
    %cst_142 = arith.constant dense<0.000000e+00> : vector<19x32xf32>
    %164 = tpu.matmul %161, %163, %cst_142 {dimension_numbers = #tpu.dot_dimension_numbers<[1], [0], [0], [1], [0, 0, 1, 1], [], []>} : vector<19x256xbf16>, vector<256x32xbf16>, vector<19x32xf32> -> vector<19x32xf32>
    %165 = arith.addf %159, %164 : vector<19x32xf32>
    %c8_143 = arith.constant 8 : index
    %c0_144 = arith.constant 0 : index
    %166 = vector.load %arg11[%c8_143, %c0_144] : memref<36x256xf32, #tpu.memory_space<vmem>>, vector<19x256xf32>
    %167 = arith.truncf %166 : vector<19x256xf32> to vector<19x256xbf16>
    %c4_145 = arith.constant 4 : index
    %c0_146 = arith.constant 0 : index
    %c0_147 = arith.constant 0 : index
    %168 = vector.load %arg6[%c4_145, %c0_146, %c0_147] : memref<10x256x32xbf16, #tpu.memory_space<vmem>>, vector<1x256x32xbf16>
    %169 = vector.shape_cast %168 : vector<1x256x32xbf16> to vector<256x32xbf16>
    %cst_148 = arith.constant dense<0.000000e+00> : vector<19x32xf32>
    %170 = tpu.matmul %167, %169, %cst_148 {dimension_numbers = #tpu.dot_dimension_numbers<[1], [0], [0], [1], [0, 0, 1, 1], [], []>} : vector<19x256xbf16>, vector<256x32xbf16>, vector<19x32xf32> -> vector<19x32xf32>
    %171 = arith.addf %165, %170 : vector<19x32xf32>
    %c9_149 = arith.constant 9 : index
    %c0_150 = arith.constant 0 : index
    %172 = vector.load %arg11[%c9_149, %c0_150] : memref<36x256xf32, #tpu.memory_space<vmem>>, vector<19x256xf32>
    %173 = arith.truncf %172 : vector<19x256xf32> to vector<19x256xbf16>
    %c5_151 = arith.constant 5 : index
    %c0_152 = arith.constant 0 : index
    %c0_153 = arith.constant 0 : index
    %174 = vector.load %arg6[%c5_151, %c0_152, %c0_153] : memref<10x256x32xbf16, #tpu.memory_space<vmem>>, vector<1x256x32xbf16>
    %175 = vector.shape_cast %174 : vector<1x256x32xbf16> to vector<256x32xbf16>
    %cst_154 = arith.constant dense<0.000000e+00> : vector<19x32xf32>
    %176 = tpu.matmul %173, %175, %cst_154 {dimension_numbers = #tpu.dot_dimension_numbers<[1], [0], [0], [1], [0, 0, 1, 1], [], []>} : vector<19x256xbf16>, vector<256x32xbf16>, vector<19x32xf32> -> vector<19x32xf32>
    %177 = arith.addf %171, %176 : vector<19x32xf32>
    %c10_155 = arith.constant 10 : index
    %c0_156 = arith.constant 0 : index
    %178 = vector.load %arg11[%c10_155, %c0_156] : memref<36x256xf32, #tpu.memory_space<vmem>>, vector<19x256xf32>
    %179 = arith.truncf %178 : vector<19x256xf32> to vector<19x256xbf16>
    %c6_157 = arith.constant 6 : index
    %c0_158 = arith.constant 0 : index
    %c0_159 = arith.constant 0 : index
    %180 = vector.load %arg6[%c6_157, %c0_158, %c0_159] : memref<10x256x32xbf16, #tpu.memory_space<vmem>>, vector<1x256x32xbf16>
    %181 = vector.shape_cast %180 : vector<1x256x32xbf16> to vector<256x32xbf16>
    %cst_160 = arith.constant dense<0.000000e+00> : vector<19x32xf32>
    %182 = tpu.matmul %179, %181, %cst_160 {dimension_numbers = #tpu.dot_dimension_numbers<[1], [0], [0], [1], [0, 0, 1, 1], [], []>} : vector<19x256xbf16>, vector<256x32xbf16>, vector<19x32xf32> -> vector<19x32xf32>
    %183 = arith.addf %177, %182 : vector<19x32xf32>
    %c11_161 = arith.constant 11 : index
    %c0_162 = arith.constant 0 : index
    %184 = vector.load %arg11[%c11_161, %c0_162] : memref<36x256xf32, #tpu.memory_space<vmem>>, vector<19x256xf32>
    %185 = arith.truncf %184 : vector<19x256xf32> to vector<19x256xbf16>
    %c7_163 = arith.constant 7 : index
    %c0_164 = arith.constant 0 : index
    %c0_165 = arith.constant 0 : index
    %186 = vector.load %arg6[%c7_163, %c0_164, %c0_165] : memref<10x256x32xbf16, #tpu.memory_space<vmem>>, vector<1x256x32xbf16>
    %187 = vector.shape_cast %186 : vector<1x256x32xbf16> to vector<256x32xbf16>
    %cst_166 = arith.constant dense<0.000000e+00> : vector<19x32xf32>
    %188 = tpu.matmul %185, %187, %cst_166 {dimension_numbers = #tpu.dot_dimension_numbers<[1], [0], [0], [1], [0, 0, 1, 1], [], []>} : vector<19x256xbf16>, vector<256x32xbf16>, vector<19x32xf32> -> vector<19x32xf32>
    %189 = arith.addf %183, %188 : vector<19x32xf32>
    %c12_167 = arith.constant 12 : index
    %c0_168 = arith.constant 0 : index
    %190 = vector.load %arg11[%c12_167, %c0_168] : memref<36x256xf32, #tpu.memory_space<vmem>>, vector<19x256xf32>
    %191 = arith.truncf %190 : vector<19x256xf32> to vector<19x256xbf16>
    %c8_169 = arith.constant 8 : index
    %c0_170 = arith.constant 0 : index
    %c0_171 = arith.constant 0 : index
    %192 = vector.load %arg6[%c8_169, %c0_170, %c0_171] : memref<10x256x32xbf16, #tpu.memory_space<vmem>>, vector<1x256x32xbf16>
    %193 = vector.shape_cast %192 : vector<1x256x32xbf16> to vector<256x32xbf16>
    %cst_172 = arith.constant dense<0.000000e+00> : vector<19x32xf32>
    %194 = tpu.matmul %191, %193, %cst_172 {dimension_numbers = #tpu.dot_dimension_numbers<[1], [0], [0], [1], [0, 0, 1, 1], [], []>} : vector<19x256xbf16>, vector<256x32xbf16>, vector<19x32xf32> -> vector<19x32xf32>
    %195 = arith.addf %189, %194 : vector<19x32xf32>
    %c13_173 = arith.constant 13 : index
    %c0_174 = arith.constant 0 : index
    %196 = vector.load %arg11[%c13_173, %c0_174] : memref<36x256xf32, #tpu.memory_space<vmem>>, vector<19x256xf32>
    %197 = arith.truncf %196 : vector<19x256xf32> to vector<19x256xbf16>
    %c9_175 = arith.constant 9 : index
    %c0_176 = arith.constant 0 : index
    %c0_177 = arith.constant 0 : index
    %198 = vector.load %arg6[%c9_175, %c0_176, %c0_177] : memref<10x256x32xbf16, #tpu.memory_space<vmem>>, vector<1x256x32xbf16>
    %199 = vector.shape_cast %198 : vector<1x256x32xbf16> to vector<256x32xbf16>
    %cst_178 = arith.constant dense<0.000000e+00> : vector<19x32xf32>
    %200 = tpu.matmul %197, %199, %cst_178 {dimension_numbers = #tpu.dot_dimension_numbers<[1], [0], [0], [1], [0, 0, 1, 1], [], []>} : vector<19x256xbf16>, vector<256x32xbf16>, vector<19x32xf32> -> vector<19x32xf32>
    %201 = arith.addf %195, %200 : vector<19x32xf32>
    %202 = tpu.iota {dimensions = array<i32: 0>} : vector<4x19xi32>
    %203 = tpu.iota {dimensions = array<i32: 1>} : vector<4x19xi32>
    %c5_i32_179 = arith.constant 5 : i32
    %204 = vector.broadcast %c5_i32_179 : i32 to vector<4x19xi32>
    %205 = arith.muli %202, %204 : vector<4x19xi32>
    %206 = arith.cmpi eq, %203, %205 : vector<4x19xi32>
    %207 = arith.extui %206 : vector<4x19xi1> to vector<4x19xi32>
    %208 = arith.sitofp %207 : vector<4x19xi32> to vector<4x19xf32>
    %cst_180 = arith.constant dense<0.000000e+00> : vector<4x32xf32>
    %209 = tpu.matmul %208, %201, %cst_180 {dimension_numbers = #tpu.dot_dimension_numbers<[1], [0], [0], [1], [0, 0, 1, 1], [], []>} : vector<4x19xf32>, vector<19x32xf32>, vector<4x32xf32> -> vector<4x32xf32>
    %c0_181 = arith.constant 0 : index
    %c0_182 = arith.constant 0 : index
    %210 = vector.load %arg7[%c0_181, %c0_182] : memref<1x32xf32, #tpu.memory_space<vmem>>, vector<1x32xf32>
    %211 = vector.broadcast %210 : vector<1x32xf32> to vector<4x32xf32>
    %212 = arith.addf %209, %211 : vector<4x32xf32>
    %cst_183 = arith.constant 0.000000e+00 : f32
    %213 = vector.broadcast %cst_183 : f32 to vector<4x32xf32>
    %214 = arith.maximumf %212, %213 : vector<4x32xf32>
    %c0_184 = arith.constant 0 : index
    %c0_185 = arith.constant 0 : index
    %c0_186 = arith.constant 0 : index
    %215 = vector.load %arg8[%c0_184, %c0_185, %c0_186] : memref<1x4x32xf32, #tpu.memory_space<vmem>>, vector<1x4x32xf32>
    %216 = vector.shape_cast %215 : vector<1x4x32xf32> to vector<4x32xf32>
    %217 = vector.shape_cast %214 : vector<4x32xf32> to vector<1x4x32xf32>
    tpu.vector_store %arg8[%c0_184, %c0_185, %c0_186], %217 {strides = array<i32>} : memref<1x4x32xf32, #tpu.memory_space<vmem>>, vector<1x4x32xf32>,
    return
  }
  func.func @transform_0(%arg0: i32) -> (i32, i32, i32) {
    %c0_i32 = arith.constant 0 : i32
    %c0_i32_0 = arith.constant 0 : i32
    %c0_i32_1 = arith.constant 0 : i32
    return %arg0, %c0_i32, %c0_i32_0 : i32, i32, i32
  }
  func.func @transform_1(%arg0: i32) -> (i32, i32, i32) {
    %c0_i32 = arith.constant 0 : i32
    %c0_i32_0 = arith.constant 0 : i32
    %c0_i32_1 = arith.constant 0 : i32
    %c0_i32_2 = arith.constant 0 : i32
    return %c0_i32, %c0_i32_0, %c0_i32_1 : i32, i32, i32
  }
  func.func @transform_2(%arg0: i32) -> (i32, i32) {
    %c0_i32 = arith.constant 0 : i32
    %c0_i32_0 = arith.constant 0 : i32
    %c0_i32_1 = arith.constant 0 : i32
    return %c0_i32, %c0_i32_0 : i32, i32
  }
  func.func @transform_3(%arg0: i32) -> (i32, i32, i32) {
    %c0_i32 = arith.constant 0 : i32
    %c0_i32_0 = arith.constant 0 : i32
    %c0_i32_1 = arith.constant 0 : i32
    %c0_i32_2 = arith.constant 0 : i32
    return %c0_i32, %c0_i32_0, %c0_i32_1 : i32, i32, i32
  }
  func.func @transform_4(%arg0: i32) -> (i32, i32) {
    %c0_i32 = arith.constant 0 : i32
    %c0_i32_0 = arith.constant 0 : i32
    %c0_i32_1 = arith.constant 0 : i32
    return %c0_i32, %c0_i32_0 : i32, i32
  }
  func.func @transform_5(%arg0: i32) -> (i32, i32, i32) {
    %c0_i32 = arith.constant 0 : i32
    %c0_i32_0 = arith.constant 0 : i32
    %c0_i32_1 = arith.constant 0 : i32
    %c0_i32_2 = arith.constant 0 : i32
    return %c0_i32, %c0_i32_0, %c0_i32_1 : i32, i32, i32
  }
  func.func @transform_6(%arg0: i32) -> (i32, i32) {
    %c0_i32 = arith.constant 0 : i32
    %c0_i32_0 = arith.constant 0 : i32
    %c0_i32_1 = arith.constant 0 : i32
    return %c0_i32, %c0_i32_0 : i32, i32
  }
  func.func @transform_7(%arg0: i32) -> (i32, i32, i32) {
    %c0_i32 = arith.constant 0 : i32
    %c0_i32_0 = arith.constant 0 : i32
    %c0_i32_1 = arith.constant 0 : i32
    return %arg0, %c0_i32, %c0_i32_0 : i32, i32, i32
  }
}

</mosaic_0001>

<bundles_post_ra>
// kernel: conv_embedding_forward.1
= control target key start
LH: loop header
LB: loop body
LE: loop exit
PB: predicated region body
PF: predicated region fallthrough
CT: control target
= control target key end

     0   :  { %12 = vsyncpa [#allocation6], 0  ;;  %s15350_s0 = inlined_call_operand.vmem [shape: f32[2,400,8], index: 0, kind: input, shape index: {}]   ;;  %s15351_s1 = inlined_call_operand.vmem [shape: bf16[8,8,64], index: 1, kind: input, shape index: {}]   ;;  %s15352_s2 = inlined_call_operand.vmem [shape: f32[1,64], index: 2, kind: input, shape index: {}]   ;;  %s15353_s3 = inlined_call_operand.vmem [shape: bf16[10,64,256], index: 3, kind: input, shape index: {}]   ;;  %s15354_s4 = inlined_call_operand.vmem [shape: f32[1,256], index: 4, kind: input, shape index: {}]   ;;  %s15355_s5 = inlined_call_operand.vmem [shape: bf16[10,256,32], index: 5, kind: input, shape index: {}]   ;;  %s15356_s6 = inlined_call_operand.vmem [shape: f32[1,32], index: 6, kind: input, shape index: {}]   ;;  %s15357_s7 = inlined_call_operand.hbm [shape: f32[2,4,32], index: 7, kind: output, shape index: {}]  }
   0x1   :  { %14 = vsyncpa [#allocation6 + $0x1], 0  ;;  %s12751_s24 = smov 0   ;;  %s12753_s25 = smov 0  }
   0x2   :  { %s12755_s26 = smov 0   ;;  %s12757_s27 = smov 0  }
   0x3 LB: > { %s12772_s28 = sadd.s32 4294967295, %s12702_s27   ;;  %s8925_s29 = sadd.s32 4294967294, %s12702_s27   ;;  %s12702_s27 = sphi %s12757_s27, %s15377_s27   ;;  %s12698_s26 = sphi %s12755_s26, %s15376_s26   ;;  %s12694_s25 = sphi %s12753_s25, %s15375_s25   ;;  %s12690_s24 = sphi %s12751_s24, %s15374_s24  }
   0x4   : > { %s12776_s30 = sadd.s32 1, %s12702_s27   ;;  %s179_s8 = sadd.s32 1, %s12698_s26 }
   0x5   : > { %s176_s9 = ssub.s32 %s12702_s27, %s12776_s30  ;;  %p189_p0 = scmp.ne.s32.totalorder %s12698_s26, %s12694_s25 }
   0x6   : > { %p177_p1 = scmp.eq.s32.totalorder %s176_s9, 0  ;;  %p190_p2 = scmp.eq.s32.totalorder %s12772_s28, 1 }
   0x7   : > { %p195_p3 = scmp.ne.s32.totalorder %s12694_s25, %s12690_s24  ;;  %p196_p4 = scmp.eq.s32.totalorder %s8925_s29, 1 }
   0x8   : > { %s12787_s10 = scalar_select %p177_p1, %s12698_s26, %s179_s8  }
   0x9   : > { %p12789_p5 = por %p190_p2, %p189_p0  ;;  %p12793_p6 = por %p196_p4, %p195_p3 }
   0xa   : > { %p8928_p7 = scmp.ge.s32.totalorder %s12702_s27, 1  ;;  %p240_p8 = scmp.lt.s32.totalorder %s12702_s27, 3 }
   0xc   : > { %p241_p9 = pnand %p8928_p7, %p240_p8 }
   0xe   : > { %244 = sbr.rel (%p241_p9) target bundleno = 3549 (0xddd), region = 48 }
  0x15   : > { %v506_v0 = vld [vmem:[%s15351_s1] sm:$0xf]  ;;  %vm659_vm0 = vcmask 1043456   ;;  %p272_p10 = scmp.lt.s32.totalorder %s12772_s28, 1  ;;  %v12704_v1 = vmov 0.0   ;;  %vm12705_vm1 = vmmov 0  }
  0x16   : > { %10594 = vmatprep.subr.bf16.mxu0 %v12704_v1  ;;  %6624 = vst [vmem:[#allocation4] sm:$0xff] %v12704_v1  ;;  %6625 = vst [vmem:[#allocation4 + $0x8] sm:$0xff] %v12704_v1  ;;  %v12809_v2 = vsel %vm659_vm0, %v506_v0, 0  ;;  %10596 = vmatprep.mubr.msk.bf16.mxu0 %vm12705_vm1, %v12704_v1  ;;  %vm328_vm2 = vcmask 64512   ;;  %v8982_v15 = vld [vmem:[%s15351_s1 + $0x8] sm:$0xf] }
  0x17   : > { %6630 = vst [vmem:[#allocation4 + $0x30] sm:$0xff] %v12704_v1  ;;  %6631 = vst [vmem:[#allocation4 + $0x38] sm:$0xff] %v12704_v1  ;;  %10595 = vmatpush3.bf16.msra.mxu0 %v12809_v2  ;;  %s12815_s15 = scalar_select %p272_p10, %s12772_s28, 1  ;;  %10492 = vmatprep.subr.bf16.mxu1 %v12704_v1  ;;  %v1360_v31 = vsel %vm659_vm0, %v8982_v15, 0 }
  0x18   : > { %329 = vst.msk [vmem:[#allocation2] sm:$0xff] %vm328_vm2, %v12704_v1  ;;  %330 = vst.msk [vmem:[#allocation2 + $0x8] sm:$0xff] %vm328_vm2, %v12704_v1  ;;  %10696 = vmatprep.subr.bf16.mxu0 %v12704_v1  ;;  %10494 = vmatprep.mubr.msk.bf16.mxu1 %vm12705_vm1, %v12704_v1  ;;  %s269_s14 = sand.u32 1, %s12694_s25   ;;  %s9926_s18 = sshll.u32 %s12772_s28, 6 }
  0x19   : > { %331 = vst.msk [vmem:[#allocation2 + $0x10] sm:$0xff] %vm328_vm2, %v12704_v1  ;;  %332 = vst.msk [vmem:[#allocation2 + $0x18] sm:$0xff] %vm328_vm2, %v12704_v1  ;;  %s12308_s16 = smul.u32 400, %s12815_s15  ;;  %s8929_s15 = sshll.u32 %s269_s14, 2 }
  0x1a   : > { %333 = vst.msk [vmem:[#allocation2 + $0x20] sm:$0xff] %vm328_vm2, %v12704_v1  ;;  %334 = vst.msk [vmem:[#allocation2 + $0x28] sm:$0xff] %vm328_vm2, %v12704_v1  ;;  %s15308_s23 = scalar_lea.hbm %s15357_s7, %s9926_s18  ;;  %s8853_s29 = scalar_lea.sflag [#allocation6], %s269_s14 }
  0x1b   : > { %335 = vst.msk [vmem:[#allocation2 + $0x30] sm:$0xff] %vm328_vm2, %v12704_v1  ;;  %336 = vst.msk [vmem:[#allocation2 + $0x38] sm:$0xff] %vm328_vm2, %v12704_v1  ;;  %s12929_s19 = scalar_lea.vmem %s15350_s0, %s12308_s16  ;;  %s12710_s28 = smov [#allocation5]  }
  0x1c   : > { %337 = vst.msk [vmem:[#allocation2 + $0x40] sm:$0xff] %vm328_vm2, %v12704_v1  ;;  %338 = vst.msk [vmem:[#allocation2 + $0x48] sm:$0xff] %vm328_vm2, %v12704_v1  ;;  %v278_v3 = vld [vmem:[%s12929_s19] sm:$0xff]  ;;  %v279_v4 = vld [vmem:[%s12929_s19 + $0x8] sm:$0xff]  ;;  %s12644_s9 = sshll.u32 %s12710_s28, 4  ;;  %s12645_s9 = int_to_ptr.vmem [resolvable:$false] %s12644_s9 }
  0x1d   : > { %339 = vst.msk [vmem:[#allocation2 + $0x50] sm:$0xff] %vm328_vm2, %v12704_v1  ;;  %340 = vst.msk [vmem:[#allocation2 + $0x58] sm:$0xff] %vm328_vm2, %v12704_v1  ;;  %v280_v5 = vld [vmem:[%s12929_s19 + $0x10] sm:$0xff]  ;;  %v281_v6 = vld [vmem:[%s12929_s19 + $0x18] sm:$0xff]  ;;  %s12646_s13 = scalar_lea.vmem %s12645_s9, 128 }
  0x1e   : > { %341 = vst.msk [vmem:[#allocation2 + $0x60] sm:$0xff] %vm328_vm2, %v12704_v1  ;;  %342 = vst.msk [vmem:[#allocation2 + $0x68] sm:$0xff] %vm328_vm2, %v12704_v1  ;;  %v282_v7 = vld [vmem:[%s12929_s19 + $0x20] sm:$0xff]  ;;  %v283_v8 = vld [vmem:[%s12929_s19 + $0x28] sm:$0xff] }
  0x1f   : > { %343 = vst.msk [vmem:[#allocation2 + $0x70] sm:$0xff] %vm328_vm2, %v12704_v1  ;;  %344 = vst.msk [vmem:[#allocation2 + $0x78] sm:$0xff] %vm328_vm2, %v12704_v1  ;;  %v284_v9 = vld [vmem:[%s12929_s19 + $0x30] sm:$0xff]  ;;  %v285_v10 = vld [vmem:[%s12929_s19 + $0x38] sm:$0xff] }
  0x20   : > { %345 = vst.msk [vmem:[#allocation2 + $0x80] sm:$0xff] %vm328_vm2, %v12704_v1  ;;  %346 = vst.msk [vmem:[#allocation2 + $0x88] sm:$0xff] %vm328_vm2, %v12704_v1  ;;  %v286_v11 = vld [vmem:[%s12929_s19 + $0x40] sm:$0xff]  ;;  %v287_v12 = vld [vmem:[%s12929_s19 + $0x48] sm:$0xff] }
  0x21   : > { %347 = vst.msk [vmem:[#allocation2 + $0x90] sm:$0xff] %vm328_vm2, %v12704_v1  ;;  %348 = vst.msk [vmem:[#allocation2 + $0x98] sm:$0xff] %vm328_vm2, %v12704_v1  ;;  %v288_v13 = vld [vmem:[%s12929_s19 + $0x50] sm:$0xff]  ;;  %v289_v14 = vld [vmem:[%s12929_s19 + $0x58] sm:$0xff] }
  0x22   : > { %349 = vst.msk [vmem:[#allocation2 + $0xa0] sm:$0xff] %vm328_vm2, %v12704_v1  ;;  %350 = vst.msk [vmem:[#allocation2 + $0xa8] sm:$0xff] %vm328_vm2, %v12704_v1  ;;  %v290_v16 = vld [vmem:[%s12929_s19 + $0x60] sm:$0xff]  ;;  %v291_v17 = vld [vmem:[%s12929_s19 + $0x68] sm:$0xff] }
  0x23   : > { %351 = vst.msk [vmem:[#allocation2 + $0xb0] sm:$0xff] %vm328_vm2, %v12704_v1  ;;  %352 = vst.msk [vmem:[#allocation2 + $0xb8] sm:$0xff] %vm328_vm2, %v12704_v1  ;;  %v292_v18 = vld [vmem:[%s12929_s19 + $0x70] sm:$0xff]  ;;  %v293_v19 = vld [vmem:[%s12929_s19 + $0x78] sm:$0xff] }
  0x24   : > { %353 = vst.msk [vmem:[#allocation2 + $0xc0] sm:$0xff] %vm328_vm2, %v12704_v1  ;;  %354 = vst.msk [vmem:[#allocation2 + $0xc8] sm:$0xff] %vm328_vm2, %v12704_v1  ;;  %v294_v20 = vld [vmem:[%s12929_s19 + $0x80] sm:$0xff]  ;;  %v295_v21 = vld [vmem:[%s12929_s19 + $0x88] sm:$0xff] }
  0x25   : > { %355 = vst.msk [vmem:[#allocation2 + $0xd0] sm:$0xff] %vm328_vm2, %v12704_v1  ;;  %356 = vst.msk [vmem:[#allocation2 + $0xd8] sm:$0xff] %vm328_vm2, %v12704_v1  ;;  %v296_v22 = vld [vmem:[%s12929_s19 + $0x90] sm:$0xff]  ;;  %v297_v23 = vld [vmem:[%s12929_s19 + $0x98] sm:$0xff] }
  0x26   : > { %357 = vst.msk [vmem:[#allocation2 + $0xe0] sm:$0xff] %vm328_vm2, %v12704_v1  ;;  %358 = vst.msk [vmem:[#allocation2 + $0xe8] sm:$0xff] %vm328_vm2, %v12704_v1  ;;  %v298_v24 = vld [vmem:[%s12929_s19 + $0xa0] sm:$0xff]  ;;  %v299_v25 = vld [vmem:[%s12929_s19 + $0xa8] sm:$0xff] }
  0x27   : > { %359 = vst.msk [vmem:[#allocation2 + $0xf0] sm:$0xff] %vm328_vm2, %v12704_v1  ;;  %360 = vst.msk [vmem:[#allocation2 + $0xf8] sm:$0xff] %vm328_vm2, %v12704_v1  ;;  %v300_v26 = vld [vmem:[%s12929_s19 + $0xb0] sm:$0xff]  ;;  %v301_v27 = vld [vmem:[%s12929_s19 + $0xb8] sm:$0xff] }
  0x28   : > { %361 = vst.msk [vmem:[#allocation2 + $0x100] sm:$0xff] %vm328_vm2, %v12704_v1  ;;  %362 = vst.msk [vmem:[#allocation2 + $0x108] sm:$0xff] %vm328_vm2, %v12704_v1  ;;  %v302_v35 = vld [vmem:[%s12929_s19 + $0xc0] sm:$0xff]  ;;  %v303_v36 = vld [vmem:[%s12929_s19 + $0xc8] sm:$0xff] }
  0x29   : > { %363 = vst.msk [vmem:[#allocation2 + $0x110] sm:$0xff] %vm328_vm2, %v12704_v1  ;;  %364 = vst.msk [vmem:[#allocation2 + $0x118] sm:$0xff] %vm328_vm2, %v12704_v1  ;;  %v304_v61 = vld [vmem:[%s12929_s19 + $0xd0] sm:$0xff]  ;;  %v305_v62 = vld [vmem:[%s12929_s19 + $0xd8] sm:$0xff] }
  0x2a   : > { %365 = vst.msk [vmem:[#allocation2 + $0x120] sm:$0xff] %vm328_vm2, %v12704_v1  ;;  %366 = vst.msk [vmem:[#allocation2 + $0x128] sm:$0xff] %vm328_vm2, %v12704_v1  ;;  %v311_v15 = vld [vmem:[%s12929_s19 + $0x108] sm:$0xff] }
  0x2b   : > { %367 = vst.msk [vmem:[#allocation2 + $0x130] sm:$0xff] %vm328_vm2, %v12704_v1  ;;  %368 = vst.msk [vmem:[#allocation2 + $0x138] sm:$0xff] %vm328_vm2, %v12704_v1 }
  0x2c   : > { %369 = vst.msk [vmem:[#allocation2 + $0x140] sm:$0xff] %vm328_vm2, %v12704_v1  ;;  %370 = vst.msk [vmem:[#allocation2 + $0x148] sm:$0xff] %vm328_vm2, %v12704_v1 }
  0x2d   : > { %371 = vst.msk [vmem:[#allocation2 + $0x150] sm:$0xff] %vm328_vm2, %v12704_v1  ;;  %372 = vst.msk [vmem:[#allocation2 + $0x158] sm:$0xff] %vm328_vm2, %v12704_v1 }
  0x2e   : > { %373 = vst.msk [vmem:[#allocation2 + $0x160] sm:$0xff] %vm328_vm2, %v12704_v1  ;;  %374 = vst.msk [vmem:[#allocation2 + $0x168] sm:$0xff] %vm328_vm2, %v12704_v1 }
  0x2f   : > { %375 = vst.msk [vmem:[#allocation2 + $0x170] sm:$0xff] %vm328_vm2, %v12704_v1  ;;  %376 = vst.msk [vmem:[#allocation2 + $0x178] sm:$0xff] %vm328_vm2, %v12704_v1 }
  0x30   : > { %377 = vst.msk [vmem:[#allocation2 + $0x180] sm:$0xff] %vm328_vm2, %v12704_v1  ;;  %378 = vst.msk [vmem:[#allocation2 + $0x188] sm:$0xff] %vm328_vm2, %v12704_v1 }
  0x31   : > { %379 = vst.msk [vmem:[#allocation2 + $0x190] sm:$0xff] %vm328_vm2, %v12704_v1  ;;  %380 = vst.msk [vmem:[#allocation2 + $0x198] sm:$0xff] %vm328_vm2, %v12704_v1 }
  0x32   : > { %381 = vst.msk [vmem:[#allocation2 + $0x8] sm:$0xff] %vm328_vm2, %v278_v3  ;;  %382 = vst.msk [vmem:[#allocation2 + $0x10] sm:$0xff] %vm328_vm2, %v279_v4  ;;  %v306_v4 = vld [vmem:[%s12929_s19 + $0xe0] sm:$0xff] }
  0x33   : > { %383 = vst.msk [vmem:[#allocation2 + $0x18] sm:$0xff] %vm328_vm2, %v280_v5  ;;  %384 = vst.msk [vmem:[#allocation2 + $0x20] sm:$0xff] %vm328_vm2, %v281_v6  ;;  %v307_v5 = vld [vmem:[%s12929_s19 + $0xe8] sm:$0xff] }
  0x34   : > { %385 = vst.msk [vmem:[#allocation2 + $0x28] sm:$0xff] %vm328_vm2, %v282_v7  ;;  %386 = vst.msk [vmem:[#allocation2 + $0x30] sm:$0xff] %vm328_vm2, %v283_v8 }
  0x35   : > { %387 = vst.msk [vmem:[#allocation2 + $0x38] sm:$0xff] %vm328_vm2, %v284_v9  ;;  %388 = vst.msk [vmem:[#allocation2 + $0x40] sm:$0xff] %vm328_vm2, %v285_v10  ;;  %v308_v9 = vld [vmem:[%s12929_s19 + $0xf0] sm:$0xff]  ;;  %v309_v10 = vld [vmem:[%s12929_s19 + $0xf8] sm:$0xff] }
  0x36   : > { %389 = vst.msk [vmem:[#allocation2 + $0x48] sm:$0xff] %vm328_vm2, %v286_v11  ;;  %390 = vst.msk [vmem:[#allocation2 + $0x50] sm:$0xff] %vm328_vm2, %v287_v12 }
  0x37   : > { %391 = vst.msk [vmem:[#allocation2 + $0x58] sm:$0xff] %vm328_vm2, %v288_v13  ;;  %392 = vst.msk [vmem:[#allocation2 + $0x60] sm:$0xff] %vm328_vm2, %v289_v14  ;;  %v310_v14 = vld [vmem:[%s12929_s19 + $0x100] sm:$0xff] }
  0x38   : > { %393 = vst.msk [vmem:[#allocation2 + $0x68] sm:$0xff] %vm328_vm2, %v290_v16  ;;  %394 = vst.msk [vmem:[#allocation2 + $0x70] sm:$0xff] %vm328_vm2, %v291_v17 }
  0x39   : > { %395 = vst.msk [vmem:[#allocation2 + $0x78] sm:$0xff] %vm328_vm2, %v292_v18  ;;  %396 = vst.msk [vmem:[#allocation2 + $0x80] sm:$0xff] %vm328_vm2, %v293_v19  ;;  %v431_v28 = vld [vmem:[#allocation2 + $0x5] sm:$0xff]  ;;  %v432_v29 = vld [vmem:[#allocation2 + $0xd] sm:$0xff] }
  0x3a   : > { %397 = vst.msk [vmem:[#allocation2 + $0x88] sm:$0xff] %vm328_vm2, %v294_v20  ;;  %398 = vst.msk [vmem:[#allocation2 + $0x90] sm:$0xff] %vm328_vm2, %v295_v21  ;;  %v481_v30 = vpack.c.bf16 %v432_v29, %v431_v28  ;;  %v433_v32 = vld [vmem:[#allocation2 + $0x15] sm:$0xff]  ;;  %v434_v33 = vld [vmem:[#allocation2 + $0x1d] sm:$0xff] }
  0x3b   : > { %399 = vst.msk [vmem:[#allocation2 + $0x98] sm:$0xff] %vm328_vm2, %v296_v22  ;;  %400 = vst.msk [vmem:[#allocation2 + $0xa0] sm:$0xff] %vm328_vm2, %v297_v23  ;;  %v482_v34 = vpack.c.bf16 %v434_v33, %v433_v32  ;;  %v435_v37 = vld [vmem:[#allocation2 + $0x25] sm:$0xff]  ;;  %v436_v38 = vld [vmem:[#allocation2 + $0x2d] sm:$0xff] }
  0x3c   : > { %401 = vst.msk [vmem:[#allocation2 + $0xa8] sm:$0xff] %vm328_vm2, %v298_v24  ;;  %402 = vst.msk [vmem:[#allocation2 + $0xb0] sm:$0xff] %vm328_vm2, %v299_v25  ;;  %10597 = vmatmul.mubr.msk.bf16.vlgmr.msra.gmra.mrb[0].mxu0 %vm328_vm2, %v481_v30  ;;  %v483_v39 = vpack.c.bf16 %v436_v38, %v435_v37  ;;  %v437_v40 = vld [vmem:[#allocation2 + $0x35] sm:$0xff]  ;;  %v438_v41 = vld [vmem:[#allocation2 + $0x3d] sm:$0xff] }
  0x3d   : > { %403 = vst.msk [vmem:[#allocation2 + $0xb8] sm:$0xff] %vm328_vm2, %v300_v26  ;;  %404 = vst.msk [vmem:[#allocation2 + $0xc0] sm:$0xff] %vm328_vm2, %v301_v27  ;;  %10600 = vmatprep.mubr.msk.bf16.mxu0 %vm12705_vm1, %v12704_v1  ;;  %10697 = vmatpush3.bf16.msra.mxu0 %v1360_v31  ;;  %v484_v42 = vpack.c.bf16 %v438_v41, %v437_v40  ;;  %v439_v43 = vld [vmem:[#allocation2 + $0x45] sm:$0xff]  ;;  %v440_v44 = vld [vmem:[#allocation2 + $0x4d] sm:$0xff] }
  0x3e   : > { %10798 = vmatprep.subr.bf16.mxu0 %v12704_v1  ;;  %405 = vst.msk [vmem:[#allocation2 + $0xc8] sm:$0xff] %vm328_vm2, %v302_v35  ;;  %406 = vst.msk [vmem:[#allocation2 + $0xd0] sm:$0xff] %vm328_vm2, %v303_v36  ;;  %v485_v45 = vpack.c.bf16 %v440_v44, %v439_v43  ;;  %v441_v46 = vld [vmem:[#allocation2 + $0x55] sm:$0xff]  ;;  %v442_v47 = vld [vmem:[#allocation2 + $0x5d] sm:$0xff] }
  0x3f   : > { %v486_v48 = vpack.c.bf16 %v442_v47, %v441_v46  ;;  %v443_v49 = vld [vmem:[#allocation2 + $0x65] sm:$0xff]  ;;  %v444_v50 = vld [vmem:[#allocation2 + $0x6d] sm:$0xff]  ;;  %407 = vst.msk [vmem:[#allocation2 + $0xd8] sm:$0xff] %vm328_vm2, %v304_v61  ;;  %408 = vst.msk [vmem:[#allocation2 + $0xe0] sm:$0xff] %vm328_vm2, %v305_v62 }
  0x40   : > { %v487_v51 = vpack.c.bf16 %v444_v50, %v443_v49  ;;  %v445_v52 = vld [vmem:[#allocation2 + $0x75] sm:$0xff]  ;;  %v446_v53 = vld [vmem:[#allocation2 + $0x7d] sm:$0xff]  ;;  %409 = vst.msk [vmem:[#allocation2 + $0xe8] sm:$0xff] %vm328_vm2, %v306_v4  ;;  %410 = vst.msk [vmem:[#allocation2 + $0xf0] sm:$0xff] %vm328_vm2, %v307_v5 }
  0x41   : > { %v488_v54 = vpack.c.bf16 %v446_v53, %v445_v52  ;;  %v447_v55 = vld [vmem:[#allocation2 + $0x85] sm:$0xff]  ;;  %v448_v56 = vld [vmem:[#allocation2 + $0x8d] sm:$0xff]  ;;  %411 = vst.msk [vmem:[#allocation2 + $0xf8] sm:$0xff] %vm328_vm2, %v308_v9  ;;  %412 = vst.msk [vmem:[#allocation2 + $0x100] sm:$0xff] %vm328_vm2, %v309_v10 }
  0x42   : > { %v489_v57 = vpack.c.bf16 %v448_v56, %v447_v55  ;;  %v449_v58 = vld [vmem:[#allocation2 + $0x95] sm:$0xff]  ;;  %v450_v59 = vld [vmem:[#allocation2 + $0x9d] sm:$0xff]  ;;  %413 = vst.msk [vmem:[#allocation2 + $0x108] sm:$0xff] %vm328_vm2, %v310_v14  ;;  %v1207_v16 = vld [vmem:[#allocation2 + $0x7] sm:$0xff] }
  0x43   : > { %v490_v60 = vpack.c.bf16 %v450_v59, %v449_v58  ;;  %v451_v63 = vld [vmem:[#allocation2 + $0xa5] sm:$0xff]  ;;  %v452_v0 = vld [vmem:[#allocation2 + $0xad] sm:$0xff]  ;;  %414 = vst.msk [vmem:[#allocation2 + $0x110] sm:$0xff] %vm328_vm2, %v311_v15  ;;  %v313_v21 = vld [vmem:[%s12929_s19 + $0x118] sm:$0xff] }
  0x44   : > { %10601 = vmatmul.mubr.msk.bf16.gmra.mrb[4].mxu0 %vm328_vm2, %v482_v34  ;;  %v491_v3 = vpack.c.bf16 %v452_v0, %v451_v63  ;;  %v453_v6 = vld [vmem:[#allocation2 + $0xb5] sm:$0xff]  ;;  %v454_v7 = vld [vmem:[#allocation2 + $0xbd] sm:$0xff]  ;;  %v9008_v18 = vld [vmem:[%s15351_s1 + $0xc] sm:$0xf]  ;;  %416 = vst.msk [vmem:[#allocation2 + $0x120] sm:$0xff] %vm328_vm2, %v313_v21 }
  0x45   : > { %10604 = vmatprep.mubr.msk.bf16.mxu0 %vm12705_vm1, %v12704_v1  ;;  %v492_v8 = vpack.c.bf16 %v454_v7, %v453_v6  ;;  %v455_v11 = vld [vmem:[#allocation2 + $0xc5] sm:$0xff]  ;;  %v456_v12 = vld [vmem:[#allocation2 + $0xcd] sm:$0xff]  ;;  %v1798_v22 = vsel %vm659_vm0, %v9008_v18, 0  ;;  %v1209_v23 = vld [vmem:[#allocation2 + $0x17] sm:$0xff] }
  0x46   : > { %v493_v13 = vpack.c.bf16 %v456_v12, %v455_v11  ;;  %v1208_v17 = vld [vmem:[#allocation2 + $0xf] sm:$0xff]  ;;  %v1210_v24 = vld [vmem:[#allocation2 + $0x1f] sm:$0xff]  ;;  %v1211_v28 = vld [vmem:[#allocation2 + $0x27] sm:$0xff] }
  0x47   : > { %v1257_v19 = vpack.c.bf16 %v1208_v17, %v1207_v16  ;;  %v312_v20 = vld [vmem:[%s12929_s19 + $0x110] sm:$0xff]  ;;  %v1258_v25 = vpack.c.bf16 %v1210_v24, %v1209_v23  ;;  %v314_v26 = vld [vmem:[%s12929_s19 + $0x120] sm:$0xff]  ;;  %v315_v27 = vld [vmem:[%s12929_s19 + $0x128] sm:$0xff] }
  0x48   : > { %415 = vst.msk [vmem:[#allocation2 + $0x118] sm:$0xff] %vm328_vm2, %v312_v20  ;;  %417 = vst.msk [vmem:[#allocation2 + $0x128] sm:$0xff] %vm328_vm2, %v314_v26  ;;  %v1212_v29 = vld [vmem:[#allocation2 + $0x2f] sm:$0xff]  ;;  %v13060_v30 = vld [vmem:[#allocation4] sm:$0xff] }
  0x49   : > { %418 = vst.msk [vmem:[#allocation2 + $0x130] sm:$0xff] %vm328_vm2, %v315_v27  ;;  %v1259_v31 = vpack.c.bf16 %v1212_v29, %v1211_v28  ;;  %v317_v32 = vld [vmem:[%s12929_s19 + $0x138] sm:$0xff]  ;;  %v318_v36 = vld [vmem:[%s12929_s19 + $0x140] sm:$0xff]  ;;  %v319_v37 = vld [vmem:[%s12929_s19 + $0x148] sm:$0xff] }
  0x4a   : > { %420 = vst.msk [vmem:[#allocation2 + $0x140] sm:$0xff] %vm328_vm2, %v317_v32  ;;  %v1213_v33 = vld [vmem:[#allocation2 + $0x37] sm:$0xff]  ;;  %v1214_v34 = vld [vmem:[#allocation2 + $0x3f] sm:$0xff]  ;;  %421 = vst.msk [vmem:[#allocation2 + $0x148] sm:$0xff] %vm328_vm2, %v318_v36 }
  0x4b   : > { %v1260_v35 = vpack.c.bf16 %v1214_v34, %v1213_v33  ;;  %v1215_v38 = vld [vmem:[#allocation2 + $0x47] sm:$0xff]  ;;  %422 = vst.msk [vmem:[#allocation2 + $0x150] sm:$0xff] %vm328_vm2, %v319_v37  ;;  %v320_v41 = vld [vmem:[%s12929_s19 + $0x150] sm:$0xff]  ;;  %v1218_v44 = vld [vmem:[#allocation2 + $0x5f] sm:$0xff] }
  0x4c   : > { %10605 = vmatmul.mubr.msk.bf16.gmra.mrb[8].mxu0 %vm328_vm2, %v483_v39  ;;  %v1216_v39 = vld [vmem:[#allocation2 + $0x4f] sm:$0xff]  ;;  %423 = vst.msk [vmem:[#allocation2 + $0x158] sm:$0xff] %vm328_vm2, %v320_v41  ;;  %v1217_v43 = vld [vmem:[#allocation2 + $0x57] sm:$0xff]  ;;  %v322_v46 = vld [vmem:[%s12929_s19 + $0x160] sm:$0xff] }
  0x4d   : > { %10608 = vmatprep.mubr.msk.bf16.mxu0 %vm12705_vm1, %v12704_v1  ;;  %v1261_v40 = vpack.c.bf16 %v1216_v39, %v1215_v38  ;;  %v323_v47 = vld [vmem:[%s12929_s19 + $0x168] sm:$0xff]  ;;  %425 = vst.msk [vmem:[#allocation2 + $0x168] sm:$0xff] %vm328_vm2, %v322_v46  ;;  %v325_v52 = vld [vmem:[%s12929_s19 + $0x178] sm:$0xff]  ;;  %v326_v56 = vld [vmem:[%s12929_s19 + $0x180] sm:$0xff] }
  0x4e   : > { %v1220_v49 = vld [vmem:[#allocation2 + $0x6f] sm:$0xff]  ;;  %426 = vst.msk [vmem:[#allocation2 + $0x170] sm:$0xff] %vm328_vm2, %v323_v47  ;;  %428 = vst.msk [vmem:[#allocation2 + $0x180] sm:$0xff] %vm328_vm2, %v325_v52  ;;  %v1221_v53 = vld [vmem:[#allocation2 + $0x77] sm:$0xff] }
  0x4f   : > { %429 = vst.msk [vmem:[#allocation2 + $0x188] sm:$0xff] %vm328_vm2, %v326_v56  ;;  %v1223_v58 = vld [vmem:[#allocation2 + $0x87] sm:$0xff]  ;;  %v1224_v59 = vld [vmem:[#allocation2 + $0x8f] sm:$0xff]  ;;  %v1225_v61 = vld [vmem:[#allocation2 + $0x97] sm:$0xff] }
  0x50   : > { %v1226_v62 = vld [vmem:[#allocation2 + $0x9f] sm:$0xff]  ;;  %v1227_v0 = vld [vmem:[#allocation2 + $0xa7] sm:$0xff]  ;;  %v1229_v5 = vld [vmem:[#allocation2 + $0xb7] sm:$0xff] }
  0x51   : > { %v1266_v63 = vpack.c.bf16 %v1226_v62, %v1225_v61  ;;  %v1230_v6 = vld [vmem:[#allocation2 + $0xbf] sm:$0xff]  ;;  %v1232_v9 = vld [vmem:[#allocation2 + $0xcf] sm:$0xff]  ;;  %v1233_v11 = vld [vmem:[#allocation2 + $0xd7] sm:$0xff] }
  0x52   : > { %v1268_v7 = vpack.c.bf16 %v1230_v6, %v1229_v5  ;;  %v1234_v12 = vld [vmem:[#allocation2 + $0xdf] sm:$0xff]  ;;  %v1235_v14 = vld [vmem:[#allocation2 + $0xe7] sm:$0xff]  ;;  %v1236_v15 = vld [vmem:[#allocation2 + $0xef] sm:$0xff] }
  0x53   : > { %v1271_v16 = vpack.c.bf16 %v1236_v15, %v1235_v14  ;;  %v1237_v17 = vld [vmem:[#allocation2 + $0xf7] sm:$0xff]  ;;  %v1238_v18 = vld [vmem:[#allocation2 + $0xff] sm:$0xff]  ;;  %v1239_v20 = vld [vmem:[#allocation2 + $0x107] sm:$0xff] }
  0x54   : > { %10609 = vmatmul.mubr.msk.bf16.gmra.mrb[12].mxu0 %vm328_vm2, %v484_v42  ;;  %v321_v42 = vld [vmem:[%s12929_s19 + $0x158] sm:$0xff]  ;;  %v1240_v21 = vld [vmem:[#allocation2 + $0x10f] sm:$0xff]  ;;  %v1243_v26 = vld [vmem:[#allocation2 + $0x127] sm:$0xff] }
  0x55   : > { %10612 = vmatprep.mubr.msk.bf16.mxu0 %vm12705_vm1, %v12704_v1  ;;  %424 = vst.msk [vmem:[#allocation2 + $0x160] sm:$0xff] %vm328_vm2, %v321_v42  ;;  %v1241_v23 = vld [vmem:[#allocation2 + $0x117] sm:$0xff]  ;;  %v1242_v24 = vld [vmem:[#allocation2 + $0x11f] sm:$0xff]  ;;  %v1244_v27 = vld [vmem:[#allocation2 + $0x12f] sm:$0xff] }
  0x56   : > { %v1275_v28 = vpack.c.bf16 %v1244_v27, %v1243_v26  ;;  %v1247_v32 = vld [vmem:[#allocation2 + $0x147] sm:$0xff]  ;;  %v1248_v33 = vld [vmem:[#allocation2 + $0x14f] sm:$0xff]  ;;  %v1647_v52 = vld [vmem:[#allocation2 + $0x18] sm:$0xff] }
  0x57   : > { %v1277_v34 = vpack.c.bf16 %v1248_v33, %v1247_v32  ;;  %v1252_v39 = vld [vmem:[#allocation2 + $0x16f] sm:$0xff]  ;;  %v1663_v14 = vld [vmem:[#allocation2 + $0x98] sm:$0xff]  ;;  %v1664_v15 = vld [vmem:[#allocation2 + $0xa0] sm:$0xff] }
  0x58   : > { %v1645_v47 = vld [vmem:[#allocation2 + $0x8] sm:$0xff]  ;;  %v1650_v56 = vld [vmem:[#allocation2 + $0x30] sm:$0xff]  ;;  %v1671_v26 = vld [vmem:[#allocation2 + $0xd8] sm:$0xff] }
  0x59   : > { %v1653_v61 = vld [vmem:[#allocation2 + $0x48] sm:$0xff]  ;;  %v1654_v62 = vld [vmem:[#allocation2 + $0x50] sm:$0xff]  ;;  %v1672_v27 = vld [vmem:[#allocation2 + $0xe0] sm:$0xff] }
  0x5a   : > { %v1657_v5 = vld [vmem:[#allocation2 + $0x68] sm:$0xff]  ;;  %v1658_v6 = vld [vmem:[#allocation2 + $0x70] sm:$0xff]  ;;  %v1675_v32 = vld [vmem:[#allocation2 + $0xf8] sm:$0xff] }
  0x5b   : > { %v1676_v33 = vld [vmem:[#allocation2 + $0x100] sm:$0xff] }
  0x5c   : > { %10613 = vmatmul.mubr.msk.bf16.gmra.mrb[16].mxu0 %vm328_vm2, %v485_v45  ;;  %v1262_v45 = vpack.c.bf16 %v1218_v44, %v1217_v43  ;;  %v1250_v36 = vld [vmem:[#allocation2 + $0x15f] sm:$0xff]  ;;  %v1251_v38 = vld [vmem:[#allocation2 + $0x167] sm:$0xff] }
  0x5d   : > { %10616 = vmatprep.mubr.msk.bf16.mxu0 %vm12705_vm1, %v12704_v1  ;;  %v1255_v44 = vld [vmem:[#allocation2 + $0x187] sm:$0xff] }
  0x64   : > { %10617 = vmatmul.mubr.msk.bf16.gmra.mrb[20].mxu0 %vm328_vm2, %v486_v48  ;;  %v1219_v48 = vld [vmem:[#allocation2 + $0x67] sm:$0xff] }
  0x65   : > { %10620 = vmatprep.mubr.msk.bf16.mxu0 %vm12705_vm1, %v12704_v1  ;;  %v1263_v50 = vpack.c.bf16 %v1220_v49, %v1219_v48  ;;  %v1646_v48 = vld [vmem:[#allocation2 + $0x10] sm:$0xff] }
  0x66   : > { %v9034_v49 = vld [vmem:[%s15351_s1 + $0x10] sm:$0xf] }
  0x6c   : > { %10621 = vmatmul.mubr.msk.bf16.gmra.mrb[24].mxu0 %vm328_vm2, %v487_v51  ;;  %v324_v51 = vld [vmem:[%s12929_s19 + $0x170] sm:$0xff] }
  0x6d   : > { %10624 = vmatprep.mubr.msk.bf16.mxu0 %vm12705_vm1, %v12704_v1  ;;  %427 = vst.msk [vmem:[#allocation2 + $0x178] sm:$0xff] %vm328_vm2, %v324_v51  ;;  %v2236_v51 = vsel %vm659_vm0, %v9034_v49, 0 }
  0x74   : > { %10625 = vmatmul.mubr.msk.bf16.gmra.mrb[28].mxu0 %vm328_vm2, %v488_v54  ;;  %v1222_v54 = vld [vmem:[#allocation2 + $0x7f] sm:$0xff]  ;;  %v1253_v41 = vld [vmem:[#allocation2 + $0x177] sm:$0xff] }
  0x75   : > { %10628 = vmatprep.mubr.msk.bf16.mxu0 %vm12705_vm1, %v12704_v1  ;;  %v1264_v55 = vpack.c.bf16 %v1222_v54, %v1221_v53  ;;  %v1254_v42 = vld [vmem:[#allocation2 + $0x17f] sm:$0xff] }
  0x76   : > { %v1280_v43 = vpack.c.bf16 %v1254_v42, %v1253_v41  ;;  %v1648_v53 = vld [vmem:[#allocation2 + $0x20] sm:$0xff]  ;;  %v1681_v41 = vld [vmem:[#allocation2 + $0x128] sm:$0xff]  ;;  %v1682_v42 = vld [vmem:[#allocation2 + $0x130] sm:$0xff] }
  0x77   : > { %v1696_v54 = vpack.c.bf16 %v1648_v53, %v1647_v52  ;;  %v1689_v53 = vld [vmem:[#allocation2 + $0x168] sm:$0xff] }
  0x7c   : > { %10629 = vmatmul.mubr.msk.bf16.gmra.mrb[32].mxu0 %vm328_vm2, %v489_v57  ;;  %v327_v57 = vld [vmem:[%s12929_s19 + $0x188] sm:$0xff] }
  0x7d   : > { %10632 = vmatprep.mubr.msk.bf16.mxu0 %vm12705_vm1, %v12704_v1  ;;  %430 = vst.msk [vmem:[#allocation2 + $0x190] sm:$0xff] %vm328_vm2, %v327_v57 }
  0x84   : > { %10633 = vmatmul.mubr.msk.bf16.gmra.mrb[36].mxu0 %vm328_vm2, %v490_v60  ;;  %v1265_v60 = vpack.c.bf16 %v1224_v59, %v1223_v58  ;;  %v1651_v58 = vld [vmem:[#allocation2 + $0x38] sm:$0xff]  ;;  %v1652_v59 = vld [vmem:[#allocation2 + $0x40] sm:$0xff] }
  0x85   : > { %10636 = vmatprep.mubr.msk.bf16.mxu0 %vm12705_vm1, %v12704_v1 }
  0x8c   : > { %10637 = vmatmul.mubr.msk.bf16.gmra.mrb[40].mxu0 %vm328_vm2, %v491_v3  ;;  %v1228_v3 = vld [vmem:[#allocation2 + $0xaf] sm:$0xff] }
  0x8d   : > { %10640 = vmatprep.mubr.msk.bf16.mxu0 %vm12705_vm1, %v12704_v1  ;;  %v1267_v4 = vpack.c.bf16 %v1228_v3, %v1227_v0  ;;  %v1655_v0 = vld [vmem:[#allocation2 + $0x58] sm:$0xff]  ;;  %v1656_v3 = vld [vmem:[#allocation2 + $0x60] sm:$0xff] }
  0x94   : > { %10641 = vmatmul.mubr.msk.bf16.gmra.mrb[44].mxu0 %vm328_vm2, %v492_v8  ;;  %v1231_v8 = vld [vmem:[#allocation2 + $0xc7] sm:$0xff] }
  0x95   : > { %10644 = vmatprep.mubr.msk.bf16.mxu0 %vm12705_vm1, %v12704_v1  ;;  %v1269_v10 = vpack.c.bf16 %v1232_v9, %v1231_v8  ;;  %v1659_v8 = vld [vmem:[#allocation2 + $0x78] sm:$0xff]  ;;  %v1660_v9 = vld [vmem:[#allocation2 + $0x80] sm:$0xff] }
  0x9c   : > { %10645 = vmatmul.mubr.msk.bf16.gmra.mrb[48].mxu0 %vm328_vm2, %v493_v13  ;;  %v1270_v13 = vpack.c.bf16 %v1234_v12, %v1233_v11  ;;  %v1661_v11 = vld [vmem:[#allocation2 + $0x88] sm:$0xff]  ;;  %v1662_v12 = vld [vmem:[#allocation2 + $0x90] sm:$0xff] }
  0x9d   : > { %10698 = vmatprep.mubr.msk.bf16.mxu0 %vm12705_vm1, %v12704_v1 }
  0xa4   : > { %10699 = vmatmul.mubr.msk.bf16.vlgmr.msra.gmra.mrb[0].mxu0 %vm328_vm2, %v1257_v19  ;;  %v1272_v19 = vpack.c.bf16 %v1238_v18, %v1237_v17  ;;  %v1665_v17 = vld [vmem:[#allocation2 + $0xa8] sm:$0xff]  ;;  %v1666_v18 = vld [vmem:[#allocation2 + $0xb0] sm:$0xff] }
  0xa5   : > { %10702 = vmatprep.mubr.msk.bf16.mxu0 %vm12705_vm1, %v12704_v1  ;;  %10799 = vmatpush3.bf16.msra.mxu0 %v1798_v22  ;;  %v1273_v22 = vpack.c.bf16 %v1240_v21, %v1239_v20  ;;  %v1667_v20 = vld [vmem:[#allocation2 + $0xb8] sm:$0xff]  ;;  %v1668_v21 = vld [vmem:[#allocation2 + $0xc0] sm:$0xff] }
  0xa6   : > { %10900 = vmatprep.subr.bf16.mxu0 %v12704_v1  ;;  %v316_v1 = vld [vmem:[%s12929_s19 + $0x130] sm:$0xff]  ;;  %s271_s19 = scalar_lea.vmem [#allocation5], %s8929_s15 }
  0xa7   : > { %419 = vst.msk [vmem:[#allocation2 + $0x138] sm:$0xff] %vm328_vm2, %v316_v1  ;;  %s8866_s20 = sshll.u32 %s271_s19, 4  ;;  %s15310_s20 = int_to_ptr.vmem [resolvable:$true] %s8866_s20 }
  0xa8   : > { %s12640_s8 = scalar_lea.vmem %s15310_s20, 64  ;;  %p12647_p0 = scmp.lt.s32.totalorder %s15310_s20, %s12645_s9 }
  0xa9   : > { %p12641_p11 = scmp.ne.s32.totalorder %s15310_s20, %s12640_s8  ;;  %p12648_p1 = scmp.lt.s32.totalorder %s12646_s13, %s12640_s8 }
  0xab   : > { %p12642_p12 = pnand %p12641_p11, %p12789_p5  ;;  %p12649_p2 = por %p12648_p1, %p12647_p0 }
  0xac   : > { %10703 = vmatmul.mubr.msk.bf16.gmra.mrb[4].mxu0 %vm328_vm2, %v1258_v25  ;;  %v1274_v25 = vpack.c.bf16 %v1242_v24, %v1241_v23  ;;  %v1669_v23 = vld [vmem:[#allocation2 + $0xc8] sm:$0xff]  ;;  %v1670_v24 = vld [vmem:[#allocation2 + $0xd0] sm:$0xff] }
  0xad   : > { %10706 = vmatprep.mubr.msk.bf16.mxu0 %vm12705_vm1, %v13060_v30  ;;  %p12643_p13 = pneg %p12642_p12 }
  0xae   : > { %v1245_v29 = vld [vmem:[#allocation2 + $0x137] sm:$0xff] }
  0xaf   : > { %p12650_p3 = pnand %p12649_p2, %p12643_p13 }
  0xb4   : > { %10707 = vmatmul.mubr.msk.bf16.gmra.mrb[8].mxu0 %vm328_vm2, %v1259_v31  ;;  %v1246_v31 = vld [vmem:[#allocation2 + $0x13f] sm:$0xff] }
  0xb5   : > { %10710 = vmatprep.mubr.msk.bf16.mxu0 %vm12705_vm1, %v13060_v30  ;;  %v1276_v1 = vpack.c.bf16 %v1246_v31, %v1245_v29  ;;  %v1673_v29 = vld [vmem:[#allocation2 + $0xe8] sm:$0xff]  ;;  %v1674_v31 = vld [vmem:[#allocation2 + $0xf0] sm:$0xff] }
  0xbc   : > { %10711 = vmatmul.mubr.msk.bf16.gmra.mrb[12].mxu0 %vm328_vm2, %v1260_v35  ;;  %v1249_v35 = vld [vmem:[#allocation2 + $0x157] sm:$0xff] }
  0xbd   : > { %10714 = vmatprep.mubr.msk.bf16.mxu0 %vm12705_vm1, %v13060_v30  ;;  %v1278_v37 = vpack.c.bf16 %v1250_v36, %v1249_v35  ;;  %v1677_v35 = vld [vmem:[#allocation2 + $0x108] sm:$0xff]  ;;  %v1678_v36 = vld [vmem:[#allocation2 + $0x110] sm:$0xff] }
  0xc4   : > { %10715 = vmatmul.mubr.msk.bf16.gmra.mrb[16].mxu0 %vm328_vm2, %v1261_v40  ;;  %v1279_v40 = vpack.c.bf16 %v1252_v39, %v1251_v38  ;;  %v1679_v38 = vld [vmem:[#allocation2 + $0x118] sm:$0xff]  ;;  %v1680_v39 = vld [vmem:[#allocation2 + $0x120] sm:$0xff] }
  0xc5   : > { %10718 = vmatprep.mubr.msk.bf16.mxu0 %vm12705_vm1, %v13060_v30 }
  0xcc   : > { %10719 = vmatmul.mubr.msk.bf16.gmra.mrb[20].mxu0 %vm328_vm2, %v1262_v45  ;;  %v1256_v45 = vld [vmem:[#allocation2 + $0x18f] sm:$0x7f] }
  0xcd   : > { %10722 = vmatprep.mubr.msk.bf16.mxu0 %vm12705_vm1, %v13060_v30  ;;  %v1281_v46 = vpack.c.bf16 %v1256_v45, %v1255_v44  ;;  %v1683_v44 = vld [vmem:[#allocation2 + $0x138] sm:$0xff]  ;;  %v1684_v45 = vld [vmem:[#allocation2 + $0x140] sm:$0xff] }
  0xd4   : > { %10723 = vmatmul.mubr.msk.bf16.gmra.mrb[24].mxu0 %vm328_vm2, %v1263_v50  ;;  %v1695_v50 = vpack.c.bf16 %v1646_v48, %v1645_v47  ;;  %v1685_v47 = vld [vmem:[#allocation2 + $0x148] sm:$0xff]  ;;  %v1686_v48 = vld [vmem:[#allocation2 + $0x150] sm:$0xff] }
  0xd5   : > { %10726 = vmatprep.mubr.msk.bf16.mxu0 %vm12705_vm1, %v13060_v30  ;;  %v1715_v49 = vpack.c.bf16 %v1686_v48, %v1685_v47  ;;  %v2113_v47 = vld [vmem:[#allocation2 + $0xf9] sm:$0xff]  ;;  %v2114_v48 = vld [vmem:[#allocation2 + $0x101] sm:$0xff] }
  0xdc   : > { %10727 = vmatmul.mubr.msk.bf16.gmra.mrb[28].mxu0 %vm328_vm2, %v1264_v55  ;;  %v1649_v55 = vld [vmem:[#allocation2 + $0x28] sm:$0xff] }
  0xdd   : > { %10730 = vmatprep.mubr.msk.bf16.mxu0 %vm12705_vm1, %v13060_v30  ;;  %v1697_v57 = vpack.c.bf16 %v1650_v56, %v1649_v55  ;;  %v1691_v56 = vld [vmem:[#allocation2 + $0x178] sm:$0xff] }
  0xe4   : > { %10731 = vmatmul.mubr.msk.bf16.gmra.mrb[32].mxu0 %vm328_vm2, %v1265_v60  ;;  %v1698_v60 = vpack.c.bf16 %v1652_v59, %v1651_v58  ;;  %v1693_v59 = vld [vmem:[#allocation2 + $0x188] sm:$0xff] }
  0xe5   : > { %10734 = vmatprep.mubr.msk.bf16.mxu0 %vm12705_vm1, %v13060_v30 }
  0xec   : > { %10735 = vmatmul.mubr.msk.bf16.gmra.mrb[36].mxu0 %vm328_vm2, %v1266_v63  ;;  %v1699_v63 = vpack.c.bf16 %v1654_v62, %v1653_v61  ;;  %v2083_v62 = vld [vmem:[#allocation2 + $0x9] sm:$0xff] }
  0xed   : > { %10738 = vmatprep.mubr.msk.bf16.mxu0 %vm12705_vm1, %v13060_v30 }
  0xf4   : > { %10739 = vmatmul.mubr.msk.bf16.gmra.mrb[40].mxu0 %vm328_vm2, %v1267_v4  ;;  %v1700_v4 = vpack.c.bf16 %v1656_v3, %v1655_v0  ;;  %v9060_v0 = vld [vmem:[%s15351_s1 + $0x14] sm:$0xf] }
  0xf5   : > { %10742 = vmatprep.mubr.msk.bf16.mxu0 %vm12705_vm1, %v13060_v30 }
  0xfc   : > { %10743 = vmatmul.mubr.msk.bf16.gmra.mrb[44].mxu0 %vm328_vm2, %v1268_v7  ;;  %v1701_v7 = vpack.c.bf16 %v1658_v6, %v1657_v5  ;;  %v2085_v5 = vld [vmem:[#allocation2 + $0x19] sm:$0xff]  ;;  %v2086_v6 = vld [vmem:[#allocation2 + $0x21] sm:$0xff] }
  0xfd   : > { %10746 = vmatprep.mubr.msk.bf16.mxu0 %vm12705_vm1, %v13060_v30 }
 0x104   : > { %10747 = vmatmul.mubr.msk.bf16.gmra.mrb[48].mxu0 %vm328_vm2, %v1269_v10  ;;  %v1702_v10 = vpack.c.bf16 %v1660_v9, %v1659_v8  ;;  %v2087_v8 = vld [vmem:[#allocation2 + $0x29] sm:$0xff]  ;;  %v2088_v9 = vld [vmem:[#allocation2 + $0x31] sm:$0xff] }
 0x105   : > { %10750 = vmatprep.mubr.msk.bf16.mxu0 %vm12705_vm1, %v13060_v30 }
 0x10c   : > { %10751 = vmatmul.mubr.msk.bf16.gmra.mrb[52].mxu0 %vm328_vm2, %v1270_v13  ;;  %v1703_v13 = vpack.c.bf16 %v1662_v12, %v1661_v11  ;;  %v2089_v11 = vld [vmem:[#allocation2 + $0x39] sm:$0xff]  ;;  %v2090_v12 = vld [vmem:[#allocation2 + $0x41] sm:$0xff] }
 0x10d   : > { %10754 = vmatprep.mubr.msk.bf16.mxu0 %vm12705_vm1, %v13060_v30 }
 0x114   : > { %10755 = vmatmul.mubr.msk.bf16.gmra.mrb[56].mxu0 %vm328_vm2, %v1271_v16  ;;  %v1704_v16 = vpack.c.bf16 %v1664_v15, %v1663_v14  ;;  %v2091_v14 = vld [vmem:[#allocation2 + $0x49] sm:$0xff]  ;;  %v2092_v15 = vld [vmem:[#allocation2 + $0x51] sm:$0xff] }
 0x115   : > { %10758 = vmatprep.mubr.msk.bf16.mxu0 %vm12705_vm1, %v13060_v30 }
 0x11c   : > { %10759 = vmatmul.mubr.msk.bf16.gmra.mrb[60].mxu0 %vm328_vm2, %v1272_v19  ;;  %v1705_v19 = vpack.c.bf16 %v1666_v18, %v1665_v17  ;;  %v2093_v17 = vld [vmem:[#allocation2 + $0x59] sm:$0xff]  ;;  %v2094_v18 = vld [vmem:[#allocation2 + $0x61] sm:$0xff] }
 0x11d   : > { %10762 = vmatprep.mubr.msk.bf16.mxu0 %vm12705_vm1, %v13060_v30 }
 0x124   : > { %10763 = vmatmul.mubr.msk.bf16.gmra.mrb[64].mxu0 %vm328_vm2, %v1273_v22  ;;  %v1706_v22 = vpack.c.bf16 %v1668_v21, %v1667_v20  ;;  %v2095_v20 = vld [vmem:[#allocation2 + $0x69] sm:$0xff]  ;;  %v2096_v21 = vld [vmem:[#allocation2 + $0x71] sm:$0xff] }
 0x125   : > { %10766 = vmatprep.mubr.msk.bf16.mxu0 %vm12705_vm1, %v13060_v30 }
 0x12c   : > { %10767 = vmatmul.mubr.msk.bf16.gmra.mrb[68].mxu0 %vm328_vm2, %v1274_v25  ;;  %v1707_v25 = vpack.c.bf16 %v1670_v24, %v1669_v23  ;;  %v2097_v23 = vld [vmem:[#allocation2 + $0x79] sm:$0xff]  ;;  %v2098_v24 = vld [vmem:[#allocation2 + $0x81] sm:$0xff] }
 0x12d   : > { %10770 = vmatprep.mubr.msk.bf16.mxu0 %vm12705_vm1, %v13060_v30 }
 0x134   : > { %10771 = vmatmul.mubr.msk.bf16.gmra.mrb[72].mxu0 %vm328_vm2, %v1275_v28  ;;  %v1708_v28 = vpack.c.bf16 %v1672_v27, %v1671_v26  ;;  %v2099_v26 = vld [vmem:[#allocation2 + $0x89] sm:$0xff]  ;;  %v2100_v27 = vld [vmem:[#allocation2 + $0x91] sm:$0xff] }
 0x135   : > { %10774 = vmatprep.mubr.msk.bf16.mxu0 %vm12705_vm1, %v13060_v30 }
 0x13c   : > { %10775 = vmatmul.mubr.msk.bf16.gmra.mrb[76].mxu0 %vm328_vm2, %v1276_v1  ;;  %v1709_v1 = vpack.c.bf16 %v1674_v31, %v1673_v29  ;;  %v2101_v29 = vld [vmem:[#allocation2 + $0x99] sm:$0xff]  ;;  %v2102_v31 = vld [vmem:[#allocation2 + $0xa1] sm:$0xff] }
 0x13d   : > { %10778 = vmatprep.mubr.msk.bf16.mxu0 %vm12705_vm1, %v13060_v30 }
 0x144   : > { %10779 = vmatmul.mubr.msk.bf16.gmra.mrb[80].mxu0 %vm328_vm2, %v1277_v34  ;;  %v1710_v34 = vpack.c.bf16 %v1676_v33, %v1675_v32  ;;  %v2103_v32 = vld [vmem:[#allocation2 + $0xa9] sm:$0xff]  ;;  %v2104_v33 = vld [vmem:[#allocation2 + $0xb1] sm:$0xff] }
 0x145   : > { %10782 = vmatprep.mubr.msk.bf16.mxu0 %vm12705_vm1, %v13060_v30 }
 0x14c   : > { %10783 = vmatmul.mubr.msk.bf16.gmra.mrb[84].mxu0 %vm328_vm2, %v1278_v37  ;;  %v1711_v37 = vpack.c.bf16 %v1678_v36, %v1677_v35  ;;  %v2105_v35 = vld [vmem:[#allocation2 + $0xb9] sm:$0xff]  ;;  %v2106_v36 = vld [vmem:[#allocation2 + $0xc1] sm:$0xff] }
 0x14d   : > { %10786 = vmatprep.mubr.msk.bf16.mxu0 %vm12705_vm1, %v13060_v30 }
 0x154   : > { %10787 = vmatmul.mubr.msk.bf16.gmra.mrb[88].mxu0 %vm328_vm2, %v1279_v40  ;;  %v1712_v40 = vpack.c.bf16 %v1680_v39, %v1679_v38  ;;  %v2107_v38 = vld [vmem:[#allocation2 + $0xc9] sm:$0xff]  ;;  %v2108_v39 = vld [vmem:[#allocation2 + $0xd1] sm:$0xff] }
 0x155   : > { %10790 = vmatprep.mubr.msk.bf16.mxu0 %vm12705_vm1, %v13060_v30 }
 0x15c   : > { %10791 = vmatmul.mubr.msk.bf16.gmra.mrb[92].mxu0 %vm328_vm2, %v1280_v43  ;;  %v1713_v43 = vpack.c.bf16 %v1682_v42, %v1681_v41  ;;  %v2109_v41 = vld [vmem:[#allocation2 + $0xd9] sm:$0xff]  ;;  %v2110_v42 = vld [vmem:[#allocation2 + $0xe1] sm:$0xff] }
 0x15d   : > { %10794 = vmatprep.mubr.msk.bf16.mxu0 %vm12705_vm1, %v13060_v30 }
 0x164   : > { %10795 = vmatmul.mubr.msk.bf16.gmra.mrb[96].mxu0 %vm328_vm2, %v1281_v46  ;;  %v1714_v46 = vpack.c.bf16 %v1684_v45, %v1683_v44  ;;  %v2111_v44 = vld [vmem:[#allocation2 + $0xe9] sm:$0xff]  ;;  %v2112_v45 = vld [vmem:[#allocation2 + $0xf1] sm:$0xff] }
 0x165   : > { %10800 = vmatprep.mubr.msk.bf16.mxu0 %vm12705_vm1, %v13060_v30 }
 0x16c   : > { %10801 = vmatmul.mubr.msk.bf16.vlgmr.msra.gmra.mrb[0].mxu0 %vm328_vm2, %v1695_v50  ;;  %v1687_v50 = vld [vmem:[#allocation2 + $0x158] sm:$0xff] }
 0x16d   : > { %10804 = vmatprep.mubr.msk.bf16.mxu0 %vm12705_vm1, %v13060_v30  ;;  %10901 = vmatpush3.bf16.msra.mxu0 %v2236_v51  ;;  %v1688_v51 = vld [vmem:[#allocation2 + $0x160] sm:$0xff] }
 0x16e   : > { %11002 = vmatprep.subr.bf16.mxu0 %v13060_v30  ;;  %v1716_v52 = vpack.c.bf16 %v1688_v51, %v1687_v50  ;;  %v2115_v50 = vld [vmem:[#allocation2 + $0x109] sm:$0xff]  ;;  %v2116_v51 = vld [vmem:[#allocation2 + $0x111] sm:$0xff] }
 0x174   : > { %10805 = vmatmul.mubr.msk.bf16.gmra.mrb[4].mxu0 %vm328_vm2, %v1696_v54  ;;  %v1690_v54 = vld [vmem:[#allocation2 + $0x170] sm:$0xff] }
 0x175   : > { %10808 = vmatprep.mubr.msk.bf16.mxu0 %vm12705_vm1, %v13060_v30  ;;  %v1717_v55 = vpack.c.bf16 %v1690_v54, %v1689_v53  ;;  %v2117_v53 = vld [vmem:[#allocation2 + $0x119] sm:$0xff]  ;;  %v2118_v54 = vld [vmem:[#allocation2 + $0x121] sm:$0xff] }
 0x17c   : > { %10809 = vmatmul.mubr.msk.bf16.gmra.mrb[8].mxu0 %vm328_vm2, %v1697_v57  ;;  %v1692_v57 = vld [vmem:[#allocation2 + $0x180] sm:$0xff] }
 0x17d   : > { %10812 = vmatprep.mubr.msk.bf16.mxu0 %vm12705_vm1, %v13060_v30  ;;  %v1718_v58 = vpack.c.bf16 %v1692_v57, %v1691_v56  ;;  %v2119_v56 = vld [vmem:[#allocation2 + $0x129] sm:$0xff]  ;;  %v2120_v57 = vld [vmem:[#allocation2 + $0x131] sm:$0xff] }
 0x184   : > { %10813 = vmatmul.mubr.msk.bf16.gmra.mrb[12].mxu0 %vm328_vm2, %v1698_v60  ;;  %v1694_v60 = vld [vmem:[#allocation2 + $0x190] sm:$0x7f] }
 0x185   : > { %10816 = vmatprep.mubr.msk.bf16.mxu0 %vm12705_vm1, %v13060_v30  ;;  %v1719_v61 = vpack.c.bf16 %v1694_v60, %v1693_v59  ;;  %v2121_v59 = vld [vmem:[#allocation2 + $0x139] sm:$0xff]  ;;  %v2122_v60 = vld [vmem:[#allocation2 + $0x141] sm:$0xff] }
 0x18c   : > { %10817 = vmatmul.mubr.msk.bf16.gmra.mrb[16].mxu0 %vm328_vm2, %v1699_v63  ;;  %v2084_v63 = vld [vmem:[#allocation2 + $0x11] sm:$0xff] }
 0x18d   : > { %10820 = vmatprep.mubr.msk.bf16.mxu0 %vm12705_vm1, %v13060_v30  ;;  %v2133_v3 = vpack.c.bf16 %v2084_v63, %v2083_v62  ;;  %v2123_v62 = vld [vmem:[#allocation2 + $0x149] sm:$0xff]  ;;  %v2124_v63 = vld [vmem:[#allocation2 + $0x151] sm:$0xff] }
 0x194   : > { %10821 = vmatmul.mubr.msk.bf16.gmra.mrb[20].mxu0 %vm328_vm2, %v1700_v4  ;;  %v2674_v4 = vsel %vm659_vm0, %v9060_v0, 0  ;;  %v2153_v0 = vpack.c.bf16 %v2124_v63, %v2123_v62  ;;  %v511_v62 = vld [vmem:[#allocation2 + $0x26] sm:$0xff]  ;;  %v512_v63 = vld [vmem:[#allocation2 + $0x2e] sm:$0xff] }
 0x195   : > { %10824 = vmatprep.mubr.msk.bf16.mxu0 %vm12705_vm1, %v13060_v30 }
 0x19c   : > { %10825 = vmatmul.mubr.msk.bf16.gmra.mrb[24].mxu0 %vm328_vm2, %v1701_v7  ;;  %v2134_v7 = vpack.c.bf16 %v2086_v6, %v2085_v5  ;;  %v2127_v6 = vld [vmem:[#allocation2 + $0x169] sm:$0xff] }
 0x19d   : > { %10828 = vmatprep.mubr.msk.bf16.mxu0 %vm12705_vm1, %v13060_v30 }
 0x1a4   : > { %10829 = vmatmul.mubr.msk.bf16.gmra.mrb[28].mxu0 %vm328_vm2, %v1702_v10  ;;  %v2135_v10 = vpack.c.bf16 %v2088_v9, %v2087_v8  ;;  %v2129_v9 = vld [vmem:[#allocation2 + $0x179] sm:$0xff] }
 0x1a5   : > { %10832 = vmatprep.mubr.msk.bf16.mxu0 %vm12705_vm1, %v13060_v30 }
 0x1ac   : > { %10833 = vmatmul.mubr.msk.bf16.gmra.mrb[32].mxu0 %vm328_vm2, %v1703_v13  ;;  %v2136_v13 = vpack.c.bf16 %v2090_v12, %v2089_v11  ;;  %v2131_v12 = vld [vmem:[#allocation2 + $0x189] sm:$0xff] }
 0x1ad   : > { %10836 = vmatprep.mubr.msk.bf16.mxu0 %vm12705_vm1, %v13060_v30 }
 0x1b4   : > { %10837 = vmatmul.mubr.msk.bf16.gmra.mrb[36].mxu0 %vm328_vm2, %v1704_v16  ;;  %v2137_v16 = vpack.c.bf16 %v2092_v15, %v2091_v14  ;;  %v2521_v15 = vld [vmem:[#allocation2 + $0xa] sm:$0xff] }
 0x1b5   : > { %10840 = vmatprep.mubr.msk.bf16.mxu0 %vm12705_vm1, %v13060_v30 }
 0x1bc   : > { %10841 = vmatmul.mubr.msk.bf16.gmra.mrb[40].mxu0 %vm328_vm2, %v1705_v19  ;;  %v2138_v19 = vpack.c.bf16 %v2094_v18, %v2093_v17  ;;  %v9086_v17 = vld [vmem:[%s15351_s1 + $0x18] sm:$0xf] }
 0x1bd   : > { %10844 = vmatprep.mubr.msk.bf16.mxu0 %vm12705_vm1, %v13060_v30 }
 0x1c4   : > { %10845 = vmatmul.mubr.msk.bf16.gmra.mrb[44].mxu0 %vm328_vm2, %v1706_v22  ;;  %v2139_v22 = vpack.c.bf16 %v2096_v21, %v2095_v20  ;;  %v13322_v20 = vld [vmem:[#allocation4] sm:$0xff] }
 0x1c5   : > { %10848 = vmatprep.mubr.msk.bf16.mxu0 %vm12705_vm1, %v13060_v30  ;;  %v2523_v21 = vld [vmem:[#allocation2 + $0x1a] sm:$0xff] }
 0x1cc   : > { %10849 = vmatmul.mubr.msk.bf16.gmra.mrb[48].mxu0 %vm328_vm2, %v1707_v25  ;;  %v2140_v25 = vpack.c.bf16 %v2098_v24, %v2097_v23  ;;  %v2525_v23 = vld [vmem:[#allocation2 + $0x2a] sm:$0xff]  ;;  %v2526_v24 = vld [vmem:[#allocation2 + $0x32] sm:$0xff] }
 0x1cd   : > { %10852 = vmatprep.mubr.msk.bf16.mxu0 %vm12705_vm1, %v13060_v30 }
 0x1d4   : > { %10853 = vmatmul.mubr.msk.bf16.gmra.mrb[52].mxu0 %vm328_vm2, %v1708_v28  ;;  %v2141_v28 = vpack.c.bf16 %v2100_v27, %v2099_v26  ;;  %v2527_v26 = vld [vmem:[#allocation2 + $0x3a] sm:$0xff]  ;;  %v2528_v27 = vld [vmem:[#allocation2 + $0x42] sm:$0xff] }
 0x1d5   : > { %10856 = vmatprep.mubr.msk.bf16.mxu0 %vm12705_vm1, %v13060_v30 }
 0x1dc   : > { %10857 = vmatmul.mubr.msk.bf16.gmra.mrb[56].mxu0 %vm328_vm2, %v1709_v1  ;;  %v2142_v1 = vpack.c.bf16 %v2102_v31, %v2101_v29  ;;  %v2529_v29 = vld [vmem:[#allocation2 + $0x4a] sm:$0xff]  ;;  %v2530_v31 = vld [vmem:[#allocation2 + $0x52] sm:$0xff] }
 0x1dd   : > { %10860 = vmatprep.mubr.msk.bf16.mxu0 %vm12705_vm1, %v13060_v30 }
 0x1e4   : > { %10861 = vmatmul.mubr.msk.bf16.gmra.mrb[60].mxu0 %vm328_vm2, %v1710_v34  ;;  %v2143_v34 = vpack.c.bf16 %v2104_v33, %v2103_v32  ;;  %v2531_v32 = vld [vmem:[#allocation2 + $0x5a] sm:$0xff]  ;;  %v2532_v33 = vld [vmem:[#allocation2 + $0x62] sm:$0xff] }
 0x1e5   : > { %10864 = vmatprep.mubr.msk.bf16.mxu0 %vm12705_vm1, %v13060_v30 }
 0x1ec   : > { %10865 = vmatmul.mubr.msk.bf16.gmra.mrb[64].mxu0 %vm328_vm2, %v1711_v37  ;;  %v2144_v37 = vpack.c.bf16 %v2106_v36, %v2105_v35  ;;  %v2533_v35 = vld [vmem:[#allocation2 + $0x6a] sm:$0xff]  ;;  %v2534_v36 = vld [vmem:[#allocation2 + $0x72] sm:$0xff] }
 0x1ed   : > { %10868 = vmatprep.mubr.msk.bf16.mxu0 %vm12705_vm1, %v13060_v30 }
 0x1f4   : > { %10869 = vmatmul.mubr.msk.bf16.gmra.mrb[68].mxu0 %vm328_vm2, %v1712_v40  ;;  %v2145_v40 = vpack.c.bf16 %v2108_v39, %v2107_v38  ;;  %v2535_v38 = vld [vmem:[#allocation2 + $0x7a] sm:$0xff]  ;;  %v2536_v39 = vld [vmem:[#allocation2 + $0x82] sm:$0xff] }
 0x1f5   : > { %10872 = vmatprep.mubr.msk.bf16.mxu0 %vm12705_vm1, %v13060_v30 }
 0x1fc   : > { %10873 = vmatmul.mubr.msk.bf16.gmra.mrb[72].mxu0 %vm328_vm2, %v1713_v43  ;;  %v2146_v43 = vpack.c.bf16 %v2110_v42, %v2109_v41  ;;  %v2537_v41 = vld [vmem:[#allocation2 + $0x8a] sm:$0xff]  ;;  %v2538_v42 = vld [vmem:[#allocation2 + $0x92] sm:$0xff] }
 0x1fd   : > { %10876 = vmatprep.mubr.msk.bf16.mxu0 %vm12705_vm1, %v13060_v30 }
 0x204   : > { %10877 = vmatmul.mubr.msk.bf16.gmra.mrb[76].mxu0 %vm328_vm2, %v1714_v46  ;;  %v2147_v46 = vpack.c.bf16 %v2112_v45, %v2111_v44  ;;  %v2539_v44 = vld [vmem:[#allocation2 + $0x9a] sm:$0xff]  ;;  %v2540_v45 = vld [vmem:[#allocation2 + $0xa2] sm:$0xff] }
 0x205   : > { %10880 = vmatprep.mubr.msk.bf16.mxu0 %vm12705_vm1, %v13060_v30 }
 0x20c   : > { %10881 = vmatmul.mubr.msk.bf16.gmra.mrb[80].mxu0 %vm328_vm2, %v1715_v49  ;;  %v2148_v49 = vpack.c.bf16 %v2114_v48, %v2113_v47  ;;  %v8931_v47 = vld [vmem:[%s15351_s1 + $0x4] sm:$0xf]  ;;  %v2541_v48 = vld [vmem:[#allocation2 + $0xaa] sm:$0xff] }
 0x20d   : > { %10884 = vmatprep.mubr.msk.bf16.mxu0 %vm12705_vm1, %v13060_v30 }
 0x214   : > { %10885 = vmatmul.mubr.msk.bf16.gmra.mrb[84].mxu0 %vm328_vm2, %v1716_v52  ;;  %v2149_v52 = vpack.c.bf16 %v2116_v51, %v2115_v50  ;;  %v661_v50 = vsel %vm659_vm0, %v8931_v47, 0  ;;  %v507_v51 = vld [vmem:[#allocation2 + $0x6] sm:$0xff]  ;;  %v2562_v47 = vld [vmem:[#allocation2 + $0x152] sm:$0xff] }
 0x215   : > { %10888 = vmatprep.mubr.msk.bf16.mxu0 %vm12705_vm1, %v13060_v30  ;;  %10493 = vmatpush3.bf16.msra.mxu1 %v661_v50 }
 0x216   : > { %11404 = vmatprep.subr.bf16.mxu1 %v13322_v20 }
 0x21c   : > { %10889 = vmatmul.mubr.msk.bf16.gmra.mrb[88].mxu0 %vm328_vm2, %v1717_v55  ;;  %v2150_v55 = vpack.c.bf16 %v2118_v54, %v2117_v53 }
 0x21d   : > { %10892 = vmatprep.mubr.msk.bf16.mxu0 %vm12705_vm1, %v13060_v30 }
 0x224   : > { %10893 = vmatmul.mubr.msk.bf16.gmra.mrb[92].mxu0 %vm328_vm2, %v1718_v58  ;;  %v2151_v58 = vpack.c.bf16 %v2120_v57, %v2119_v56  ;;  %v2544_v56 = vld [vmem:[#allocation2 + $0xc2] sm:$0xff]  ;;  %v509_v57 = vld [vmem:[#allocation2 + $0x16] sm:$0xff] }
 0x225   : > { %10896 = vmatprep.mubr.msk.bf16.mxu0 %vm12705_vm1, %v13060_v30 }
 0x22c   : > { %10897 = vmatmul.mubr.msk.bf16.gmra.mrb[96].mxu0 %vm328_vm2, %v1719_v61  ;;  %v2152_v61 = vpack.c.bf16 %v2122_v60, %v2121_v59 }
 0x22d   : > { %10902 = vmatprep.mubr.msk.bf16.mxu0 %vm12705_vm1, %v13060_v30 }
 0x234   : > { %10903 = vmatmul.mubr.msk.bf16.vlgmr.msra.gmra.mrb[0].mxu0 %vm328_vm2, %v2133_v3  ;;  %v2125_v3 = vld [vmem:[#allocation2 + $0x159] sm:$0xff] }
 0x235   : > { %10906 = vmatprep.mubr.msk.bf16.mxu0 %vm12705_vm1, %v13060_v30  ;;  %11003 = vmatpush3.bf16.msra.mxu0 %v2674_v4  ;;  %v2126_v4 = vld [vmem:[#allocation2 + $0x161] sm:$0xff] }
 0x236   : > { %11104 = vmatprep.subr.bf16.mxu0 %v13060_v30  ;;  %v2154_v5 = vpack.c.bf16 %v2126_v4, %v2125_v3  ;;  %v2547_v4 = vld [vmem:[#allocation2 + $0xda] sm:$0xff] }
 0x23c   : > { %10907 = vmatmul.mubr.msk.bf16.gmra.mrb[4].mxu0 %vm328_vm2, %v2134_v7  ;;  %v2128_v7 = vld [vmem:[#allocation2 + $0x171] sm:$0xff] }
 0x23d   : > { %10910 = vmatprep.mubr.msk.bf16.mxu0 %vm12705_vm1, %v13060_v30  ;;  %v2155_v8 = vpack.c.bf16 %v2128_v7, %v2127_v6  ;;  %v513_v6 = vld [vmem:[#allocation2 + $0x36] sm:$0xff]  ;;  %v514_v7 = vld [vmem:[#allocation2 + $0x3e] sm:$0xff] }
 0x244   : > { %10911 = vmatmul.mubr.msk.bf16.gmra.mrb[8].mxu0 %vm328_vm2, %v2135_v10  ;;  %v2130_v10 = vld [vmem:[#allocation2 + $0x181] sm:$0xff] }
 0x245   : > { %10914 = vmatprep.mubr.msk.bf16.mxu0 %vm12705_vm1, %v13060_v30  ;;  %v2156_v11 = vpack.c.bf16 %v2130_v10, %v2129_v9  ;;  %v2549_v10 = vld [vmem:[#allocation2 + $0xea] sm:$0xff] }
 0x24c   : > { %10915 = vmatmul.mubr.msk.bf16.gmra.mrb[12].mxu0 %vm328_vm2, %v2136_v13  ;;  %v2132_v13 = vld [vmem:[#allocation2 + $0x191] sm:$0x7f] }
 0x24d   : > { %10918 = vmatprep.mubr.msk.bf16.mxu0 %vm12705_vm1, %v13060_v30  ;;  %v2157_v14 = vpack.c.bf16 %v2132_v13, %v2131_v12  ;;  %v515_v12 = vld [vmem:[#allocation2 + $0x46] sm:$0xff]  ;;  %v516_v13 = vld [vmem:[#allocation2 + $0x4e] sm:$0xff] }
 0x254   : > { %10919 = vmatmul.mubr.msk.bf16.gmra.mrb[16].mxu0 %vm328_vm2, %v2137_v16  ;;  %v2522_v16 = vld [vmem:[#allocation2 + $0x12] sm:$0xff] }
 0x255   : > { %10922 = vmatprep.mubr.msk.bf16.mxu0 %vm12705_vm1, %v13060_v30  ;;  %v2571_v18 = vpack.c.bf16 %v2522_v16, %v2521_v15  ;;  %v2551_v16 = vld [vmem:[#allocation2 + $0xfa] sm:$0xff] }
 0x25c   : > { %10923 = vmatmul.mubr.msk.bf16.gmra.mrb[20].mxu0 %vm328_vm2, %v2138_v19  ;;  %v3112_v19 = vsel %vm659_vm0, %v9086_v17, 0  ;;  %v2552_v17 = vld [vmem:[#allocation2 + $0x102] sm:$0xff] }
 0x25d   : > { %10926 = vmatprep.mubr.msk.bf16.mxu0 %vm12705_vm1, %v13060_v30 }
 0x264   : > { %10927 = vmatmul.mubr.msk.bf16.gmra.mrb[24].mxu0 %vm328_vm2, %v2139_v22  ;;  %v2524_v22 = vld [vmem:[#allocation2 + $0x22] sm:$0xff] }
 0x265   : > { %10930 = vmatprep.mubr.msk.bf16.mxu0 %vm12705_vm1, %v13060_v30 }
 0x26c   : > { %10931 = vmatmul.mubr.msk.bf16.gmra.mrb[28].mxu0 %vm328_vm2, %v2140_v25  ;;  %v2573_v25 = vpack.c.bf16 %v2526_v24, %v2525_v23  ;;  %v2554_v23 = vld [vmem:[#allocation2 + $0x112] sm:$0xff]  ;;  %v519_v24 = vld [vmem:[#allocation2 + $0x66] sm:$0xff] }
 0x26d   : > { %10934 = vmatprep.mubr.msk.bf16.mxu0 %vm12705_vm1, %v13060_v30 }
 0x274   : > { %10935 = vmatmul.mubr.msk.bf16.gmra.mrb[32].mxu0 %vm328_vm2, %v2141_v28  ;;  %v2574_v28 = vpack.c.bf16 %v2528_v27, %v2527_v26 }
 0x275   : > { %10938 = vmatprep.mubr.msk.bf16.mxu0 %vm12705_vm1, %v13060_v30 }
 0x27c   : > { %10939 = vmatmul.mubr.msk.bf16.gmra.mrb[36].mxu0 %vm328_vm2, %v2142_v1  ;;  %v2575_v1 = vpack.c.bf16 %v2530_v31, %v2529_v29  ;;  %v2556_v29 = vld [vmem:[#allocation2 + $0x122] sm:$0xff]  ;;  %v521_v31 = vld [vmem:[#allocation2 + $0x76] sm:$0xff] }
 0x27d   : > { %10942 = vmatprep.mubr.msk.bf16.mxu0 %vm12705_vm1, %v13060_v30 }
 0x284   : > { %10943 = vmatmul.mubr.msk.bf16.gmra.mrb[40].mxu0 %vm328_vm2, %v2143_v34  ;;  %v2576_v34 = vpack.c.bf16 %v2532_v33, %v2531_v32 }
 0x285   : > { %10946 = vmatprep.mubr.msk.bf16.mxu0 %vm12705_vm1, %v13060_v30 }
 0x28c   : > { %10947 = vmatmul.mubr.msk.bf16.gmra.mrb[44].mxu0 %vm328_vm2, %v2144_v37  ;;  %v2577_v37 = vpack.c.bf16 %v2534_v36, %v2533_v35  ;;  %v2558_v35 = vld [vmem:[#allocation2 + $0x132] sm:$0xff]  ;;  %v523_v36 = vld [vmem:[#allocation2 + $0x86] sm:$0xff] }
 0x28d   : > { %10950 = vmatprep.mubr.msk.bf16.mxu0 %vm12705_vm1, %v13060_v30 }
 0x294   : > { %10951 = vmatmul.mubr.msk.bf16.gmra.mrb[48].mxu0 %vm328_vm2, %v2145_v40  ;;  %v2578_v40 = vpack.c.bf16 %v2536_v39, %v2535_v38 }
 0x295   : > { %10954 = vmatprep.mubr.msk.bf16.mxu0 %vm12705_vm1, %v13060_v30 }
 0x29c   : > { %10955 = vmatmul.mubr.msk.bf16.gmra.mrb[52].mxu0 %vm328_vm2, %v2146_v43  ;;  %v2579_v43 = vpack.c.bf16 %v2538_v42, %v2537_v41  ;;  %v2560_v41 = vld [vmem:[#allocation2 + $0x142] sm:$0xff]  ;;  %v525_v42 = vld [vmem:[#allocation2 + $0x96] sm:$0xff] }
 0x29d   : > { %10958 = vmatprep.mubr.msk.bf16.mxu0 %vm12705_vm1, %v13060_v30 }
 0x2a4   : > { %10959 = vmatmul.mubr.msk.bf16.gmra.mrb[56].mxu0 %vm328_vm2, %v2147_v46  ;;  %v2580_v46 = vpack.c.bf16 %v2540_v45, %v2539_v44 }
 0x2a5   : > { %10962 = vmatprep.mubr.msk.bf16.mxu0 %vm12705_vm1, %v13060_v30 }
 0x2ac   : > { %10963 = vmatmul.mubr.msk.bf16.gmra.mrb[60].mxu0 %vm328_vm2, %v2148_v49  ;;  %v2542_v49 = vld [vmem:[#allocation2 + $0xb2] sm:$0xff] }
 0x2ad   : > { %10966 = vmatprep.mubr.msk.bf16.mxu0 %vm12705_vm1, %v13060_v30  ;;  %v2581_v54 = vpack.c.bf16 %v2542_v49, %v2541_v48  ;;  %v527_v48 = vld [vmem:[#allocation2 + $0xa6] sm:$0xff]  ;;  %v528_v49 = vld [vmem:[#allocation2 + $0xae] sm:$0xff] }
 0x2ae   : > { %v567_v50 = vpack.c.bf16 %v528_v49, %v527_v48  ;;  %v548_v48 = vld [vmem:[#allocation2 + $0x14e] sm:$0xff] }
 0x2b4   : > { %10967 = vmatmul.mubr.msk.bf16.gmra.mrb[64].mxu0 %vm328_vm2, %v2149_v52  ;;  %v508_v52 = vld [vmem:[#allocation2 + $0xe] sm:$0xff] }
 0x2b5   : > { %10970 = vmatprep.mubr.msk.bf16.mxu0 %vm12705_vm1, %v13060_v30  ;;  %v557_v53 = vpack.c.bf16 %v508_v52, %v507_v51  ;;  %v2563_v52 = vld [vmem:[#allocation2 + $0x15a] sm:$0xff] }
 0x2b7   : > { %10495 = vmatmul.mubr.msk.bf16.vlgmr.msra.gmra.mrb[0].mxu1 %vm328_vm2, %v557_v53  ;;  %v2564_v53 = vld [vmem:[#allocation2 + $0x162] sm:$0xff] }
 0x2b8   : > { %10498 = vmatprep.mubr.msk.bf16.mxu1 %vm12705_vm1, %v13322_v20  ;;  %11405 = vmatpush3.bf16.msra.mxu1 %v12809_v2  ;;  %v2545_v2 = vld [vmem:[#allocation2 + $0xca] sm:$0xff] }
 0x2bc   : > { %10971 = vmatmul.mubr.msk.bf16.gmra.mrb[68].mxu0 %vm328_vm2, %v2150_v55  ;;  %v2543_v55 = vld [vmem:[#allocation2 + $0xba] sm:$0xff] }
 0x2bd   : > { %10974 = vmatprep.mubr.msk.bf16.mxu0 %vm12705_vm1, %v13060_v30  ;;  %v2582_v60 = vpack.c.bf16 %v2544_v56, %v2543_v55  ;;  %v530_v55 = vld [vmem:[#allocation2 + $0xbe] sm:$0xff] }
 0x2c4   : > { %10975 = vmatmul.mubr.msk.bf16.gmra.mrb[72].mxu0 %vm328_vm2, %v2151_v58  ;;  %v510_v58 = vld [vmem:[#allocation2 + $0x1e] sm:$0xff] }
 0x2c5   : > { %10978 = vmatprep.mubr.msk.bf16.mxu0 %vm12705_vm1, %v13060_v30  ;;  %v558_v59 = vpack.c.bf16 %v510_v58, %v509_v57  ;;  %v2592_v57 = vpack.c.bf16 %v2564_v53, %v2563_v52  ;;  %v2565_v58 = vld [vmem:[#allocation2 + $0x16a] sm:$0xff]  ;;  %v2972_v52 = vld [vmem:[#allocation2 + $0x73] sm:$0xff] }
 0x2c6   : > { %v549_v53 = vld [vmem:[#allocation2 + $0x156] sm:$0xff] }
 0x2c7   : > { %10499 = vmatmul.mubr.msk.bf16.gmra.mrb[4].mxu1 %vm328_vm2, %v558_v59  ;;  %v2566_v59 = vld [vmem:[#allocation2 + $0x172] sm:$0xff] }
 0x2c8   : > { %10502 = vmatprep.mubr.msk.bf16.mxu1 %vm12705_vm1, %v13322_v20 }
 0x2cc   : > { %10979 = vmatmul.mubr.msk.bf16.gmra.mrb[76].mxu0 %vm328_vm2, %v2152_v61  ;;  %v2546_v61 = vld [vmem:[#allocation2 + $0xd2] sm:$0xff] }
 0x2cd   : > { %10982 = vmatprep.mubr.msk.bf16.mxu0 %vm12705_vm1, %v13060_v30  ;;  %v2583_v3 = vpack.c.bf16 %v2546_v61, %v2545_v2  ;;  %v532_v2 = vld [vmem:[#allocation2 + $0xce] sm:$0xff] }
 0x2d4   : > { %10983 = vmatmul.mubr.msk.bf16.gmra.mrb[80].mxu0 %vm328_vm2, %v2153_v0  ;;  %v559_v0 = vpack.c.bf16 %v512_v63, %v511_v62  ;;  %v2593_v62 = vpack.c.bf16 %v2566_v59, %v2565_v58  ;;  %v2567_v63 = vld [vmem:[#allocation2 + $0x17a] sm:$0xff]  ;;  %v2974_v58 = vld [vmem:[#allocation2 + $0x83] sm:$0xff] }
 0x2d5   : > { %10986 = vmatprep.mubr.msk.bf16.mxu0 %vm12705_vm1, %v13060_v30  ;;  %v551_v59 = vld [vmem:[#allocation2 + $0x166] sm:$0xff] }
 0x2d6   : > { %10503 = vmatmul.mubr.msk.bf16.gmra.mrb[8].mxu1 %vm328_vm2, %v559_v0  ;;  %v2568_v0 = vld [vmem:[#allocation2 + $0x182] sm:$0xff] }
 0x2d7   : > { %10506 = vmatprep.mubr.msk.bf16.mxu1 %vm12705_vm1, %v13322_v20 }
 0x2dc   : > { %10987 = vmatmul.mubr.msk.bf16.gmra.mrb[84].mxu0 %vm328_vm2, %v2154_v5  ;;  %v2548_v5 = vld [vmem:[#allocation2 + $0xe2] sm:$0xff] }
 0x2dd   : > { %10990 = vmatprep.mubr.msk.bf16.mxu0 %vm12705_vm1, %v13060_v30  ;;  %v2584_v9 = vpack.c.bf16 %v2548_v5, %v2547_v4  ;;  %v534_v4 = vld [vmem:[#allocation2 + $0xde] sm:$0xff] }
 0x2e4   : > { %10991 = vmatmul.mubr.msk.bf16.gmra.mrb[88].mxu0 %vm328_vm2, %v2155_v8  ;;  %v560_v8 = vpack.c.bf16 %v514_v7, %v513_v6  ;;  %v2594_v6 = vpack.c.bf16 %v2568_v0, %v2567_v63  ;;  %v2569_v7 = vld [vmem:[#allocation2 + $0x18a] sm:$0xff]  ;;  %v2976_v63 = vld [vmem:[#allocation2 + $0x93] sm:$0xff] }
 0x2e5   : > { %10994 = vmatprep.mubr.msk.bf16.mxu0 %vm12705_vm1, %v13060_v30  ;;  %v553_v0 = vld [vmem:[#allocation2 + $0x176] sm:$0xff] }
 0x2e6   : > { %10507 = vmatmul.mubr.msk.bf16.gmra.mrb[12].mxu1 %vm328_vm2, %v560_v8  ;;  %v2570_v8 = vld [vmem:[#allocation2 + $0x192] sm:$0x7f] }
 0x2e7   : > { %10510 = vmatprep.mubr.msk.bf16.mxu1 %vm12705_vm1, %v13322_v20 }
 0x2ec   : > { %10995 = vmatmul.mubr.msk.bf16.gmra.mrb[92].mxu0 %vm328_vm2, %v2156_v11  ;;  %v2550_v11 = vld [vmem:[#allocation2 + $0xf2] sm:$0xff] }
 0x2ed   : > { %10998 = vmatprep.mubr.msk.bf16.mxu0 %vm12705_vm1, %v13060_v30  ;;  %v2585_v15 = vpack.c.bf16 %v2550_v11, %v2549_v10  ;;  %v536_v10 = vld [vmem:[#allocation2 + $0xee] sm:$0xff] }
 0x2f4   : > { %10999 = vmatmul.mubr.msk.bf16.gmra.mrb[96].mxu0 %vm328_vm2, %v2157_v14  ;;  %v561_v14 = vpack.c.bf16 %v516_v13, %v515_v12  ;;  %v2595_v12 = vpack.c.bf16 %v2570_v8, %v2569_v7  ;;  %v2959_v13 = vld [vmem:[#allocation2 + $0xb] sm:$0xff]  ;;  %v2978_v7 = vld [vmem:[#allocation2 + $0xa3] sm:$0xff] }
 0x2f5   : > { %11004 = vmatprep.mubr.msk.bf16.mxu0 %vm12705_vm1, %v13060_v30  ;;  %v2572_v30 = vpack.c.bf16 %v2524_v22, %v2523_v21  ;;  %v2586_v22 = vpack.c.bf16 %v2552_v17, %v2551_v16  ;;  %v538_v16 = vld [vmem:[#allocation2 + $0xfe] sm:$0xff]  ;;  %v555_v8 = vld [vmem:[#allocation2 + $0x186] sm:$0xff] }
 0x2f6   : > { %10511 = vmatmul.mubr.msk.bf16.gmra.mrb[16].mxu1 %vm328_vm2, %v561_v14  ;;  %v2960_v14 = vld [vmem:[#allocation2 + $0x13] sm:$0xff]  ;;  %v9112_v17 = vld [vmem:[%s15351_s1 + $0x1c] sm:$0xf] }
 0x2f7   : > { %10514 = vmatprep.mubr.msk.bf16.mxu1 %vm12705_vm1, %v13322_v20 }
 0x2fc   : > { %11005 = vmatmul.mubr.msk.bf16.vlgmr.msra.gmra.mrb[0].mxu0 %vm328_vm2, %v2571_v18  ;;  %v517_v18 = vld [vmem:[#allocation2 + $0x56] sm:$0xff] }
 0x2fd   : > { %11008 = vmatprep.mubr.msk.bf16.mxu0 %vm12705_vm1, %v13322_v20  ;;  %11105 = vmatpush3.bf16.msra.mxu0 %v3112_v19  ;;  %v518_v19 = vld [vmem:[#allocation2 + $0x5e] sm:$0xff] }
 0x2fe   : > { %11206 = vmatprep.subr.bf16.mxu0 %v13322_v20  ;;  %v562_v21 = vpack.c.bf16 %v518_v19, %v517_v18  ;;  %v3009_v19 = vpack.c.bf16 %v2960_v14, %v2959_v13  ;;  %v2980_v13 = vld [vmem:[#allocation2 + $0xb3] sm:$0xff] }
 0x2ff   : > { %v457_v14 = vld [vmem:[#allocation2 + $0xd5] sm:$0xff] }
 0x300   : > { %10515 = vmatmul.mubr.msk.bf16.gmra.mrb[20].mxu1 %vm328_vm2, %v562_v21  ;;  %v3550_v21 = vsel %vm659_vm0, %v9112_v17, 0 }
 0x301   : > { %10518 = vmatprep.mubr.msk.bf16.mxu1 %vm12705_vm1, %v13322_v20 }
 0x304   : > { %11009 = vmatmul.mubr.msk.bf16.gmra.mrb[4].mxu0 %vm328_vm2, %v2572_v30  ;;  %v2553_v30 = vld [vmem:[#allocation2 + $0x10a] sm:$0xff] }
 0x305   : > { %11012 = vmatprep.mubr.msk.bf16.mxu0 %vm12705_vm1, %v13322_v20  ;;  %v2587_v27 = vpack.c.bf16 %v2554_v23, %v2553_v30  ;;  %v2962_v30 = vld [vmem:[#allocation2 + $0x23] sm:$0xff] }
 0x306   : > { %v539_v23 = vld [vmem:[#allocation2 + $0x106] sm:$0xff] }
 0x30c   : > { %11013 = vmatmul.mubr.msk.bf16.gmra.mrb[8].mxu0 %vm328_vm2, %v2573_v25  ;;  %v520_v25 = vld [vmem:[#allocation2 + $0x6e] sm:$0xff] }
 0x30d   : > { %11016 = vmatprep.mubr.msk.bf16.mxu0 %vm12705_vm1, %v13322_v20  ;;  %v563_v26 = vpack.c.bf16 %v520_v25, %v519_v24  ;;  %v540_v24 = vld [vmem:[#allocation2 + $0x10e] sm:$0xff] }
 0x30e   : > { %v573_v25 = vpack.c.bf16 %v540_v24, %v539_v23  ;;  %v2983_v24 = vld [vmem:[#allocation2 + $0xcb] sm:$0xff] }
 0x30f   : > { %10519 = vmatmul.mubr.msk.bf16.gmra.mrb[24].mxu1 %vm328_vm2, %v563_v26 }
 0x310   : > { %10522 = vmatprep.mubr.msk.bf16.mxu1 %vm12705_vm1, %v13322_v20 }
 0x314   : > { %11017 = vmatmul.mubr.msk.bf16.gmra.mrb[12].mxu0 %vm328_vm2, %v2574_v28  ;;  %v2555_v28 = vld [vmem:[#allocation2 + $0x11a] sm:$0xff] }
 0x315   : > { %11020 = vmatprep.mubr.msk.bf16.mxu0 %vm12705_vm1, %v13322_v20  ;;  %v2588_v33 = vpack.c.bf16 %v2556_v29, %v2555_v28  ;;  %v2964_v28 = vld [vmem:[#allocation2 + $0x33] sm:$0xff] }
 0x316   : > { %v541_v29 = vld [vmem:[#allocation2 + $0x116] sm:$0xff] }
 0x31c   : > { %11021 = vmatmul.mubr.msk.bf16.gmra.mrb[16].mxu0 %vm328_vm2, %v2575_v1  ;;  %v522_v1 = vld [vmem:[#allocation2 + $0x7e] sm:$0xff] }
 0x31d   : > { %11024 = vmatprep.mubr.msk.bf16.mxu0 %vm12705_vm1, %v13322_v20  ;;  %v564_v32 = vpack.c.bf16 %v522_v1, %v521_v31  ;;  %v542_v31 = vld [vmem:[#allocation2 + $0x11e] sm:$0xff] }
 0x31e   : > { %v574_v1 = vpack.c.bf16 %v542_v31, %v541_v29  ;;  %v2985_v31 = vld [vmem:[#allocation2 + $0xdb] sm:$0xff] }
 0x31f   : > { %10523 = vmatmul.mubr.msk.bf16.gmra.mrb[28].mxu1 %vm328_vm2, %v564_v32 }
 0x320   : > { %10526 = vmatprep.mubr.msk.bf16.mxu1 %vm12705_vm1, %v13322_v20 }
 0x324   : > { %11025 = vmatmul.mubr.msk.bf16.gmra.mrb[20].mxu0 %vm328_vm2, %v2576_v34  ;;  %v2557_v34 = vld [vmem:[#allocation2 + $0x12a] sm:$0xff] }
 0x325   : > { %11028 = vmatprep.mubr.msk.bf16.mxu0 %vm12705_vm1, %v13322_v20  ;;  %v2589_v39 = vpack.c.bf16 %v2558_v35, %v2557_v34  ;;  %v2966_v34 = vld [vmem:[#allocation2 + $0x43] sm:$0xff] }
 0x326   : > { %v543_v35 = vld [vmem:[#allocation2 + $0x126] sm:$0xff] }
 0x32c   : > { %11029 = vmatmul.mubr.msk.bf16.gmra.mrb[24].mxu0 %vm328_vm2, %v2577_v37  ;;  %v524_v37 = vld [vmem:[#allocation2 + $0x8e] sm:$0xff] }
 0x32d   : > { %11032 = vmatprep.mubr.msk.bf16.mxu0 %vm12705_vm1, %v13322_v20  ;;  %v565_v38 = vpack.c.bf16 %v524_v37, %v523_v36  ;;  %v544_v36 = vld [vmem:[#allocation2 + $0x12e] sm:$0xff] }
 0x32e   : > { %v575_v37 = vpack.c.bf16 %v544_v36, %v543_v35  ;;  %v2987_v36 = vld [vmem:[#allocation2 + $0xeb] sm:$0xff] }
 0x32f   : > { %10527 = vmatmul.mubr.msk.bf16.gmra.mrb[32].mxu1 %vm328_vm2, %v565_v38 }
 0x330   : > { %10530 = vmatprep.mubr.msk.bf16.mxu1 %vm12705_vm1, %v13322_v20 }
 0x334   : > { %11033 = vmatmul.mubr.msk.bf16.gmra.mrb[28].mxu0 %vm328_vm2, %v2578_v40  ;;  %v2559_v40 = vld [vmem:[#allocation2 + $0x13a] sm:$0xff] }
 0x335   : > { %11036 = vmatprep.mubr.msk.bf16.mxu0 %vm12705_vm1, %v13322_v20  ;;  %v2590_v45 = vpack.c.bf16 %v2560_v41, %v2559_v40  ;;  %v2968_v40 = vld [vmem:[#allocation2 + $0x53] sm:$0xff] }
 0x336   : > { %v545_v41 = vld [vmem:[#allocation2 + $0x136] sm:$0xff] }
 0x33c   : > { %11037 = vmatmul.mubr.msk.bf16.gmra.mrb[32].mxu0 %vm328_vm2, %v2579_v43  ;;  %v526_v43 = vld [vmem:[#allocation2 + $0x9e] sm:$0xff] }
 0x33d   : > { %11040 = vmatprep.mubr.msk.bf16.mxu0 %vm12705_vm1, %v13322_v20  ;;  %v566_v44 = vpack.c.bf16 %v526_v43, %v525_v42  ;;  %v546_v42 = vld [vmem:[#allocation2 + $0x13e] sm:$0xff] }
 0x33e   : > { %v576_v43 = vpack.c.bf16 %v546_v42, %v545_v41  ;;  %v2989_v42 = vld [vmem:[#allocation2 + $0xfb] sm:$0xff] }
 0x33f   : > { %10531 = vmatmul.mubr.msk.bf16.gmra.mrb[36].mxu1 %vm328_vm2, %v566_v44 }
 0x340   : > { %10534 = vmatprep.mubr.msk.bf16.mxu1 %vm12705_vm1, %v13322_v20 }
 0x344   : > { %11041 = vmatmul.mubr.msk.bf16.gmra.mrb[36].mxu0 %vm328_vm2, %v2580_v46  ;;  %v2561_v46 = vld [vmem:[#allocation2 + $0x14a] sm:$0xff] }
 0x345   : > { %11044 = vmatprep.mubr.msk.bf16.mxu0 %vm12705_vm1, %v13322_v20  ;;  %v2591_v51 = vpack.c.bf16 %v2562_v47, %v2561_v46  ;;  %v2970_v46 = vld [vmem:[#allocation2 + $0x63] sm:$0xff] }
 0x346   : > { %v547_v47 = vld [vmem:[#allocation2 + $0x146] sm:$0xff] }
 0x347   : > { %10535 = vmatmul.mubr.msk.bf16.gmra.mrb[40].mxu1 %vm328_vm2, %v567_v50  ;;  %v577_v49 = vpack.c.bf16 %v548_v48, %v547_v47  ;;  %v2991_v48 = vld [vmem:[#allocation2 + $0x10b] sm:$0xff] }
 0x348   : > { %10538 = vmatprep.mubr.msk.bf16.mxu1 %vm12705_vm1, %v13322_v20 }
 0x34c   : > { %11045 = vmatmul.mubr.msk.bf16.gmra.mrb[40].mxu0 %vm328_vm2, %v2581_v54  ;;  %v529_v54 = vld [vmem:[#allocation2 + $0xb6] sm:$0xff] }
 0x34d   : > { %11048 = vmatprep.mubr.msk.bf16.mxu0 %vm12705_vm1, %v13322_v20  ;;  %v568_v56 = vpack.c.bf16 %v530_v55, %v529_v54  ;;  %v550_v54 = vld [vmem:[#allocation2 + $0x15e] sm:$0xff] }
 0x34e   : > { %v578_v55 = vpack.c.bf16 %v550_v54, %v549_v53  ;;  %v2993_v54 = vld [vmem:[#allocation2 + $0x11b] sm:$0xff] }
 0x34f   : > { %10539 = vmatmul.mubr.msk.bf16.gmra.mrb[44].mxu1 %vm328_vm2, %v568_v56 }
 0x350   : > { %10542 = vmatprep.mubr.msk.bf16.mxu1 %vm12705_vm1, %v13322_v20 }
 0x354   : > { %11049 = vmatmul.mubr.msk.bf16.gmra.mrb[44].mxu0 %vm328_vm2, %v2582_v60  ;;  %v531_v60 = vld [vmem:[#allocation2 + $0xc6] sm:$0xff] }
 0x355   : > { %11052 = vmatprep.mubr.msk.bf16.mxu0 %vm12705_vm1, %v13322_v20  ;;  %v569_v61 = vpack.c.bf16 %v532_v2, %v531_v60  ;;  %v552_v60 = vld [vmem:[#allocation2 + $0x16e] sm:$0xff] }
 0x356   : > { %v579_v2 = vpack.c.bf16 %v552_v60, %v551_v59  ;;  %v2995_v60 = vld [vmem:[#allocation2 + $0x12b] sm:$0xff] }
 0x357   : > { %10543 = vmatmul.mubr.msk.bf16.gmra.mrb[48].mxu1 %vm328_vm2, %v569_v61 }
 0x358   : > { %10546 = vmatprep.mubr.msk.bf16.mxu1 %vm12705_vm1, %v13322_v20 }
 0x35c   : > { %11053 = vmatmul.mubr.msk.bf16.gmra.mrb[48].mxu0 %vm328_vm2, %v2583_v3  ;;  %v533_v3 = vld [vmem:[#allocation2 + $0xd6] sm:$0xff] }
 0x35d   : > { %11056 = vmatprep.mubr.msk.bf16.mxu0 %vm12705_vm1, %v13322_v20  ;;  %v570_v5 = vpack.c.bf16 %v534_v4, %v533_v3  ;;  %v554_v3 = vld [vmem:[#allocation2 + $0x17e] sm:$0xff] }
 0x35e   : > { %v580_v4 = vpack.c.bf16 %v554_v3, %v553_v0  ;;  %v2997_v3 = vld [vmem:[#allocation2 + $0x13b] sm:$0xff] }
 0x35f   : > { %10547 = vmatmul.mubr.msk.bf16.gmra.mrb[52].mxu1 %vm328_vm2, %v570_v5 }
 0x360   : > { %10550 = vmatprep.mubr.msk.bf16.mxu1 %vm12705_vm1, %v13322_v20 }
 0x364   : > { %11057 = vmatmul.mubr.msk.bf16.gmra.mrb[52].mxu0 %vm328_vm2, %v2584_v9  ;;  %v535_v9 = vld [vmem:[#allocation2 + $0xe6] sm:$0xff] }
 0x365   : > { %11060 = vmatprep.mubr.msk.bf16.mxu0 %vm12705_vm1, %v13322_v20  ;;  %v571_v11 = vpack.c.bf16 %v536_v10, %v535_v9  ;;  %v556_v9 = vld [vmem:[#allocation2 + $0x18e] sm:$0x7f] }
 0x366   : > { %v581_v10 = vpack.c.bf16 %v556_v9, %v555_v8  ;;  %v2999_v9 = vld [vmem:[#allocation2 + $0x14b] sm:$0xff] }
 0x367   : > { %10551 = vmatmul.mubr.msk.bf16.gmra.mrb[56].mxu1 %vm328_vm2, %v571_v11 }
 0x368   : > { %10554 = vmatprep.mubr.msk.bf16.mxu1 %vm12705_vm1, %v13322_v20 }
 0x36c   : > { %11061 = vmatmul.mubr.msk.bf16.gmra.mrb[56].mxu0 %vm328_vm2, %v2585_v15  ;;  %v537_v15 = vld [vmem:[#allocation2 + $0xf6] sm:$0xff] }
 0x36d   : > { %11064 = vmatprep.mubr.msk.bf16.mxu0 %vm12705_vm1, %v13322_v20  ;;  %v572_v18 = vpack.c.bf16 %v538_v16, %v537_v15  ;;  %v458_v15 = vld [vmem:[#allocation2 + $0xdd] sm:$0xff] }
 0x36e   : > { %v494_v16 = vpack.c.bf16 %v458_v15, %v457_v14  ;;  %v3001_v15 = vld [vmem:[#allocation2 + $0x15b] sm:$0xff] }
 0x36f   : > { %10555 = vmatmul.mubr.msk.bf16.gmra.mrb[60].mxu1 %vm328_vm2, %v572_v18  ;;  %v2981_v18 = vld [vmem:[#allocation2 + $0xbb] sm:$0xff] }
 0x370   : > { %10558 = vmatprep.mubr.msk.bf16.mxu1 %vm12705_vm1, %v13322_v20 }
 0x374   : > { %11065 = vmatmul.mubr.msk.bf16.gmra.mrb[60].mxu0 %vm328_vm2, %v2586_v22  ;;  %v2961_v22 = vld [vmem:[#allocation2 + $0x1b] sm:$0xff] }
 0x375   : > { %11068 = vmatprep.mubr.msk.bf16.mxu0 %vm12705_vm1, %v13322_v20  ;;  %v3010_v26 = vpack.c.bf16 %v2962_v30, %v2961_v22  ;;  %v460_v22 = vld [vmem:[#allocation2 + $0xed] sm:$0xff] }
 0x377   : > { %10559 = vmatmul.mubr.msk.bf16.gmra.mrb[64].mxu1 %vm328_vm2, %v573_v25  ;;  %v2984_v25 = vld [vmem:[#allocation2 + $0xd3] sm:$0xff] }
 0x378   : > { %10562 = vmatprep.mubr.msk.bf16.mxu1 %vm12705_vm1, %v13322_v20  ;;  %v3021_v29 = vpack.c.bf16 %v2984_v25, %v2983_v24  ;;  %v3005_v24 = vld [vmem:[#allocation2 + $0x17b] sm:$0xff]  ;;  %v3006_v25 = vld [vmem:[#allocation2 + $0x183] sm:$0xff] }
 0x37c   : > { %11069 = vmatmul.mubr.msk.bf16.gmra.mrb[64].mxu0 %vm328_vm2, %v2587_v27  ;;  %v2963_v27 = vld [vmem:[#allocation2 + $0x2b] sm:$0xff] }
 0x37d   : > { %11072 = vmatprep.mubr.msk.bf16.mxu0 %vm12705_vm1, %v13322_v20  ;;  %v3011_v32 = vpack.c.bf16 %v2964_v28, %v2963_v27  ;;  %v462_v27 = vld [vmem:[#allocation2 + $0xfd] sm:$0xff] }
 0x37f   : > { %10563 = vmatmul.mubr.msk.bf16.gmra.mrb[68].mxu1 %vm328_vm2, %v574_v1  ;;  %v2986_v1 = vld [vmem:[#allocation2 + $0xe3] sm:$0xff] }
 0x380   : > { %10566 = vmatprep.mubr.msk.bf16.mxu1 %vm12705_vm1, %v13322_v20  ;;  %v3022_v35 = vpack.c.bf16 %v2986_v1, %v2985_v31 }
 0x384   : > { %11073 = vmatmul.mubr.msk.bf16.gmra.mrb[68].mxu0 %vm328_vm2, %v2588_v33  ;;  %v2965_v33 = vld [vmem:[#allocation2 + $0x3b] sm:$0xff] }
 0x385   : > { %11076 = vmatprep.mubr.msk.bf16.mxu0 %vm12705_vm1, %v13322_v20  ;;  %v3012_v38 = vpack.c.bf16 %v2966_v34, %v2965_v33  ;;  %v464_v33 = vld [vmem:[#allocation2 + $0x10d] sm:$0xff] }
 0x387   : > { %10567 = vmatmul.mubr.msk.bf16.gmra.mrb[72].mxu1 %vm328_vm2, %v575_v37  ;;  %v2988_v37 = vld [vmem:[#allocation2 + $0xf3] sm:$0xff] }
 0x388   : > { %10570 = vmatprep.mubr.msk.bf16.mxu1 %vm12705_vm1, %v13322_v20  ;;  %v3023_v41 = vpack.c.bf16 %v2988_v37, %v2987_v36  ;;  %v3398_v36 = vld [vmem:[#allocation2 + $0x14] sm:$0xff] }
 0x38c   : > { %11077 = vmatmul.mubr.msk.bf16.gmra.mrb[72].mxu0 %vm328_vm2, %v2589_v39  ;;  %v2967_v39 = vld [vmem:[#allocation2 + $0x4b] sm:$0xff] }
 0x38d   : > { %11080 = vmatprep.mubr.msk.bf16.mxu0 %vm12705_vm1, %v13322_v20  ;;  %v3013_v44 = vpack.c.bf16 %v2968_v40, %v2967_v39  ;;  %v466_v39 = vld [vmem:[#allocation2 + $0x11d] sm:$0xff] }
 0x38f   : > { %10571 = vmatmul.mubr.msk.bf16.gmra.mrb[76].mxu1 %vm328_vm2, %v576_v43  ;;  %v2990_v43 = vld [vmem:[#allocation2 + $0x103] sm:$0xff] }
 0x390   : > { %10574 = vmatprep.mubr.msk.bf16.mxu1 %vm12705_vm1, %v13322_v20  ;;  %v3024_v47 = vpack.c.bf16 %v2990_v43, %v2989_v42  ;;  %v3399_v42 = vld [vmem:[#allocation2 + $0x1c] sm:$0xff]  ;;  %v3400_v43 = vld [vmem:[#allocation2 + $0x24] sm:$0xff] }
 0x394   : > { %11081 = vmatmul.mubr.msk.bf16.gmra.mrb[76].mxu0 %vm328_vm2, %v2590_v45  ;;  %v2969_v45 = vld [vmem:[#allocation2 + $0x5b] sm:$0xff] }
 0x395   : > { %11084 = vmatprep.mubr.msk.bf16.mxu0 %vm12705_vm1, %v13322_v20  ;;  %v3014_v50 = vpack.c.bf16 %v2970_v46, %v2969_v45  ;;  %v468_v45 = vld [vmem:[#allocation2 + $0x12d] sm:$0xff] }
 0x397   : > { %10575 = vmatmul.mubr.msk.bf16.gmra.mrb[80].mxu1 %vm328_vm2, %v577_v49  ;;  %v2992_v49 = vld [vmem:[#allocation2 + $0x113] sm:$0xff] }
 0x398   : > { %10578 = vmatprep.mubr.msk.bf16.mxu1 %vm12705_vm1, %v13322_v20  ;;  %v3025_v53 = vpack.c.bf16 %v2992_v49, %v2991_v48  ;;  %v3401_v49 = vld [vmem:[#allocation2 + $0x2c] sm:$0xff] }
 0x39c   : > { %11085 = vmatmul.mubr.msk.bf16.gmra.mrb[80].mxu0 %vm328_vm2, %v2591_v51  ;;  %v2971_v51 = vld [vmem:[#allocation2 + $0x6b] sm:$0xff] }
 0x39d   : > { %11088 = vmatprep.mubr.msk.bf16.mxu0 %vm12705_vm1, %v13322_v20  ;;  %v3015_v56 = vpack.c.bf16 %v2972_v52, %v2971_v51  ;;  %v470_v51 = vld [vmem:[#allocation2 + $0x13d] sm:$0xff] }
 0x39f   : > { %10579 = vmatmul.mubr.msk.bf16.gmra.mrb[84].mxu1 %vm328_vm2, %v578_v55  ;;  %v2994_v55 = vld [vmem:[#allocation2 + $0x123] sm:$0xff] }
 0x3a0   : > { %10582 = vmatprep.mubr.msk.bf16.mxu1 %vm12705_vm1, %v13322_v20  ;;  %v3026_v59 = vpack.c.bf16 %v2994_v55, %v2993_v54 }
 0x3a4   : > { %11089 = vmatmul.mubr.msk.bf16.gmra.mrb[84].mxu0 %vm328_vm2, %v2592_v57  ;;  %v2973_v57 = vld [vmem:[#allocation2 + $0x7b] sm:$0xff] }
 0x3a5   : > { %11092 = vmatprep.mubr.msk.bf16.mxu0 %vm12705_vm1, %v13322_v20  ;;  %v3016_v61 = vpack.c.bf16 %v2974_v58, %v2973_v57  ;;  %v472_v57 = vld [vmem:[#allocation2 + $0x14d] sm:$0xff] }
 0x3a7   : > { %10583 = vmatmul.mubr.msk.bf16.gmra.mrb[88].mxu1 %vm328_vm2, %v579_v2  ;;  %v2996_v2 = vld [vmem:[#allocation2 + $0x133] sm:$0xff] }
 0x3a8   : > { %10586 = vmatprep.mubr.msk.bf16.mxu1 %vm12705_vm1, %v13322_v20  ;;  %v3027_v0 = vpack.c.bf16 %v2996_v2, %v2995_v60 }
 0x3ac   : > { %11093 = vmatmul.mubr.msk.bf16.gmra.mrb[88].mxu0 %vm328_vm2, %v2593_v62  ;;  %v2975_v62 = vld [vmem:[#allocation2 + $0x8b] sm:$0xff] }
 0x3ad   : > { %11096 = vmatprep.mubr.msk.bf16.mxu0 %vm12705_vm1, %v13322_v20  ;;  %v3017_v5 = vpack.c.bf16 %v2976_v63, %v2975_v62  ;;  %v474_v62 = vld [vmem:[#allocation2 + $0x15d] sm:$0xff] }
 0x3af   : > { %10587 = vmatmul.mubr.msk.bf16.gmra.mrb[92].mxu1 %vm328_vm2, %v580_v4  ;;  %v2998_v4 = vld [vmem:[#allocation2 + $0x143] sm:$0xff] }
 0x3b0   : > { %10590 = vmatprep.mubr.msk.bf16.mxu1 %vm12705_vm1, %v13322_v20  ;;  %v3028_v8 = vpack.c.bf16 %v2998_v4, %v2997_v3 }
 0x3b4   : > { %11097 = vmatmul.mubr.msk.bf16.gmra.mrb[92].mxu0 %vm328_vm2, %v2594_v6  ;;  %v2977_v6 = vld [vmem:[#allocation2 + $0x9b] sm:$0xff] }
 0x3b5   : > { %11100 = vmatprep.mubr.msk.bf16.mxu0 %vm12705_vm1, %v13322_v20  ;;  %v3018_v11 = vpack.c.bf16 %v2978_v7, %v2977_v6  ;;  %v476_v6 = vld [vmem:[#allocation2 + $0x16d] sm:$0xff] }
 0x3b7   : > { %10591 = vmatmul.mubr.msk.bf16.gmra.mrb[96].mxu1 %vm328_vm2, %v581_v10  ;;  %v3000_v10 = vld [vmem:[#allocation2 + $0x153] sm:$0xff] }
 0x3b8   : > { %10648 = vmatprep.mubr.msk.bf16.mxu1 %vm12705_vm1, %v13322_v20  ;;  %v3029_v14 = vpack.c.bf16 %v3000_v10, %v2999_v9 }
 0x3bc   : > { %11101 = vmatmul.mubr.msk.bf16.gmra.mrb[96].mxu0 %vm328_vm2, %v2595_v12  ;;  %v2979_v12 = vld [vmem:[#allocation2 + $0xab] sm:$0xff] }
 0x3bd   : > { %11106 = vmatprep.mubr.msk.bf16.mxu0 %vm12705_vm1, %v13322_v20  ;;  %v3019_v17 = vpack.c.bf16 %v2980_v13, %v2979_v12  ;;  %v478_v12 = vld [vmem:[#allocation2 + $0x17d] sm:$0xff] }
 0x3bf   : > { %10649 = vmatmul.mubr.msk.bf16.vlgmr.msra.gmra.mrb[52].mxu1 %vm328_vm2, %v494_v16  ;;  %v3002_v16 = vld [vmem:[#allocation2 + $0x163] sm:$0xff] }
 0x3c0   : > { %10652 = vmatprep.mubr.msk.bf16.mxu1 %vm12705_vm1, %v13322_v20 }
 0x3c4   : > { %11107 = vmatmul.mubr.msk.bf16.vlgmr.msra.gmra.mrb[0].mxu0 %vm328_vm2, %v3009_v19  ;;  %v2982_v19 = vld [vmem:[#allocation2 + $0xc3] sm:$0xff] }
 0x3c5   : > { %11110 = vmatprep.mubr.msk.bf16.mxu0 %vm12705_vm1, %v13322_v20  ;;  %11207 = vmatpush3.bf16.msra.mxu0 %v3550_v21  ;;  %v459_v21 = vld [vmem:[#allocation2 + $0xe5] sm:$0xff]  ;;  %v3020_v23 = vpack.c.bf16 %v2982_v19, %v2981_v18  ;;  %v480_v18 = vld [vmem:[#allocation2 + $0x18d] sm:$0x7f] }
 0x3c6   : > { %v495_v30 = vpack.c.bf16 %v460_v22, %v459_v21  ;;  %v3030_v21 = vpack.c.bf16 %v3002_v16, %v3001_v15  ;;  %v3003_v22 = vld [vmem:[#allocation2 + $0x16b] sm:$0xff]  ;;  %v3410_v15 = vld [vmem:[#allocation2 + $0x74] sm:$0xff] }
 0x3c8   : > { %10653 = vmatmul.mubr.msk.bf16.gmra.mrb[56].mxu1 %vm328_vm2, %v495_v30  ;;  %v3004_v30 = vld [vmem:[#allocation2 + $0x173] sm:$0xff] }
 0x3c9   : > { %10656 = vmatprep.mubr.msk.bf16.mxu1 %vm12705_vm1, %v13322_v20 }
 0x3cc   : > { %11111 = vmatmul.mubr.msk.bf16.gmra.mrb[4].mxu0 %vm328_vm2, %v3010_v26  ;;  %v461_v26 = vld [vmem:[#allocation2 + $0xf5] sm:$0xff] }
 0x3cd   : > { %11114 = vmatprep.mubr.msk.bf16.mxu0 %vm12705_vm1, %v13322_v20  ;;  %v496_v28 = vpack.c.bf16 %v462_v27, %v461_v26  ;;  %v3032_v26 = vpack.c.bf16 %v3006_v25, %v3005_v24  ;;  %v13588_v27 = vpop.f32.mrb[0].mxu1 }
 0x3ce   : > { %v10496_v31 = vpop.f32.mrb[1].mxu1 }
 0x3cf   : > { %v13592_v1 = vpop.f32.mrb[2].mxu1  ;;  %v3413_v31 = vld [vmem:[#allocation2 + $0x8c] sm:$0xff] }
 0x3d0   : > { %10657 = vmatmul.mubr.msk.bf16.gmra.mrb[60].mxu1 %vm328_vm2, %v496_v28  ;;  %v3007_v28 = vld [vmem:[#allocation2 + $0x18b] sm:$0xff] }
 0x3d1   : > { %10660 = vmatprep.mubr.msk.bf16.mxu1 %vm12705_vm1, %v13322_v20 }
 0x3d4   : > { %11115 = vmatmul.mubr.msk.bf16.gmra.mrb[8].mxu0 %vm328_vm2, %v3011_v32  ;;  %v463_v32 = vld [vmem:[#allocation2 + $0x105] sm:$0xff] }
 0x3d5   : > { %11118 = vmatprep.mubr.msk.bf16.mxu0 %vm12705_vm1, %v13322_v20  ;;  %v497_v34 = vpack.c.bf16 %v464_v33, %v463_v32  ;;  %v10497_v32 = vpop.f32.mrb[3].mxu1 }
 0x3d6   : > { %v3414_v32 = vld [vmem:[#allocation2 + $0x94] sm:$0xff] }
 0x3d8   : > { %10661 = vmatmul.mubr.msk.bf16.gmra.mrb[64].mxu1 %vm328_vm2, %v497_v34  ;;  %v13595_v34 = vpop.f32.mrb[4].mxu1 }
 0x3d9   : > { %10664 = vmatprep.mubr.msk.bf16.mxu1 %vm12705_vm1, %v13322_v20  ;;  %v10500_v37 = vpop.f32.mrb[5].mxu1 }
 0x3dc   : > { %11119 = vmatmul.mubr.msk.bf16.gmra.mrb[12].mxu0 %vm328_vm2, %v3012_v38  ;;  %v465_v38 = vld [vmem:[#allocation2 + $0x115] sm:$0xff] }
 0x3dd   : > { %11122 = vmatprep.mubr.msk.bf16.mxu0 %vm12705_vm1, %v13322_v20  ;;  %v498_v40 = vpack.c.bf16 %v466_v39, %v465_v38  ;;  %v13599_v38 = vpop.f32.mrb[6].mxu1 }
 0x3de   : > { %v10501_v39 = vpop.f32.mrb[7].mxu1 }
 0x3df   : > { %v3415_v39 = vld [vmem:[#allocation2 + $0x9c] sm:$0xff] }
 0x3e0   : > { %10665 = vmatmul.mubr.msk.bf16.gmra.mrb[68].mxu1 %vm328_vm2, %v498_v40 }
 0x3e1   : > { %10668 = vmatprep.mubr.msk.bf16.mxu1 %vm12705_vm1, %v13322_v20 }
 0x3e4   : > { %11123 = vmatmul.mubr.msk.bf16.gmra.mrb[16].mxu0 %vm328_vm2, %v3013_v44  ;;  %v467_v44 = vld [vmem:[#allocation2 + $0x125] sm:$0xff] }
 0x3e5   : > { %11126 = vmatprep.mubr.msk.bf16.mxu0 %vm12705_vm1, %v13322_v20  ;;  %v499_v46 = vpack.c.bf16 %v468_v45, %v467_v44 }
 0x3e8   : > { %10669 = vmatmul.mubr.msk.bf16.gmra.mrb[72].mxu1 %vm328_vm2, %v499_v46 }
 0x3e9   : > { %10672 = vmatprep.mubr.msk.bf16.mxu1 %vm12705_vm1, %v13322_v20 }
 0x3ec   : > { %11127 = vmatmul.mubr.msk.bf16.gmra.mrb[20].mxu0 %vm328_vm2, %v3014_v50  ;;  %v469_v50 = vld [vmem:[#allocation2 + $0x135] sm:$0xff] }
 0x3ed   : > { %11130 = vmatprep.mubr.msk.bf16.mxu0 %vm12705_vm1, %v13322_v20  ;;  %v500_v52 = vpack.c.bf16 %v470_v51, %v469_v50  ;;  %v3402_v50 = vld [vmem:[#allocation2 + $0x34] sm:$0xff] }
 0x3ee   : > { %v3449_v54 = vpack.c.bf16 %v3402_v50, %v3401_v49 }
 0x3f0   : > { %10673 = vmatmul.mubr.msk.bf16.gmra.mrb[76].mxu1 %vm328_vm2, %v500_v52 }
 0x3f1   : > { %10676 = vmatprep.mubr.msk.bf16.mxu1 %vm12705_vm1, %v13322_v20 }
 0x3f4   : > { %11131 = vmatmul.mubr.msk.bf16.gmra.mrb[24].mxu0 %vm328_vm2, %v3015_v56  ;;  %v471_v56 = vld [vmem:[#allocation2 + $0x145] sm:$0xff] }
 0x3f5   : > { %11134 = vmatprep.mubr.msk.bf16.mxu0 %vm12705_vm1, %v13322_v20  ;;  %v501_v58 = vpack.c.bf16 %v472_v57, %v471_v56  ;;  %v3403_v56 = vld [vmem:[#allocation2 + $0x3c] sm:$0xff]  ;;  %v3404_v57 = vld [vmem:[#allocation2 + $0x44] sm:$0xff] }
 0x3f6   : > { %v3450_v2 = vpack.c.bf16 %v3404_v57, %v3403_v56 }
 0x3f8   : > { %10677 = vmatmul.mubr.msk.bf16.gmra.mrb[80].mxu1 %vm328_vm2, %v501_v58 }
 0x3f9   : > { %10680 = vmatprep.mubr.msk.bf16.mxu1 %vm12705_vm1, %v13322_v20 }
 0x3fc   : > { %11135 = vmatmul.mubr.msk.bf16.gmra.mrb[28].mxu0 %vm328_vm2, %v3016_v61  ;;  %v473_v61 = vld [vmem:[#allocation2 + $0x155] sm:$0xff] }
 0x3fd   : > { %11138 = vmatprep.mubr.msk.bf16.mxu0 %vm12705_vm1, %v13322_v20  ;;  %v502_v63 = vpack.c.bf16 %v474_v62, %v473_v61  ;;  %v3405_v62 = vld [vmem:[#allocation2 + $0x4c] sm:$0xff] }
 0x400   : > { %10681 = vmatmul.mubr.msk.bf16.gmra.mrb[84].mxu1 %vm328_vm2, %v502_v63  ;;  %v3406_v63 = vld [vmem:[#allocation2 + $0x54] sm:$0xff] }
 0x401   : > { %10684 = vmatprep.mubr.msk.bf16.mxu1 %vm12705_vm1, %v13322_v20 }
 0x404   : > { %11139 = vmatmul.mubr.msk.bf16.gmra.mrb[32].mxu0 %vm328_vm2, %v3017_v5  ;;  %v475_v5 = vld [vmem:[#allocation2 + $0x165] sm:$0xff] }
 0x405   : > { %11142 = vmatprep.mubr.msk.bf16.mxu0 %vm12705_vm1, %v13322_v20  ;;  %v503_v7 = vpack.c.bf16 %v476_v6, %v475_v5  ;;  %v3451_v5 = vpack.c.bf16 %v3406_v63, %v3405_v62 }
 0x408   : > { %10685 = vmatmul.mubr.msk.bf16.gmra.mrb[88].mxu1 %vm328_vm2, %v503_v7  ;;  %v3407_v7 = vld [vmem:[#allocation2 + $0x5c] sm:$0xff] }
 0x409   : > { %10688 = vmatprep.mubr.msk.bf16.mxu1 %vm12705_vm1, %v13322_v20 }
 0x40c   : > { %11143 = vmatmul.mubr.msk.bf16.gmra.mrb[36].mxu0 %vm328_vm2, %v3018_v11  ;;  %v477_v11 = vld [vmem:[#allocation2 + $0x175] sm:$0xff] }
 0x40d   : > { %11146 = vmatprep.mubr.msk.bf16.mxu0 %vm12705_vm1, %v13322_v20  ;;  %v504_v13 = vpack.c.bf16 %v478_v12, %v477_v11 }
 0x410   : > { %10689 = vmatmul.mubr.msk.bf16.gmra.mrb[92].mxu1 %vm328_vm2, %v504_v13 }
 0x411   : > { %10692 = vmatprep.mubr.msk.bf16.mxu1 %vm12705_vm1, %v13322_v20 }
 0x414   : > { %11147 = vmatmul.mubr.msk.bf16.gmra.mrb[40].mxu0 %vm328_vm2, %v3019_v17  ;;  %v479_v17 = vld [vmem:[#allocation2 + $0x185] sm:$0xff] }
 0x415   : > { %11150 = vmatprep.mubr.msk.bf16.mxu0 %vm12705_vm1, %v13322_v20  ;;  %v505_v19 = vpack.c.bf16 %v480_v18, %v479_v17 }
 0x418   : > { %10693 = vmatmul.mubr.msk.bf16.gmra.mrb[96].mxu1 %vm328_vm2, %v505_v19 }
 0x41c   : > { %11151 = vmatmul.mubr.msk.bf16.gmra.mrb[44].mxu0 %vm328_vm2, %v3020_v23  ;;  %v3031_v23 = vpack.c.bf16 %v3004_v30, %v3003_v22  ;;  %v3411_v22 = vld [vmem:[#allocation2 + $0x7c] sm:$0xff]  ;;  %v3412_v30 = vld [vmem:[#allocation2 + $0x84] sm:$0xff] }
 0x41d   : > { %11154 = vmatprep.mubr.msk.bf16.mxu0 %vm12705_vm1, %v13322_v20 }
 0x424   : > { %11155 = vmatmul.mubr.msk.bf16.gmra.mrb[48].mxu0 %vm328_vm2, %v3021_v29  ;;  %v3008_v29 = vld [vmem:[#allocation2 + $0x193] sm:$0x7f] }
 0x425   : > { %11158 = vmatprep.mubr.msk.bf16.mxu0 %vm12705_vm1, %v13322_v20  ;;  %v3033_v33 = vpack.c.bf16 %v3008_v29, %v3007_v28  ;;  %v13653_v29 = vld [vmem:[#allocation4] sm:$0xff] }
 0x42c   : > { %11159 = vmatmul.mubr.msk.bf16.gmra.mrb[52].mxu0 %vm328_vm2, %v3022_v35  ;;  %v3397_v35 = vld [vmem:[#allocation2 + $0xc] sm:$0xff] }
 0x42d   : > { %11162 = vmatprep.mubr.msk.bf16.mxu0 %vm12705_vm1, %v13322_v20  ;;  %v3447_v40 = vpack.c.bf16 %v3398_v36, %v3397_v35  ;;  %v3455_v36 = vpack.c.bf16 %v3414_v32, %v3413_v31 }
 0x434   : > { %11163 = vmatmul.mubr.msk.bf16.gmra.mrb[56].mxu0 %vm328_vm2, %v3023_v41  ;;  %v13602_v41 = vpop.f32.mrb[8].mxu1 }
 0x435   : > { %11166 = vmatprep.mubr.msk.bf16.mxu0 %vm12705_vm1, %v13322_v20  ;;  %v10504_v44 = vpop.f32.mrb[9].mxu1 }
 0x436   : > { %v13606_v45 = vpop.f32.mrb[10].mxu1 }
 0x437   : > { %v10505_v46 = vpop.f32.mrb[11].mxu1 }
 0x438   : > { %v13609_v48 = vpop.f32.mrb[12].mxu1 }
 0x439   : > { %v10508_v51 = vpop.f32.mrb[13].mxu1 }
 0x43a   : > { %v13613_v52 = vpop.f32.mrb[14].mxu1 }
 0x43c   : > { %11167 = vmatmul.mubr.msk.bf16.gmra.mrb[60].mxu0 %vm328_vm2, %v3024_v47  ;;  %v3448_v47 = vpack.c.bf16 %v3400_v43, %v3399_v42 }
 0x43d   : > { %11170 = vmatprep.mubr.msk.bf16.mxu0 %vm12705_vm1, %v13322_v20 }
 0x444   : > { %11171 = vmatmul.mubr.msk.bf16.gmra.mrb[64].mxu0 %vm328_vm2, %v3025_v53  ;;  %v10509_v53 = vpop.f32.mrb[15].mxu1 }
 0x445   : > { %11174 = vmatprep.mubr.msk.bf16.mxu0 %vm12705_vm1, %v13322_v20  ;;  %v13616_v55 = vpop.f32.mrb[16].mxu1  ;;  %v3417_v53 = vld [vmem:[#allocation2 + $0xac] sm:$0xff] }
 0x446   : > { %v10512_v58 = vpop.f32.mrb[17].mxu1 }
 0x447   : > { %v3419_v58 = vld [vmem:[#allocation2 + $0xbc] sm:$0xff] }
 0x44c   : > { %11175 = vmatmul.mubr.msk.bf16.gmra.mrb[68].mxu0 %vm328_vm2, %v3026_v59  ;;  %v13620_v59 = vpop.f32.mrb[18].mxu1 }
 0x44d   : > { %11178 = vmatprep.mubr.msk.bf16.mxu0 %vm12705_vm1, %v13322_v20  ;;  %v10513_v60 = vpop.f32.mrb[19].mxu1 }
 0x44e   : > { %v13623_v61 = vpop.f32.mrb[20].mxu1  ;;  %v3420_v60 = vld [vmem:[#allocation2 + $0xc4] sm:$0xff] }
 0x454   : > { %11179 = vmatmul.mubr.msk.bf16.gmra.mrb[72].mxu0 %vm328_vm2, %v3027_v0  ;;  %v10516_v0 = vpop.f32.mrb[21].mxu1 }
 0x455   : > { %11182 = vmatprep.mubr.msk.bf16.mxu0 %vm12705_vm1, %v13322_v20  ;;  %v13627_v3 = vpop.f32.mrb[22].mxu1  ;;  %v3458_v0 = vpack.c.bf16 %v3420_v60, %v3419_v58 }
 0x456   : > { %v10517_v4 = vpop.f32.mrb[23].mxu1 }
 0x457   : > { %v13630_v6 = vpop.f32.mrb[24].mxu1 }
 0x458   : > { %v10520_v9 = vpop.f32.mrb[25].mxu1 }
 0x459   : > { %v13634_v10 = vpop.f32.mrb[26].mxu1 }
 0x45a   : > { %v10521_v11 = vpop.f32.mrb[27].mxu1 }
 0x45b   : > { %v13637_v13 = vpop.f32.mrb[28].mxu1 }
 0x45c   : > { %11183 = vmatmul.mubr.msk.bf16.gmra.mrb[76].mxu0 %vm328_vm2, %v3028_v8  ;;  %v3408_v8 = vld [vmem:[#allocation2 + $0x64] sm:$0xff]  ;;  %v10524_v16 = vpop.f32.mrb[29].mxu1 }
 0x45d   : > { %11186 = vmatprep.mubr.msk.bf16.mxu0 %vm12705_vm1, %v13322_v20  ;;  %v3452_v12 = vpack.c.bf16 %v3408_v8, %v3407_v7  ;;  %v13641_v17 = vpop.f32.mrb[30].mxu1  ;;  %v3422_v7 = vld [vmem:[#allocation2 + $0xd4] sm:$0xff]  ;;  %v3424_v16 = vld [vmem:[#allocation2 + $0xe4] sm:$0xff] }
 0x45e   : > { %v10525_v18 = vpop.f32.mrb[31].mxu1 }
 0x464   : > { %11187 = vmatmul.mubr.msk.bf16.gmra.mrb[80].mxu0 %vm328_vm2, %v3029_v14  ;;  %v3409_v14 = vld [vmem:[#allocation2 + $0x6c] sm:$0xff] }
 0x465   : > { %11190 = vmatprep.mubr.msk.bf16.mxu0 %vm12705_vm1, %v13322_v20  ;;  %v3453_v19 = vpack.c.bf16 %v3410_v15, %v3409_v14  ;;  %v3423_v15 = vld [vmem:[#allocation2 + $0xdc] sm:$0xff] }
 0x46c   : > { %11191 = vmatmul.mubr.msk.bf16.gmra.mrb[84].mxu0 %vm328_vm2, %v3030_v21  ;;  %v13644_v21 = vpop.f32.mrb[32].mxu1 }
 0x46d   : > { %11194 = vmatprep.mubr.msk.bf16.mxu0 %vm12705_vm1, %v13322_v20 }
 0x474   : > { %11195 = vmatmul.mubr.msk.bf16.gmra.mrb[88].mxu0 %vm328_vm2, %v3031_v23  ;;  %v10528_v23 = vpop.f32.mrb[33].mxu1 }
 0x475   : > { %11198 = vmatprep.mubr.msk.bf16.mxu0 %vm12705_vm1, %v13322_v20  ;;  %v13648_v24 = vpop.f32.mrb[34].mxu1 }
 0x476   : > { %v10529_v25 = vpop.f32.mrb[35].mxu1 }
 0x477   : > { %v13651_v28 = vpop.f32.mrb[36].mxu1  ;;  %v3425_v25 = vld [vmem:[#allocation2 + $0xec] sm:$0xff] }
 0x47c   : > { %11199 = vmatmul.mubr.msk.bf16.gmra.mrb[92].mxu0 %vm328_vm2, %v3032_v26  ;;  %v3454_v26 = vpack.c.bf16 %v3412_v30, %v3411_v22  ;;  %v3460_v30 = vpack.c.bf16 %v3424_v16, %v3423_v15  ;;  %v3433_v16 = vld [vmem:[#allocation2 + $0x12c] sm:$0xff] }
 0x47d   : > { %11202 = vmatprep.mubr.msk.bf16.mxu0 %vm12705_vm1, %v13322_v20 }
 0x484   : > { %11203 = vmatmul.mubr.msk.bf16.gmra.mrb[96].mxu0 %vm328_vm2, %v3033_v33  ;;  %v10532_v33 = vpop.f32.mrb[37].mxu1 }
 0x485   : > { %11208 = vmatprep.mubr.msk.bf16.mxu0 %vm12705_vm1, %v13322_v20 }
 0x48c   : > { %11209 = vmatmul.mubr.msk.bf16.vlgmr.msra.gmra.mrb[0].mxu0 %vm328_vm2, %v3447_v40  ;;  %v3416_v40 = vld [vmem:[#allocation2 + $0xa4] sm:$0xff] }
 0x48d   : > { %11212 = vmatprep.mubr.msk.bf16.mxu0 %vm12705_vm1, %v13322_v20  ;;  %v3456_v46 = vpack.c.bf16 %v3416_v40, %v3415_v39  ;;  %v3427_v39 = vld [vmem:[#allocation2 + $0xfc] sm:$0xff]  ;;  %v3428_v40 = vld [vmem:[#allocation2 + $0x104] sm:$0xff] }
 0x494   : > { %11213 = vmatmul.mubr.msk.bf16.gmra.mrb[4].mxu0 %vm328_vm2, %v3448_v47 }
 0x495   : > { %11216 = vmatprep.mubr.msk.bf16.mxu0 %vm12705_vm1, %v13322_v20 }
 0x49c   : > { %11217 = vmatmul.mubr.msk.bf16.gmra.mrb[8].mxu0 %vm328_vm2, %v3449_v54  ;;  %v3418_v54 = vld [vmem:[#allocation2 + $0xb4] sm:$0xff] }
 0x49d   : > { %11220 = vmatprep.mubr.msk.bf16.mxu0 %vm12705_vm1, %v13322_v20  ;;  %v3457_v56 = vpack.c.bf16 %v3418_v54, %v3417_v53  ;;  %v3429_v53 = vld [vmem:[#allocation2 + $0x10c] sm:$0xff]  ;;  %v3430_v54 = vld [vmem:[#allocation2 + $0x114] sm:$0xff] }
 0x4a4   : > { %11221 = vmatmul.mubr.msk.bf16.gmra.mrb[12].mxu0 %vm328_vm2, %v3450_v2 }
 0x4a5   : > { %11224 = vmatprep.mubr.msk.bf16.mxu0 %vm12705_vm1, %v13322_v20 }
 0x4ac   : > { %11225 = vmatmul.mubr.msk.bf16.gmra.mrb[16].mxu0 %vm328_vm2, %v3451_v5  ;;  %v3421_v5 = vld [vmem:[#allocation2 + $0xcc] sm:$0xff] }
 0x4ad   : > { %11228 = vmatprep.mubr.msk.bf16.mxu0 %vm12705_vm1, %v13322_v20 }
 0x4b4   : > { %11229 = vmatmul.mubr.msk.bf16.gmra.mrb[20].mxu0 %vm328_vm2, %v3452_v12  ;;  %v3459_v12 = vpack.c.bf16 %v3422_v7, %v3421_v5  ;;  %v3432_v5 = vld [vmem:[#allocation2 + $0x124] sm:$0xff] }
 0x4b5   : > { %11232 = vmatprep.mubr.msk.bf16.mxu0 %vm12705_vm1, %v13322_v20 }
 0x4bc   : > { %11233 = vmatmul.mubr.msk.bf16.gmra.mrb[24].mxu0 %vm328_vm2, %v3453_v19 }
 0x4bd   : > { %11236 = vmatprep.mubr.msk.bf16.mxu0 %vm12705_vm1, %v13322_v20  ;;  %v13657_v20 = vpop.f32.mrb[38].mxu1 }
 0x4be   : > { %v10533_v35 = vpop.f32.mrb[39].mxu1 }
 0x4bf   : > { %v13660_v37 = vpop.f32.mrb[40].mxu1 }
 0x4c0   : > { %v10536_v42 = vpop.f32.mrb[41].mxu1 }
 0x4c1   : > { %v13664_v43 = vpop.f32.mrb[42].mxu1 }
 0x4c2   : > { %v10537_v44 = vpop.f32.mrb[43].mxu1 }
 0x4c3   : > { %v13666_v47 = vpop.f32.mrb[44].mxu1 }
 0x4c4   : > { %11237 = vmatmul.mubr.msk.bf16.gmra.mrb[28].mxu0 %vm328_vm2, %v3454_v26  ;;  %v10540_v49 = vpop.f32.mrb[45].mxu1  ;;  %v3426_v26 = vld [vmem:[#allocation2 + $0xf4] sm:$0xff] }
 0x4c5   : > { %11240 = vmatprep.mubr.msk.bf16.mxu0 %vm12705_vm1, %v13653_v29  ;;  %v13668_v50 = vpop.f32.mrb[46].mxu1  ;;  %v3461_v35 = vpack.c.bf16 %v3426_v26, %v3425_v25  ;;  %v3462_v49 = vpack.c.bf16 %v3428_v40, %v3427_v39 }
 0x4c6   : > { %v10541_v51 = vpop.f32.mrb[47].mxu1 }
 0x4c7   : > { %v13674_v57 = vpop.f32.mrb[48].mxu1 }
 0x4c8   : > { %v10544_v2 = vpop.f32.mrb[49].mxu1 }
 0x4c9   : > { %v13678_v62 = vpop.f32.mrb[50].mxu1  ;;  %v3463_v2 = vpack.c.bf16 %v3430_v54, %v3429_v53  ;;  %v3437_v53 = vld [vmem:[#allocation2 + $0x14c] sm:$0xff]  ;;  %v3438_v54 = vld [vmem:[#allocation2 + $0x154] sm:$0xff] }
 0x4ca   : > { %v10545_v63 = vpop.f32.mrb[51].mxu1 }
 0x4cb   : > { %v13681_v4 = vpop.f32.mrb[52].mxu1 }
 0x4cc   : > { %11241 = vmatmul.mubr.msk.bf16.gmra.mrb[32].mxu0 %vm328_vm2, %v3455_v36  ;;  %v10650_v8 = vpop.f32.mrb[53].mxu1 }
 0x4cd   : > { %11244 = vmatprep.mubr.msk.bf16.mxu0 %vm12705_vm1, %v13653_v29  ;;  %v13685_v9 = vpop.f32.mrb[54].mxu1 }
 0x4ce   : > { %v10651_v11 = vpop.f32.mrb[55].mxu1 }
 0x4cf   : > { %v13688_v14 = vpop.f32.mrb[56].mxu1 }
 0x4d0   : > { %v10654_v18 = vpop.f32.mrb[57].mxu1 }
 0x4d1   : > { %v13692_v19 = vpop.f32.mrb[58].mxu1  ;;  %v3434_v18 = vld [vmem:[#allocation2 + $0x134] sm:$0xff] }
 0x4d2   : > { %v10655_v22 = vpop.f32.mrb[59].mxu1  ;;  %v3465_v26 = vpack.c.bf16 %v3434_v18, %v3433_v16 }
 0x4d3   : > { %v13695_v23 = vpop.f32.mrb[60].mxu1 }
 0x4d4   : > { %11245 = vmatmul.mubr.msk.bf16.gmra.mrb[36].mxu0 %vm328_vm2, %v3456_v46  ;;  %v10658_v31 = vpop.f32.mrb[61].mxu1 }
 0x4d5   : > { %11248 = vmatprep.mubr.msk.bf16.mxu0 %vm12705_vm1, %v13653_v29  ;;  %v13699_v32 = vpop.f32.mrb[62].mxu1 }
 0x4d6   : > { %v10659_v33 = vpop.f32.mrb[63].mxu1 }
 0x4d7   : > { %v13702_v36 = vpop.f32.mrb[64].mxu1  ;;  %v3435_v33 = vld [vmem:[#allocation2 + $0x13c] sm:$0xff] }
 0x4d8   : > { %v10662_v42 = vpop.f32.mrb[65].mxu1 }
 0x4d9   : > { %v13706_v44 = vpop.f32.mrb[66].mxu1 }
 0x4da   : > { %v10663_v46 = vpop.f32.mrb[67].mxu1 }
 0x4db   : > { %v13709_v51 = vpop.f32.mrb[68].mxu1 }
 0x4dc   : > { %11249 = vmatmul.mubr.msk.bf16.gmra.mrb[40].mxu0 %vm328_vm2, %v3457_v56  ;;  %v10666_v56 = vpop.f32.mrb[69].mxu1 }
 0x4dd   : > { %11252 = vmatprep.mubr.msk.bf16.mxu0 %vm12705_vm1, %v13653_v29  ;;  %v13713_v58 = vpop.f32.mrb[70].mxu1 }
 0x4de   : > { %v10667_v60 = vpop.f32.mrb[71].mxu1 }
 0x4df   : > { %v13716_v63 = vpop.f32.mrb[72].mxu1 }
 0x4e0   : > { %v10670_v7 = vpop.f32.mrb[73].mxu1 }
 0x4e1   : > { %v13720_v8 = vpop.f32.mrb[74].mxu1  ;;  %v3439_v7 = vld [vmem:[#allocation2 + $0x15c] sm:$0xff] }
 0x4e2   : > { %v10671_v11 = vpop.f32.mrb[75].mxu1 }
 0x4e3   : > { %v13723_v15 = vpop.f32.mrb[76].mxu1  ;;  %v3440_v11 = vld [vmem:[#allocation2 + $0x164] sm:$0xff] }
 0x4e4   : > { %11253 = vmatmul.mubr.msk.bf16.gmra.mrb[44].mxu0 %vm328_vm2, %v3458_v0  ;;  %v3431_v0 = vld [vmem:[#allocation2 + $0x11c] sm:$0xff]  ;;  %v10674_v22 = vpop.f32.mrb[77].mxu1 }
 0x4e5   : > { %11256 = vmatprep.mubr.msk.bf16.mxu0 %vm12705_vm1, %v13653_v29  ;;  %v3468_v22 = vpack.c.bf16 %v3440_v11, %v3439_v7 }
 0x4ec   : > { %11257 = vmatmul.mubr.msk.bf16.gmra.mrb[48].mxu0 %vm328_vm2, %v3459_v12  ;;  %v3464_v12 = vpack.c.bf16 %v3432_v5, %v3431_v0  ;;  %v3467_v0 = vpack.c.bf16 %v3438_v54, %v3437_v53  ;;  %v3443_v54 = vld [vmem:[#allocation2 + $0x17c] sm:$0xff] }
 0x4ed   : > { %11260 = vmatprep.mubr.msk.bf16.mxu0 %vm12705_vm1, %v13653_v29 }
 0x4f4   : > { %11261 = vmatmul.mubr.msk.bf16.gmra.mrb[52].mxu0 %vm328_vm2, %v3460_v30  ;;  %v13727_v30 = vpop.f32.mrb[78].mxu1 }
 0x4f5   : > { %11264 = vmatprep.mubr.msk.bf16.mxu0 %vm12705_vm1, %v13653_v29  ;;  %v10675_v25 = vpop.f32.mrb[79].mxu1 }
 0x4f6   : > { %v13730_v31 = vpop.f32.mrb[80].mxu1 }
 0x4f7   : > { %v10678_v39 = vpop.f32.mrb[81].mxu1 }
 0x4f8   : > { %v13734_v40 = vpop.f32.mrb[82].mxu1 }
 0x4f9   : > { %v10679_v42 = vpop.f32.mrb[83].mxu1 }
 0x4fc   : > { %11265 = vmatmul.mubr.msk.bf16.gmra.mrb[56].mxu0 %vm328_vm2, %v3461_v35  ;;  %v3436_v35 = vld [vmem:[#allocation2 + $0x144] sm:$0xff] }
 0x4fd   : > { %11268 = vmatprep.mubr.msk.bf16.mxu0 %vm12705_vm1, %v13653_v29  ;;  %v3466_v46 = vpack.c.bf16 %v3436_v35, %v3435_v33  ;;  %v3442_v33 = vld [vmem:[#allocation2 + $0x174] sm:$0xff] }
 0x504   : > { %11269 = vmatmul.mubr.msk.bf16.gmra.mrb[60].mxu0 %vm328_vm2, %v3462_v49  ;;  %v13737_v49 = vpop.f32.mrb[84].mxu1 }
 0x505   : > { %11272 = vmatprep.mubr.msk.bf16.mxu0 %vm12705_vm1, %v13653_v29  ;;  %v10682_v56 = vpop.f32.mrb[85].mxu1 }
 0x506   : > { %v13741_v60 = vpop.f32.mrb[86].mxu1  ;;  %v3444_v56 = vld [vmem:[#allocation2 + $0x184] sm:$0xff] }
 0x507   : > { %v3470_v11 = vpack.c.bf16 %v3444_v56, %v3443_v54 }
 0x50c   : > { %11273 = vmatmul.mubr.msk.bf16.gmra.mrb[64].mxu0 %vm328_vm2, %v3463_v2  ;;  %v10683_v2 = vpop.f32.mrb[87].mxu1 }
 0x50d   : > { %11276 = vmatprep.mubr.msk.bf16.mxu0 %vm12705_vm1, %v13653_v29  ;;  %v13744_v5 = vpop.f32.mrb[88].mxu1 }
 0x514   : > { %11277 = vmatmul.mubr.msk.bf16.gmra.mrb[68].mxu0 %vm328_vm2, %v3464_v12  ;;  %v10686_v12 = vpop.f32.mrb[89].mxu1 }
 0x515   : > { %11280 = vmatprep.mubr.msk.bf16.mxu0 %vm12705_vm1, %v13653_v29  ;;  %v13748_v16 = vpop.f32.mrb[90].mxu1  ;;  %v3445_v12 = vld [vmem:[#allocation2 + $0x18c] sm:$0xff] }
 0x516   : > { %v10687_v18 = vpop.f32.mrb[91].mxu1 }
 0x517   : > { %v13751_v25 = vpop.f32.mrb[92].mxu1  ;;  %v3446_v18 = vld [vmem:[#allocation2 + $0x194] sm:$0x7f] }
 0x518   : > { %v10690_v35 = vpop.f32.mrb[93].mxu1 }
 0x519   : > { %v13755_v39 = vpop.f32.mrb[94].mxu1 }
 0x51a   : > { %15362 = vst [vmem:[#allocation8_spill] sm:$0xff] %v13755_v39  ;;  %v10691_v42 = vpop.f32.mrb[95].mxu1 }
 0x51b   : > { %v13758_v53 = vpop.f32.mrb[96].mxu1 }
 0x51c   : > { %11281 = vmatmul.mubr.msk.bf16.gmra.mrb[72].mxu0 %vm328_vm2, %v3465_v26  ;;  %v3441_v26 = vld [vmem:[#allocation2 + $0x16c] sm:$0xff]  ;;  %15363 = vst [vmem:[#allocation9_spill] sm:$0xff] %v13758_v53  ;;  %v10694_v2 = vpop.f32.mrb[97].mxu1 }
 0x51d   : > { %11284 = vmatprep.mubr.msk.bf16.mxu0 %vm12705_vm1, %v13653_v29 }
 0x524   : > { %11285 = vmatmul.mubr.msk.bf16.gmra.mrb[76].mxu0 %vm328_vm2, %v3466_v46  ;;  %v3469_v46 = vpack.c.bf16 %v3442_v33, %v3441_v26  ;;  %v3835_v26 = vlaneseq }
 0x525   : > { %11288 = vmatprep.mubr.msk.bf16.mxu0 %vm12705_vm1, %v13653_v29 }
 0x526   : > { %v13773_v2 = vand.u32 127, %v3835_v26 }
 0x52c   : > { %11289 = vmatmul.mubr.msk.bf16.gmra.mrb[80].mxu0 %vm328_vm2, %v3467_v0  ;;  %v13762_v0 = vpop.f32.mrb[98].mxu1 }
 0x52d   : > { %11292 = vmatprep.mubr.msk.bf16.mxu0 %vm12705_vm1, %v13653_v29  ;;  %15364 = vst [vmem:[#allocation10_spill] sm:$0xff] %v13762_v0  ;;  %v10695_v7 = vpop.f32.mrb[99].mxu1 }
 0x534   : > { %11293 = vmatmul.mubr.msk.bf16.gmra.mrb[84].mxu0 %vm328_vm2, %v3468_v22  ;;  %v3471_v22 = vpack.c.bf16 %v3446_v18, %v3445_v12  ;;  %v15358_v18 = vmov 1.0  }
 0x535   : > { %11296 = vmatprep.mubr.msk.bf16.mxu0 %vm12705_vm1, %v13653_v29 }
 0x53c   : > { %11297 = vmatmul.mubr.msk.bf16.gmra.mrb[88].mxu0 %vm328_vm2, %v3469_v46  ;;  %v13771_v46 = vshrl.u32 %v3835_v26, 7 }
 0x53d   : > { %11300 = vmatprep.mubr.msk.bf16.mxu0 %vm12705_vm1, %v13653_v29 }
 0x53e   : > { %v13782_v12 = vmul.u32 4, %v13771_v46 }
 0x540   : > { %vm3867_vm5 = vcmp.eq.s32.totalorder %v13773_v2, %v13782_v12 }
 0x544   : > { %11301 = vmatmul.mubr.msk.bf16.gmra.mrb[92].mxu0 %vm328_vm2, %v3470_v11  ;;  %v13779_v11 = vadd.s32 128, %v13773_v2 }
 0x545   : > { %11304 = vmatprep.mubr.msk.bf16.mxu0 %vm12705_vm1, %v13653_v29 }
 0x546   : > { %vm3868_vm3 = vcmp.eq.s32.totalorder %v13779_v11, %v13782_v12 }
 0x547   : > { %9191 = vmatprep.mubr.msk.f32.mxu1 %vm3868_vm3, %v15358_v18 }
 0x54c   : > { %11305 = vmatmul.mubr.msk.bf16.gmra.mrb[96].mxu0 %vm328_vm2, %v3471_v22 }
 0x55f   : > { %v3586_v33 = vpop.f32.mrb[0].mxu0 }
 0x560   : > { %v13769_v35 = vadd.f32 %v3586_v33, %v13588_v27  ;;  %v11210_v42 = vpop.f32.mrb[1].mxu0 }
 0x561   : > { %v3589_v54 = vpop.f32.mrb[2].mxu0 }
 0x562   : > { %v13776_v56 = vadd.f32 %v3589_v54, %v13592_v1  ;;  %v11211_v7 = vpop.f32.mrb[3].mxu0 }
 0x564   : > { %v11319_v27 = vpack.c.bf16 %v13776_v56, %v13769_v35 }
 0x567   : > { %v3594_v22 = vpop.f32.mrb[4].mxu0 }
 0x568   : > { %v13790_v1 = vadd.f32 %v3594_v22, %v13595_v34  ;;  %v11214_v26 = vpop.f32.mrb[5].mxu0 }
 0x569   : > { %v3597_v33 = vpop.f32.mrb[6].mxu0 }
 0x56a   : > { %v13793_v42 = vadd.f32 %v3597_v33, %v13599_v38  ;;  %v11215_v54 = vpop.f32.mrb[7].mxu0 }
 0x56c   : > { %v11323_v7 = vpack.c.bf16 %v13793_v42, %v13790_v1 }
 0x56f   : > { %v3602_v35 = vpop.f32.mrb[8].mxu0 }
 0x570   : > { %v13798_v56 = vadd.f32 %v3602_v35, %v13602_v41  ;;  %v11218_v0 = vpop.f32.mrb[9].mxu0 }
 0x571   : > { %v3605_v53 = vpop.f32.mrb[10].mxu0 }
 0x572   : > { %v13801_v18 = vadd.f32 %v3605_v53, %v13606_v45  ;;  %v11219_v34 = vpop.f32.mrb[11].mxu0 }
 0x574   : > { %v11327_v22 = vpack.c.bf16 %v13801_v18, %v13798_v56 }
 0x577   : > { %v3610_v26 = vpop.f32.mrb[12].mxu0 }
 0x578   : > { %v13806_v38 = vadd.f32 %v3610_v26, %v13609_v48  ;;  %v11222_v33 = vpop.f32.mrb[13].mxu0 }
 0x579   : > { %v3613_v54 = vpop.f32.mrb[14].mxu0 }
 0x57a   : > { %v13809_v1 = vadd.f32 %v3613_v54, %v13613_v52  ;;  %v11223_v41 = vpop.f32.mrb[15].mxu0 }
 0x57f   : > { %v3618_v42 = vpop.f32.mrb[16].mxu0 }
 0x580   : > { %v13814_v45 = vadd.f32 %v3618_v42, %v13616_v55  ;;  %v11226_v53 = vpop.f32.mrb[17].mxu0 }
 0x581   : > { %v3621_v35 = vpop.f32.mrb[18].mxu0 }
 0x582   : > { %v13817_v18 = vadd.f32 %v3621_v35, %v13620_v59  ;;  %v11227_v48 = vpop.f32.mrb[19].mxu0 }
 0x587   : > { %v3626_v34 = vpop.f32.mrb[20].mxu0 }
 0x588   : > { %v13822_v52 = vadd.f32 %v3626_v34, %v13623_v61  ;;  %v11230_v26 = vpop.f32.mrb[21].mxu0 }
 0x589   : > { %v3629_v33 = vpop.f32.mrb[22].mxu0 }
 0x58a   : > { %v13825_v54 = vadd.f32 %v3629_v33, %v13627_v3  ;;  %v11231_v55 = vpop.f32.mrb[23].mxu0 }
 0x58f   : > { %v3634_v42 = vpop.f32.mrb[24].mxu0 }
 0x590   : > { %v13830_v59 = vadd.f32 %v3634_v42, %v13630_v6  ;;  %v11234_v53 = vpop.f32.mrb[25].mxu0 }
 0x591   : > { %v3637_v35 = vpop.f32.mrb[26].mxu0 }
 0x592   : > { %v13833_v48 = vadd.f32 %v3637_v35, %v13634_v10  ;;  %v11235_v61 = vpop.f32.mrb[27].mxu0 }
 0x597   : > { %v3642_v26 = vpop.f32.mrb[28].mxu0 }
 0x598   : > { %v13838_v3 = vadd.f32 %v3642_v26, %v13637_v13  ;;  %v11238_v33 = vpop.f32.mrb[29].mxu0 }
 0x599   : > { %v3645_v55 = vpop.f32.mrb[30].mxu0 }
 0x59a   : > { %v13841_v41 = vadd.f32 %v3645_v55, %v13641_v17  ;;  %v11239_v6 = vpop.f32.mrb[31].mxu0 }
 0x59f   : > { %v3650_v53 = vpop.f32.mrb[32].mxu0 }
 0x5a0   : > { %v11422_v10 = vadd.f32 %v3650_v53, %v13644_v21  ;;  %v11242_v35 = vpop.f32.mrb[33].mxu0 }
 0x5a1   : > { %v3653_v61 = vpop.f32.mrb[34].mxu0 }
 0x5a2   : > { %v11423_v34 = vadd.f32 %v3653_v61, %v13648_v24  ;;  %v11243_v56 = vpop.f32.mrb[35].mxu0 }
 0x5a4   : > { %v11317_v0 = vpack.c.bf16 %v11423_v34, %v11422_v10 }
 0x5a6   : > { %11318 = vmatprep.subr.bf16.mxu1 %v11317_v0 }
 0x5a7   : > { %v3658_v13 = vpop.f32.mrb[36].mxu0  ;;  %11320 = vmatpush3.bf16.msra.mxu1 %v11319_v27 }
 0x5a8   : > { %v11424_v26 = vadd.f32 %v3658_v13, %v13651_v28  ;;  %v11246_v17 = vpop.f32.mrb[37].mxu0 }
 0x5a9   : > { %v3661_v33 = vpop.f32.mrb[38].mxu0 }
 0x5aa   : > { %v11425_v55 = vadd.f32 %v3661_v33, %v13657_v20  ;;  %v11247_v6 = vpop.f32.mrb[39].mxu0 }
 0x5ac   : > { %v11321_v42 = vpack.c.bf16 %v11425_v55, %v11424_v26 }
 0x5ae   : > { %11322 = vmatprep.subr.bf16.mxu1 %v11321_v42 }
 0x5af   : > { %v3666_v39 = vpop.f32.mrb[40].mxu0  ;;  %11324 = vmatpush3.bf16.msra.mxu1 %v11323_v7 }
 0x5b0   : > { %v11426_v21 = vadd.f32 %v3666_v39, %v13660_v37  ;;  %v11250_v53 = vpop.f32.mrb[41].mxu0  ;;  %v15365_v37 = vpack.c.bf16 %v13809_v1, %v13806_v38 }
 0x5b1   : > { %v3669_v24 = vpop.f32.mrb[42].mxu0  ;;  %v3848_v53 = vadd.s32 96, %v13771_v46 }
 0x5b2   : > { %v11427_v56 = vadd.f32 %v3669_v24, %v13664_v43  ;;  %v11251_v0 = vpop.f32.mrb[43].mxu0 }
 0x5b3   : > { %v13869_v0 = vmul.u32 4, %v3848_v53 }
 0x5b4   : > { %v11325_v34 = vpack.c.bf16 %v11427_v56, %v11426_v21 }
 0x5b6   : > { %11326 = vmatprep.subr.bf16.mxu1 %v11325_v34 }
 0x5b7   : > { %v3674_v27 = vpop.f32.mrb[44].mxu0  ;;  %11328 = vmatpush3.bf16.msra.mxu1 %v11327_v22 }
 0x5b8   : > { %v11428_v28 = vadd.f32 %v3674_v27, %v13666_v47  ;;  %v11254_v10 = vpop.f32.mrb[45].mxu0 }
 0x5b9   : > { %v3677_v20 = vpop.f32.mrb[46].mxu0 }
 0x5ba   : > { %v11429_v35 = vadd.f32 %v3677_v20, %v13668_v50  ;;  %v11255_v42 = vpop.f32.mrb[47].mxu0  ;;  %v15366_v50 = vpack.c.bf16 %v13817_v18, %v13814_v45 }
 0x5bc   : > { %v11329_v61 = vpack.c.bf16 %v11429_v35, %v11428_v28 }
 0x5be   : > { %11330 = vmatprep.subr.bf16.mxu1 %v11329_v61  ;;  %v13888_v61 = vadd.s32 16, %v13771_v46 }
 0x5bf   : > { %v3682_v7 = vpop.f32.mrb[48].mxu0  ;;  %11332 = vmatpush3.bf16.msra.mxu1 %v15365_v37 }
 0x5c0   : > { %v11430_v43 = vadd.f32 %v3682_v7, %v13674_v57  ;;  %v11258_v39 = vpop.f32.mrb[49].mxu0  ;;  %v12707_v7 = vmov 0.0|0.0  }
 0x5c1   : > { %v3685_v13 = vpop.f32.mrb[50].mxu0  ;;  %v3839_v39 = vadd.s32 24, %v13771_v46 }
 0x5c2   : > { %v11431_v22 = vadd.f32 %v3685_v13, %v13678_v62  ;;  %v11259_v26 = vpop.f32.mrb[51].mxu0  ;;  %v15367_v62 = vpack.c.bf16 %v13825_v54, %v13822_v52  ;;  %v15368_v54 = vpack.c.bf16 %v13833_v48, %v13830_v59  ;;  %v15370_v13 = vmov 1.0  }
 0x5c3   : > { %v3840_v26 = vadd.s32 32, %v13771_v46 }
 0x5c4   : > { %v11333_v47 = vpack.c.bf16 %v11431_v22, %v11430_v43  ;;  %v13900_v43 = vmul.u32 4, %v13888_v61  ;;  %v13910_v22 = vmul.u32 4, %v3839_v39  ;;  %v3847_v39 = vadd.s32 88, %v13771_v46 }
 0x5c6   : > { %11334 = vmatprep.subr.bf16.mxu1 %v11333_v47  ;;  %vm3876_vm8 = vcmp.eq.s32.totalorder %v13779_v11, %v13900_v43  ;;  %vm3875_vm9 = vcmp.eq.s32.totalorder %v13773_v2, %v13900_v43  ;;  %vm3880_vm10 = vcmp.eq.s32.totalorder %v13779_v11, %v13910_v22  ;;  %vm3879_vm11 = vcmp.eq.s32.totalorder %v13773_v2, %v13910_v22 }
 0x5c7   : > { %v3690_v17 = vpop.f32.mrb[52].mxu0  ;;  %11336 = vmatpush3.bf16.msra.mxu1 %v15366_v50 }
 0x5c8   : > { %v11432_v33 = vadd.f32 %v3690_v17, %v13681_v4  ;;  %v11262_v55 = vpop.f32.mrb[53].mxu0 }
 0x5c9   : > { %v3693_v6 = vpop.f32.mrb[54].mxu0  ;;  %v3841_v55 = vadd.s32 40, %v13771_v46 }
 0x5ca   : > { %v11433_v38 = vadd.f32 %v3693_v6, %v13685_v9  ;;  %v11263_v1 = vpop.f32.mrb[55].mxu0  ;;  %v13872_v9 = vadd.s32 384, %v13773_v2 }
 0x5cb   : > { %v13931_v1 = vmul.u32 4, %v3841_v55 }
 0x5cc   : > { %v11337_v57 = vpack.c.bf16 %v11433_v38, %v11432_v33  ;;  %vm3918_vm4 = vcmp.eq.s32.totalorder %v13872_v9, %v13869_v0  ;;  %v13921_v33 = vmul.u32 4, %v3840_v26 }
 0x5cd   : > { %vm3888_vm14 = vcmp.eq.s32.totalorder %v13779_v11, %v13931_v1  ;;  %vm3887_vm15 = vcmp.eq.s32.totalorder %v13773_v2, %v13931_v1 }
 0x5ce   : > { %11338 = vmatprep.subr.bf16.mxu1 %v11337_v57  ;;  %vm3884_vm12 = vcmp.eq.s32.totalorder %v13779_v11, %v13921_v33  ;;  %v3842_v57 = vadd.s32 48, %v13771_v46  ;;  %vm3883_vm13 = vcmp.eq.s32.totalorder %v13773_v2, %v13921_v33 }
 0x5cf   : > { %v3698_v21 = vpop.f32.mrb[56].mxu0  ;;  %11340 = vmatpush3.bf16.msra.mxu1 %v15367_v62 }
 0x5d0   : > { %v11434_v24 = vadd.f32 %v3698_v21, %v13688_v14  ;;  %v11266_v45 = vpop.f32.mrb[57].mxu0 }
 0x5d1   : > { %v3701_v18 = vpop.f32.mrb[58].mxu0  ;;  %v3843_v45 = vadd.s32 56, %v13771_v46 }
 0x5d2   : > { %v11435_v4 = vadd.f32 %v3701_v18, %v13692_v19  ;;  %v11267_v56 = vpop.f32.mrb[59].mxu0  ;;  %v13881_v19 = vadd.s32 8, %v13771_v46 }
 0x5d3   : > { %v13952_v56 = vmul.u32 4, %v3843_v45  ;;  %v15371_v45 = vld [vmem:[#allocation8_spill] sm:$0xff] }
 0x5d4   : > { %v11341_v34 = vpack.c.bf16 %v11435_v4, %v11434_v24  ;;  %v13885_v42 = vmul.u32 4, %v13881_v19  ;;  %v13942_v24 = vmul.u32 4, %v3842_v57 }
 0x5d5   : > { %vm3896_vm3 = vcmp.eq.s32.totalorder %v13779_v11, %v13952_v56 }
 0x5d6   : > { %11342 = vmatprep.subr.bf16.mxu1 %v11341_v34  ;;  %vm3872_vm6 = vcmp.eq.s32.totalorder %v13779_v11, %v13885_v42  ;;  %vm3871_vm7 = vcmp.eq.s32.totalorder %v13773_v2, %v13885_v42  ;;  %vm3892_vm0 = vcmp.eq.s32.totalorder %v13779_v11, %v13942_v24  ;;  %v3844_v34 = vadd.s32 64, %v13771_v46 }
 0x5d7   : > { %v3706_v52 = vpop.f32.mrb[60].mxu0  ;;  %11344 = vmatpush3.bf16.msra.mxu1 %v15368_v54  ;;  %vm3891_vm2 = vcmp.eq.s32.totalorder %v13773_v2, %v13942_v24 }
 0x5d8   : > { %v11436_v14 = vadd.f32 %v3706_v52, %v13695_v23  ;;  %v11270_v27 = vpop.f32.mrb[61].mxu0  ;;  %v15369_v23 = vpack.c.bf16 %v13841_v41, %v13838_v3 }
 0x5d9   : > { %v3709_v28 = vpop.f32.mrb[62].mxu0  ;;  %v13963_v27 = vmul.u32 4, %v3844_v34  ;;  %v15372_v34 = vld [vmem:[#allocation9_spill] sm:$0xff] }
 0x5da   : > { %v11437_v10 = vadd.f32 %v3709_v28, %v13699_v32  ;;  %v11271_v20 = vpop.f32.mrb[63].mxu0  ;;  %v3845_v28 = vadd.s32 72, %v13771_v46 }
 0x5dc   : > { %v11345_v35 = vpack.c.bf16 %v11437_v10, %v11436_v14 }
 0x5de   : > { %11346 = vmatprep.subr.bf16.mxu1 %v11345_v35  ;;  %v13973_v35 = vmul.u32 4, %v3845_v28 }
 0x5df   : > { %v3714_v59 = vpop.f32.mrb[64].mxu0  ;;  %11348 = vmatpush3.bf16.msra.mxu1 %v15369_v23 }
 0x5e0   : > { %v11438_v48 = vadd.f32 %v3714_v59, %v13702_v36  ;;  %v11274_v32 = vpop.f32.mrb[65].mxu0  ;;  %11349 = vmatprep.subr.bf16.mxu1 %v12707_v7  ;;  %v3846_v59 = vadd.s32 80, %v13771_v46 }
 0x5e1   : > { %v3717_v37 = vpop.f32.mrb[66].mxu0 }
 0x5e2   : > { %v11439_v41 = vadd.f32 %v3717_v37, %v13706_v44  ;;  %v11275_v3 = vpop.f32.mrb[67].mxu0  ;;  %9192 = vmatmul.mubr.msk.f32.vlgmr.msra.gmra.mrb[100].mxu1 %vm3867_vm5, %v15370_v13  ;;  %vm3895_vm5 = vcmp.eq.s32.totalorder %v13773_v2, %v13952_v56  ;;  %v13984_v37 = vmul.u32 4, %v3846_v59 }
 0x5e3   : > { %9193 = vmatprep.mubr.msk.f32.mxu1 %vm3872_vm6, %v15370_v13  ;;  %vm3900_vm6 = vcmp.eq.s32.totalorder %v13779_v11, %v13963_v27 }
 0x5e4   : > { %v11350_v36 = vpack.c.bf16 %v11439_v41, %v11438_v48 }
 0x5e6   : > { %11351 = vmatpush1.bf16.msra.mxu1 %v11350_v36  ;;  %v13994_v36 = vmul.u32 4, %v3847_v39  ;;  %v12709_v39 = vmov 0  }
 0x5e7   : > { %v3722_v47 = vpop.f32.mrb[68].mxu0  ;;  %11352 = vmatprep.subr.bf16.mxu1 %v12707_v7  ;;  %9194 = vmatmul.mubr.msk.f32.gmra.mrb[102].mxu1 %vm3871_vm7, %v15370_v13  ;;  %vm3899_vm7 = vcmp.eq.s32.totalorder %v13773_v2, %v13963_v27 }
 0x5e8   : > { %v11440_v44 = vadd.f32 %v3722_v47, %v13709_v51  ;;  %v11278_v17 = vpop.f32.mrb[69].mxu0  ;;  %9195 = vmatprep.mubr.msk.f32.mxu1 %vm3876_vm8, %v15370_v13  ;;  %vm3904_vm8 = vcmp.eq.s32.totalorder %v13779_v11, %v13973_v35 }
 0x5e9   : > { %v3725_v50 = vpop.f32.mrb[70].mxu0 }
 0x5ea   : > { %v11441_v6 = vadd.f32 %v3725_v50, %v13713_v58  ;;  %v11279_v38 = vpop.f32.mrb[71].mxu0 }
 0x5eb   : > { %9196 = vmatmul.mubr.msk.f32.gmra.mrb[104].mxu1 %vm3875_vm9, %v15370_v13  ;;  %vm3903_vm9 = vcmp.eq.s32.totalorder %v13773_v2, %v13973_v35 }
 0x5ec   : > { %v11353_v51 = vpack.c.bf16 %v11441_v6, %v11440_v44  ;;  %9197 = vmatprep.mubr.msk.f32.mxu1 %vm3880_vm10, %v15370_v13  ;;  %vm3908_vm10 = vcmp.eq.s32.totalorder %v13779_v11, %v13984_v37 }
 0x5ee   : > { %11354 = vmatpush1.bf16.msra.mxu1 %v11353_v51 }
 0x5ef   : > { %v3730_v21 = vpop.f32.mrb[72].mxu0  ;;  %11355 = vmatprep.subr.bf16.mxu1 %v12707_v7  ;;  %9198 = vmatmul.mubr.msk.f32.gmra.mrb[106].mxu1 %vm3879_vm11, %v15370_v13  ;;  %vm3907_vm11 = vcmp.eq.s32.totalorder %v13773_v2, %v13984_v37 }
 0x5f0   : > { %v11442_v58 = vadd.f32 %v3730_v21, %v13716_v63  ;;  %v11282_v62 = vpop.f32.mrb[73].mxu0  ;;  %9199 = vmatprep.mubr.msk.f32.mxu1 %vm3884_vm12, %v15370_v13  ;;  %vm3912_vm12 = vcmp.eq.s32.totalorder %v13779_v11, %v13994_v36 }
 0x5f1   : > { %v3733_v53 = vpop.f32.mrb[74].mxu0 }
 0x5f2   : > { %v11443_v18 = vadd.f32 %v3733_v53, %v13720_v8  ;;  %v11283_v4 = vpop.f32.mrb[75].mxu0 }
 0x5f3   : > { %9200 = vmatmul.mubr.msk.f32.gmra.mrb[108].mxu1 %vm3883_vm13, %v15370_v13  ;;  %vm3911_vm13 = vcmp.eq.s32.totalorder %v13773_v2, %v13994_v36 }
 0x5f4   : > { %v11356_v63 = vpack.c.bf16 %v11443_v18, %v11442_v58  ;;  %9201 = vmatprep.mubr.msk.f32.mxu1 %vm3888_vm14, %v15370_v13  ;;  %vm3916_vm14 = vcmp.eq.s32.totalorder %v13779_v11, %v13869_v0 }
 0x5f6   : > { %11357 = vmatpush1.bf16.msra.mxu1 %v11356_v63 }
 0x5f7   : > { %v3738_v52 = vpop.f32.mrb[76].mxu0  ;;  %11358 = vmatprep.subr.bf16.mxu1 %v12707_v7  ;;  %9202 = vmatmul.mubr.msk.f32.gmra.mrb[110].mxu1 %vm3887_vm15, %v15370_v13  ;;  %vm3870_vm15 = vcmp.eq.s32.totalorder %v13872_v9, %v13782_v12 }
 0x5f8   : > { %v11444_v8 = vadd.f32 %v3738_v52, %v13723_v15  ;;  %v11286_v54 = vpop.f32.mrb[77].mxu0  ;;  %9203 = vmatprep.mubr.msk.f32.mxu1 %vm3892_vm0, %v15370_v13  ;;  %vm3915_vm0 = vcmp.eq.s32.totalorder %v13773_v2, %v13869_v0  ;;  %v9141_v11 = vsel %vm3870_vm15, 1.0, %v13653_v29  ;;  %vm3890_vm15 = vcmp.eq.s32.totalorder %v13872_v9, %v13931_v1 }
 0x5f9   : > { %v3741_v14 = vpop.f32.mrb[78].mxu0 }
 0x5fa   : > { %v11445_v10 = vadd.f32 %v3741_v14, %v13727_v30  ;;  %v11287_v20 = vpop.f32.mrb[79].mxu0  ;;  %v15373_v14 = vld [vmem:[#allocation10_spill] sm:$0xff] }
 0x5fb   : > { %9204 = vmatmul.mubr.msk.f32.gmra.mrb[112].mxu1 %vm3891_vm2, %v15370_v13  ;;  %vm4030_vm2 = vcmask 121856  }
 0x5fc   : > { %v11359_v15 = vpack.c.bf16 %v11445_v10, %v11444_v8  ;;  %9205 = vmatprep.mubr.msk.f32.mxu1 %vm3896_vm3, %v15370_v13  ;;  %vm4070_vm3 = vcmask 1046528  }
 0x5fe   : > { %11360 = vmatpush1.bf16.msra.mxu1 %v11359_v15 }
 0x5ff   : > { %v3746_v23 = vpop.f32.mrb[80].mxu0  ;;  %11361 = vmatprep.subr.bf16.mxu1 %v12707_v7  ;;  %9206 = vmatmul.mubr.msk.f32.gmra.mrb[114].mxu1 %vm3895_vm5, %v15370_v13  ;;  %vm12708_vm5 = vmmov 1  }
 0x600   : > { %v11446_v30 = vadd.f32 %v3746_v23, %v13730_v31  ;;  %v11290_v48 = vpop.f32.mrb[81].mxu0  ;;  %9207 = vmatprep.mubr.msk.f32.mxu1 %vm3900_vm6, %v15370_v13  ;;  %vm11375_vm6 = vmpackc.low %vm4070_vm3, %vm12708_vm5  ;;  %vm3894_vm5 = vcmp.eq.s32.totalorder %v13872_v9, %v13942_v24  ;;  %v12354_v23 = vld [vmem:[%s15353_s3 + $0x40] ss:$8 sps:$4 sm:$0xff]  }
 0x601   : > { %v3749_v32 = vpop.f32.mrb[82].mxu0  ;;  %v12637_v48 = vld [vmem:[#allocation4] sm:$0xff] }
 0x602   : > { %v11447_v41 = vadd.f32 %v3749_v32, %v13734_v40  ;;  %v11291_v3 = vpop.f32.mrb[83].mxu0  ;;  %v12365_v32 = vld [vmem:[%s15353_s3 + $0x74] ss:$8 sps:$4 sm:$0xff]  }
 0x603   : > { %9208 = vmatmul.mubr.msk.f32.gmra.mrb[116].mxu1 %vm3899_vm7, %v15370_v13  ;;  %vm3874_vm7 = vcmp.eq.s32.totalorder %v13872_v9, %v13885_v42 }
 0x604   : > { %v11362_v31 = vpack.c.bf16 %v11447_v41, %v11446_v30  ;;  %9209 = vmatprep.mubr.msk.f32.mxu1 %vm3904_vm8, %v15370_v13  ;;  %v9145_v15 = vsel %vm3874_vm7, 1.0, %v13653_v29  ;;  %vm3898_vm7 = vcmp.eq.s32.totalorder %v13872_v9, %v13952_v56  ;;  %v12356_v30 = vld [vmem:[%s15353_s3 + $0x44] ss:$8 sps:$4 sm:$0xff]  }
 0x605   : > { %v12368_v41 = vld [vmem:[%s15353_s3 + $0x4] ss:$8 sps:$4 sm:$0xff]  }
 0x606   : > { %11363 = vmatpush1.bf16.msra.mxu1 %v11362_v31 }
 0x607   : > { %v3754_v26 = vpop.f32.mrb[84].mxu0  ;;  %11364 = vmatprep.subr.bf16.mxu1 %v12707_v7  ;;  %9210 = vmatmul.mubr.msk.f32.gmra.mrb[118].mxu1 %vm3903_vm9, %v15370_v13  ;;  %vm3878_vm9 = vcmp.eq.s32.totalorder %v13872_v9, %v13900_v43 }
 0x608   : > { %v11448_v40 = vadd.f32 %v3754_v26, %v13737_v49  ;;  %v11294_v47 = vpop.f32.mrb[85].mxu0  ;;  %9211 = vmatprep.mubr.msk.f32.mxu1 %vm3908_vm10, %v15370_v13  ;;  %v9149_v59 = vsel %vm3878_vm9, 1.0, %v13653_v29  ;;  %vm3902_vm9 = vcmp.eq.s32.totalorder %v13872_v9, %v13963_v27 }
 0x609   : > { %v3757_v44 = vpop.f32.mrb[86].mxu0 }
 0x60a   : > { %v11449_v17 = vadd.f32 %v3757_v44, %v13741_v60  ;;  %v11295_v50 = vpop.f32.mrb[87].mxu0 }
 0x60b   : > { %9212 = vmatmul.mubr.msk.f32.gmra.mrb[120].mxu1 %vm3907_vm11, %v15370_v13  ;;  %vm3882_vm11 = vcmp.eq.s32.totalorder %v13872_v9, %v13910_v22 }
 0x60c   : > { %v11365_v55 = vpack.c.bf16 %v11449_v17, %v11448_v40  ;;  %9213 = vmatprep.mubr.msk.f32.mxu1 %vm3912_vm12, %v15370_v13 }
 0x60e   : > { %11366 = vmatpush1.bf16.msra.mxu1 %v11365_v55 }
 0x60f   : > { %v3762_v49 = vpop.f32.mrb[88].mxu0  ;;  %11367 = vmatprep.subr.bf16.mxu1 %v12707_v7  ;;  %9214 = vmatmul.mubr.msk.f32.gmra.mrb[122].mxu1 %vm3911_vm13, %v15370_v13  ;;  %vm3886_vm13 = vcmp.eq.s32.totalorder %v13872_v9, %v13921_v33 }
 0x610   : > { %v11450_v60 = vadd.f32 %v3762_v49, %v13744_v5  ;;  %v11298_v6 = vpop.f32.mrb[89].mxu0  ;;  %9215 = vmatprep.mubr.msk.f32.mxu1 %vm3916_vm14, %v15370_v13 }
 0x611   : > { %v3765_v38 = vpop.f32.mrb[90].mxu0 }
 0x612   : > { %v11451_v51 = vadd.f32 %v3765_v38, %v13748_v16  ;;  %v11299_v57 = vpop.f32.mrb[91].mxu0 }
 0x613   : > { %9216 = vmatmul.mubr.msk.f32.gmra.mrb[124].mxu1 %vm3915_vm0, %v15370_v13 }
 0x614   : > { %v11368_v21 = vpack.c.bf16 %v11451_v51, %v11450_v60  ;;  %9218 = vmatprep.mubr.msk.f32.mxu1 %vm4030_vm2, %v9141_v11 }
 0x616   : > { %11369 = vmatpush1.bf16.msra.mxu1 %v11368_v21 }
 0x617   : > { %v3770_v5 = vpop.f32.mrb[92].mxu0  ;;  %11370 = vmatprep.subr.bf16.mxu1 %v12707_v7 }
 0x618   : > { %v11452_v58 = vadd.f32 %v3770_v5, %v13751_v25  ;;  %v11302_v62 = vpop.f32.mrb[93].mxu0  ;;  %v14030_v25 = vadd.s32 256, %v13773_v2 }
 0x619   : > { %v3773_v53 = vpop.f32.mrb[94].mxu0 }
 0x61a   : > { %v11453_v18 = vadd.f32 %v3773_v53, %v15371_v45  ;;  %v11303_v4 = vpop.f32.mrb[95].mxu0  ;;  %vm3869_vm8 = vcmp.eq.s32.totalorder %v14030_v25, %v13782_v12  ;;  %vm3873_vm10 = vcmp.eq.s32.totalorder %v14030_v25, %v13885_v42  ;;  %vm3877_vm12 = vcmp.eq.s32.totalorder %v14030_v25, %v13900_v43 }
 0x61b   : > { %v9153_v12 = vsel %vm3882_vm11, 1.0, %v13653_v29  ;;  %vm3881_vm14 = vcmp.eq.s32.totalorder %v14030_v25, %v13910_v22  ;;  %v9157_v42 = vsel %vm3886_vm13, 1.0, %v13653_v29  ;;  %vm3885_vm0 = vcmp.eq.s32.totalorder %v14030_v25, %v13921_v33 }
 0x61c   : > { %v11371_v63 = vpack.c.bf16 %v11453_v18, %v11452_v58  ;;  %v9161_v43 = vsel %vm3890_vm15, 1.0, %v13653_v29  ;;  %v9165_v22 = vsel %vm3894_vm5, 1.0, %v13653_v29  ;;  %v9169_v33 = vsel %vm3898_vm7, 1.0, %v13653_v29 }
 0x61d   : > { %vm3906_vm11 = vcmp.eq.s32.totalorder %v13872_v9, %v13973_v35  ;;  %vm3910_vm13 = vcmp.eq.s32.totalorder %v13872_v9, %v13984_v37  ;;  %vm3914_vm15 = vcmp.eq.s32.totalorder %v13872_v9, %v13994_v36  ;;  %vm3913_vm5 = vcmp.eq.s32.totalorder %v14030_v25, %v13994_v36  ;;  %v12359_v9 = vld [vmem:[%s15353_s3 + $0x54] ss:$8 sps:$4 sm:$0xff]  }
 0x61e   : > { %11372 = vmatpush1.bf16.msra.mxu1 %v11371_v63 }
 0x61f   : > { %v3778_v16 = vpop.f32.mrb[96].mxu0  ;;  %11373 = vmatprep.subr.bf16.mxu1 %v12707_v7 }
 0x620   : > { %v11454_v52 = vadd.f32 %v3778_v16, %v15372_v34  ;;  %v11306_v8 = vpop.f32.mrb[97].mxu0 }
 0x621   : > { %v3781_v54 = vpop.f32.mrb[98].mxu0 }
 0x622   : > { %v11455_v28 = vadd.f32 %v3781_v54, %v15373_v14  ;;  %v11307_v10 = vpop.f32.mrb[99].mxu0 }
 0x624   : > { %v11374_v20 = vpack.c.bf16 %v11455_v28, %v11454_v52 }
 0x626   : > { %11376 = vmatpush1.bf16.msk.msra.mxu1 %vm11375_vm6, %v11374_v20  ;;  %vm3889_vm6 = vcmp.eq.s32.totalorder %v14030_v25, %v13931_v1  ;;  %v9173_v1 = vsel %vm3902_vm9, 1.0, %v13653_v29  ;;  %vm6518_vm9 = vcmask 809984  }
 0x627   : > { %4495 = vmatprep.subr.bf16.mxu1 %v12356_v30 }
 0x629   : > { %9219 = vmatmul.mubr.msk.f32.vlgmr.msra.gmra.mrb[126].mxu1 %vm3869_vm8, %v15370_v13  ;;  %vm3893_vm8 = vcmp.eq.s32.totalorder %v14030_v25, %v13942_v24  ;;  %v9177_v24 = vsel %vm3906_vm11, 1.0, %v13653_v29 }
 0x62a   : > { %9220 = vmatprep.mubr.msk.f32.mxu1 %vm4030_vm2, %v9145_v15  ;;  %4496 = vmatpush1.bf16.msra.mxu1 %v12354_v23 }
 0x62b   : > { %4497 = vmatprep.subr.bf16.mxu1 %v12359_v9 }
 0x62d   : > { %9221 = vmatmul.mubr.msk.f32.gmra.mrb[128].mxu1 %vm3873_vm10, %v15370_v13  ;;  %vm3897_vm10 = vcmp.eq.s32.totalorder %v14030_v25, %v13952_v56  ;;  %v9181_v56 = vsel %vm3910_vm13, 1.0, %v13653_v29  ;;  %vm6910_vm13 = vcmask 1045504  }
 0x62e   : > { %9222 = vmatprep.mubr.msk.f32.mxu1 %vm4030_vm2, %v9149_v59 }
 0x631   : > { %9223 = vmatmul.mubr.msk.f32.gmra.mrb[130].mxu1 %vm3877_vm12, %v15370_v13  ;;  %vm3901_vm12 = vcmp.eq.s32.totalorder %v14030_v25, %v13963_v27  ;;  %v9185_v27 = vsel %vm3914_vm15, 1.0, %v13653_v29  ;;  %vm7313_vm15 = vsmask.f32 4352 }
 0x632   : > { %9224 = vmatprep.mubr.msk.f32.mxu1 %vm4030_vm2, %v9153_v12 }
 0x635   : > { %9225 = vmatmul.mubr.msk.f32.gmra.mrb[132].mxu1 %vm3881_vm14, %v15370_v13  ;;  %vm3905_vm14 = vcmp.eq.s32.totalorder %v14030_v25, %v13973_v35  ;;  %v9189_v35 = vsel %vm3918_vm4, 1.0, %v13653_v29  ;;  %v12357_v29 = vld [vmem:[%s15353_s3 + $0x50] ss:$8 sps:$4 sm:$0xff]   ;;  %vm4347_vm4 = vcmask 523264  }
 0x636   : > { %9226 = vmatprep.mubr.msk.f32.mxu1 %vm4030_vm2, %v9157_v42  ;;  %4498 = vmatpush1.bf16.msra.mxu1 %v12357_v29  ;;  %4349 = vst.msk [vmem:[#allocation3 + $0x8] sm:$0xff] %vm4347_vm4, %v12637_v48  ;;  %4348 = vst.msk [vmem:[#allocation3] sm:$0xff] %vm4347_vm4, %v12637_v48  ;;  %v14180_v42 = vld [vmem:[%s15352_s2] ss:$0 sm:$0xff] }
 0x637   : > { %4350 = vst.msk [vmem:[#allocation3 + $0x10] sm:$0xff] %vm4347_vm4, %v12637_v48  ;;  %4351 = vst.msk [vmem:[#allocation3 + $0x18] sm:$0xff] %vm4347_vm4, %v12637_v48 }
 0x638   : > { %4352 = vst.msk [vmem:[#allocation3 + $0x20] sm:$0xff] %vm4347_vm4, %v12637_v48  ;;  %4353 = vst.msk [vmem:[#allocation3 + $0x28] sm:$0xff] %vm4347_vm4, %v12637_v48 }
 0x639   : > { %9227 = vmatmul.mubr.msk.f32.gmra.mrb[134].mxu1 %vm3885_vm0, %v15370_v13  ;;  %vm3909_vm0 = vcmp.eq.s32.totalorder %v14030_v25, %v13984_v37  ;;  %4354 = vst.msk [vmem:[#allocation3 + $0x30] sm:$0xff] %vm4347_vm4, %v12637_v48  ;;  %4355 = vst.msk [vmem:[#allocation3 + $0x38] sm:$0xff] %vm4347_vm4, %v12637_v48  ;;  %v12363_v37 = vld [vmem:[%s15353_s3 + $0x70] ss:$8 sps:$4 sm:$0xff]  }
 0x63a   : > { %9228 = vmatprep.mubr.msk.f32.mxu1 %vm4030_vm2, %v9161_v43  ;;  %4356 = vst.msk [vmem:[#allocation3 + $0x40] sm:$0xff] %vm4347_vm4, %v12637_v48  ;;  %4357 = vst.msk [vmem:[#allocation3 + $0x48] sm:$0xff] %vm4347_vm4, %v12637_v48 }
 0x63b   : > { %4358 = vst.msk [vmem:[#allocation3 + $0x50] sm:$0xff] %vm4347_vm4, %v12637_v48  ;;  %4359 = vst.msk [vmem:[#allocation3 + $0x58] sm:$0xff] %vm4347_vm4, %v12637_v48 }
 0x63c   : > { %4360 = vst.msk [vmem:[#allocation3 + $0x60] sm:$0xff] %vm4347_vm4, %v12637_v48  ;;  %4361 = vst.msk [vmem:[#allocation3 + $0x68] sm:$0xff] %vm4347_vm4, %v12637_v48 }
 0x63d   : > { %9229 = vmatmul.mubr.msk.f32.gmra.mrb[136].mxu1 %vm3889_vm6, %v15370_v13  ;;  %vm3917_vm6 = vcmp.eq.s32.totalorder %v14030_v25, %v13869_v0  ;;  %v12362_v0 = vld [vmem:[%s15353_s3 + $0x64] ss:$8 sps:$4 sm:$0xff]  }
 0x63e   : > { %9230 = vmatprep.mubr.msk.f32.mxu1 %vm4030_vm2, %v9165_v22  ;;  %4499 = vmatprep.subr.bf16.mxu1 %v12362_v0 }
 0x641   : > { %9231 = vmatmul.mubr.msk.f32.gmra.mrb[138].mxu1 %vm3893_vm8, %v15370_v13  ;;  %vm6528_vm8 = vcmask 1042432  }
 0x642   : > { %9232 = vmatprep.mubr.msk.f32.mxu1 %vm4030_vm2, %v9169_v33 }
 0x645   : > { %9233 = vmatmul.mubr.msk.f32.gmra.mrb[140].mxu1 %vm3897_vm10, %v15370_v13 }
 0x646   : > { %9234 = vmatprep.mubr.msk.f32.mxu1 %vm4030_vm2, %v9173_v1 }
 0x649   : > { %9235 = vmatmul.mubr.msk.f32.gmra.mrb[142].mxu1 %vm3901_vm12, %v15370_v13  ;;  %vm6723_vm12 = vsmask.f32 5376 }
 0x64a   : > { %9236 = vmatprep.mubr.msk.f32.mxu1 %vm4030_vm2, %v9177_v24 }
 0x64d   : > { %9237 = vmatmul.mubr.msk.f32.gmra.mrb[144].mxu1 %vm3905_vm14, %v15370_v13  ;;  %vm7114_vm14 = vcmask 1044480  }
 0x64e   : > { %9238 = vmatprep.mubr.msk.f32.mxu1 %vm4030_vm2, %v9181_v56 }
 0x651   : > { %9239 = vmatmul.mubr.msk.f32.gmra.mrb[146].mxu1 %vm3909_vm0, %v15370_v13  ;;  %vm7726_vm0 = vsmask.f32 7424 }
 0x652   : > { %9240 = vmatprep.mubr.msk.f32.mxu1 %vm4030_vm2, %v9185_v27 }
 0x655   : > { %9241 = vmatmul.mubr.msk.f32.gmra.mrb[148].mxu1 %vm3913_vm5, %v15370_v13  ;;  %vm8850_vm5 = vcmask 257024  }
 0x656   : > { %9242 = vmatprep.mubr.msk.f32.mxu1 %vm4030_vm2, %v9189_v35  ;;  %vm4362_vm2 = vcmask 519168  }
 0x659   : > { %9243 = vmatmul.mubr.msk.f32.gmra.mrb[150].mxu1 %vm3917_vm6, %v15370_v13  ;;  %v12360_v13 = vld [vmem:[%s15353_s3 + $0x60] ss:$8 sps:$4 sm:$0xff]  }
 0x65a   : > { %4500 = vmatpush1.bf16.msra.mxu1 %v12360_v13  ;;  %4527 = vmatprep.mubr.bf16.mxu1 %v12709_v39 }
 0x65b   : > { %4501 = vmatprep.subr.bf16.mxu1 %v12365_v32 }
 0x65e   : > { %4502 = vmatpush1.bf16.msra.mxu1 %v12363_v37 }
 0x65f   : > { %4657 = vmatprep.subr.bf16.mxu1 %v12368_v41 }
 0x6b5   : > { %v10169_v3 = vpop.f32.mrb[100].mxu1 }
 0x6b6   : > { %v10170_v31 = vpop.f32.mrb[101].mxu1 }
 0x6b7   : > { %v10171_v36 = vadd.f32 %v10170_v31, %v10169_v3 }
 0x6b9   : > { %v4141_v43 = vadd.f32 %v10171_v36, %v14180_v42 }
 0x6ba   : > { %v10172_v26 = vpop.f32.mrb[102].mxu1 }
 0x6bb   : > { %v10173_v40 = vpop.f32.mrb[103].mxu1 }
 0x6bc   : > { %v10174_v47 = vadd.f32 %v10173_v40, %v10172_v26 }
 0x6be   : > { %v10175_v44 = vpop.f32.mrb[104].mxu1  ;;  %v4146_v56 = vadd.f32 %v10174_v47, %v14180_v42 }
 0x6bf   : > { %v10176_v17 = vpop.f32.mrb[105].mxu1 }
 0x6c0   : > { %v10177_v50 = vadd.f32 %v10176_v17, %v10175_v44  ;;  %v12366_v44 = vld [vmem:[%s15353_s3] ss:$8 sps:$4 sm:$0xff]  }
 0x6c2   : > { %v10178_v55 = vpop.f32.mrb[106].mxu1  ;;  %v4151_v29 = vadd.f32 %v10177_v50, %v14180_v42 }
 0x6c3   : > { %v10179_v49 = vpop.f32.mrb[107].mxu1 }
 0x6c4   : > { %v10180_v60 = vadd.f32 %v10179_v49, %v10178_v55  ;;  %v12371_v49 = vld [vmem:[%s15353_s3 + $0x14] ss:$8 sps:$4 sm:$0xff]  }
 0x6c6   : > { %v10181_v6 = vpop.f32.mrb[108].mxu1  ;;  %v4156_v32 = vadd.f32 %v10180_v60, %v14180_v42 }
 0x6c7   : > { %v10182_v38 = vpop.f32.mrb[109].mxu1 }
 0x6c8   : > { %v10183_v11 = vadd.f32 %v10182_v38, %v10181_v6 }
 0x6ca   : > { %v10184_v51 = vpop.f32.mrb[110].mxu1  ;;  %v4161_v36 = vadd.f32 %v10183_v11, %v14180_v42  ;;  %v12369_v11 = vld [vmem:[%s15353_s3 + $0x10] ss:$8 sps:$4 sm:$0xff]  }
 0x6cb   : > { %v10185_v57 = vpop.f32.mrb[111].mxu1 }
 0x6cc   : > { %v10186_v21 = vadd.f32 %v10185_v57, %v10184_v51 }
 0x6ce   : > { %v10187_v5 = vpop.f32.mrb[112].mxu1  ;;  %v4166_v6 = vadd.f32 %v10186_v21, %v14180_v42  ;;  %v12374_v21 = vld [vmem:[%s15353_s3 + $0x24] ss:$8 sps:$4 sm:$0xff]  }
 0x6cf   : > { %v10188_v58 = vpop.f32.mrb[113].mxu1 }
 0x6d0   : > { %v14163_v62 = vadd.f32 %v10188_v58, %v10187_v5 }
 0x6d2   : > { %v10190_v53 = vpop.f32.mrb[114].mxu1 }
 0x6d3   : > { %v10191_v45 = vpop.f32.mrb[115].mxu1 }
 0x6d4   : > { %v14165_v18 = vadd.f32 %v10191_v45, %v10190_v53 }
 0x6d6   : > { %v10193_v4 = vpop.f32.mrb[116].mxu1 }
 0x6d7   : > { %v10194_v63 = vpop.f32.mrb[117].mxu1 }
 0x6d8   : > { %v14167_v16 = vadd.f32 %v10194_v63, %v10193_v4  ;;  %v4171_v4 = vadd.f32 %v14163_v62, %v14180_v42  ;;  %v4176_v62 = vadd.f32 %v14165_v18, %v14180_v42  ;;  %v12380_v18 = vld [vmem:[%s15353_s3 + $0x84] ss:$8 sps:$4 sm:$0xff]  }
 0x6da   : > { %v10196_v34 = vpop.f32.mrb[118].mxu1 }
 0x6db   : > { %v10197_v52 = vpop.f32.mrb[119].mxu1 }
 0x6dc   : > { %v14169_v8 = vadd.f32 %v10197_v52, %v10196_v34 }
 0x6de   : > { %v10199_v54 = vpop.f32.mrb[120].mxu1 }
 0x6df   : > { %v10200_v14 = vpop.f32.mrb[121].mxu1 }
 0x6e0   : > { %v14171_v28 = vadd.f32 %v10200_v14, %v10199_v54  ;;  %v12372_v54 = vld [vmem:[%s15353_s3 + $0x20] ss:$8 sps:$4 sm:$0xff]  }
 0x6e2   : > { %v10202_v10 = vpop.f32.mrb[122].mxu1 }
 0x6e3   : > { %v10203_v25 = vpop.f32.mrb[123].mxu1 }
 0x6e4   : > { %v14173_v20 = vadd.f32 %v10203_v25, %v10202_v10 }
 0x6e6   : > { %v10205_v15 = vpop.f32.mrb[124].mxu1 }
 0x6e7   : > { %v10206_v59 = vpop.f32.mrb[125].mxu1 }
 0x6e8   : > { %v14175_v12 = vadd.f32 %v10206_v59, %v10205_v15  ;;  %v12377_v15 = vld [vmem:[%s15353_s3 + $0x34] ss:$8 sps:$4 sm:$0xff]  }
 0x6fc   : > { %v4270_v22 = vpop.f32.mrb[126].mxu1 }
 0x6fd   : > { %v4271_v33 = vadd.f32 %v4270_v22, %v4141_v43  ;;  %v4272_v1 = vpop.f32.mrb[127].mxu1  ;;  %v12375_v22 = vld [vmem:[%s15353_s3 + $0x30] ss:$8 sps:$4 sm:$0xff]  }
 0x6ff   : > { %v4334_v24 = vmax.f32 %v4271_v33, 0.0 }
 0x700   : > { %v4275_v27 = vpop.f32.mrb[128].mxu1 }
 0x701   : > { %4364 = vst.msk [vmem:[#allocation3 + $0x8] sm:$0xff] %vm4347_vm4, %v4334_v24  ;;  %v4276_v35 = vadd.f32 %v4275_v27, %v4146_v56  ;;  %v4277_v23 = vpop.f32.mrb[129].mxu1 }
 0x702   : > { %v4181_v23 = vadd.f32 %v14167_v16, %v14180_v42 }
 0x703   : > { %v4335_v30 = vmax.f32 %v4276_v35, 0.0 }
 0x704   : > { %v4280_v9 = vpop.f32.mrb[130].mxu1 }
 0x705   : > { %4365 = vst.msk [vmem:[#allocation3 + $0x10] sm:$0xff] %vm4347_vm4, %v4335_v30  ;;  %v4281_v48 = vadd.f32 %v4280_v9, %v4151_v29  ;;  %v4282_v0 = vpop.f32.mrb[131].mxu1 }
 0x707   : > { %v4336_v13 = vmax.f32 %v4281_v48, 0.0 }
 0x708   : > { %v4285_v37 = vpop.f32.mrb[132].mxu1  ;;  %v4405_v40 = vld [vmem:[#allocation3 + $0x5] sm:$0xff] }
 0x709   : > { %4366 = vst.msk [vmem:[#allocation3 + $0x18] sm:$0xff] %vm4347_vm4, %v4336_v13  ;;  %v4286_v41 = vadd.f32 %v4285_v37, %v4156_v32  ;;  %v4287_v3 = vpop.f32.mrb[133].mxu1  ;;  %v4186_v37 = vadd.f32 %v14169_v8, %v14180_v42 }
 0x70b   : > { %v4337_v31 = vmax.f32 %v4286_v41, 0.0 }
 0x70c   : > { %v4290_v26 = vpop.f32.mrb[134].mxu1  ;;  %v4406_v47 = vld [vmem:[#allocation3 + $0xd] sm:$0xff] }
 0x70d   : > { %4367 = vst.msk [vmem:[#allocation3 + $0x20] sm:$0xff] %vm4347_vm4, %v4337_v31  ;;  %v4291_v17 = vadd.f32 %v4290_v26, %v4161_v36  ;;  %v4292_v50 = vpop.f32.mrb[135].mxu1  ;;  %v4418_v55 = vpack.c.bf16 %v4406_v47, %v4405_v40  ;;  %v14203_v51 = vld [vmem:[#allocation3 + $0xc] sm:$0xff]  ;;  %v4191_v47 = vadd.f32 %v14171_v28, %v14180_v42 }
 0x70f   : > { %v4338_v60 = vmax.f32 %v4291_v17, 0.0  ;;  %9260 = vmatmul.mubr.msk.bf16.vlgmr.msra.gmra.mrb[152].mxu1 %vm4347_vm4, %v4418_v55 }
 0x710   : > { %v4295_v38 = vpop.f32.mrb[136].mxu1  ;;  %4537 = vmatprep.mubr.bf16.mxu1 %v12709_v39  ;;  %4658 = vmatpush1.bf16.msra.mxu1 %v12366_v44  ;;  %v14205_v57 = vld [vmem:[#allocation3 + $0x14] sm:$0xff] }
 0x711   : > { %4368 = vst.msk [vmem:[#allocation3 + $0x28] sm:$0xff] %vm4347_vm4, %v4338_v60  ;;  %v4296_v5 = vadd.f32 %v4295_v38, %v4166_v6  ;;  %v4297_v58 = vpop.f32.mrb[137].mxu1  ;;  %4659 = vmatprep.subr.bf16.mxu1 %v12371_v49  ;;  %v6073_v53 = vpack.c.bf16 %v14205_v57, %v14203_v51  ;;  %v4407_v34 = vld [vmem:[#allocation3 + $0x15] sm:$0xff]  ;;  %v4196_v6 = vadd.f32 %v14173_v20, %v14180_v42 }
 0x713   : > { %v4339_v45 = vmax.f32 %v4296_v5, 0.0 }
 0x714   : > { %v4300_v63 = vpop.f32.mrb[138].mxu1  ;;  %v4408_v52 = vld [vmem:[#allocation3 + $0x1d] sm:$0xff]  ;;  %4660 = vmatpush1.bf16.msra.mxu1 %v12369_v11 }
 0x715   : > { %4369 = vst.msk [vmem:[#allocation3 + $0x30] sm:$0xff] %vm4347_vm4, %v4339_v45  ;;  %v4301_v14 = vadd.f32 %v4300_v63, %v4171_v4  ;;  %v4302_v10 = vpop.f32.mrb[139].mxu1  ;;  %v4419_v25 = vpack.c.bf16 %v4408_v52, %v4407_v34  ;;  %4661 = vmatprep.subr.bf16.mxu1 %v12374_v21  ;;  %v14229_v33 = vld [vmem:[#allocation3 + $0x1c] sm:$0xff]  ;;  %v4201_v4 = vadd.f32 %v14175_v12, %v14180_v42 }
 0x717   : > { %v4340_v59 = vmax.f32 %v4301_v14, 0.0  ;;  %9261 = vmatmul.mubr.msk.bf16.gmra.mrb[156].mxu1 %vm4347_vm4, %v4419_v25 }
 0x718   : > { %v4305_v43 = vpop.f32.mrb[140].mxu1  ;;  %4547 = vmatprep.mubr.bf16.mxu1 %v12709_v39  ;;  %4662 = vmatpush1.bf16.msra.mxu1 %v12372_v54  ;;  %v14231_v1 = vld [vmem:[#allocation3 + $0x24] sm:$0xff] }
 0x719   : > { %4370 = vst.msk [vmem:[#allocation3 + $0x38] sm:$0xff] %vm4347_vm4, %v4340_v59  ;;  %v4306_v24 = vadd.f32 %v4305_v43, %v4176_v62  ;;  %v4307_v56 = vpop.f32.mrb[141].mxu1  ;;  %4663 = vmatprep.subr.bf16.mxu1 %v12377_v15  ;;  %v6074_v27 = vpack.c.bf16 %v14231_v1, %v14229_v33  ;;  %v4409_v29 = vld [vmem:[#allocation3 + $0x25] sm:$0xff] }
 0x71a   : > { %v4377_v56 = vld [vmem:[#allocation3 + $0x4] sm:$0xff] }
 0x71b   : > { %v4341_v35 = vmax.f32 %v4306_v24, 0.0 }
 0x71c   : > { %v4310_v30 = vpop.f32.mrb[142].mxu1  ;;  %v4410_v9 = vld [vmem:[#allocation3 + $0x2d] sm:$0xff]  ;;  %4664 = vmatpush1.bf16.msra.mxu1 %v12375_v22 }
 0x71d   : > { %4371 = vst.msk [vmem:[#allocation3 + $0x40] sm:$0xff] %vm4347_vm4, %v4341_v35  ;;  %v4311_v48 = vadd.f32 %v4310_v30, %v4181_v23  ;;  %v4312_v0 = vpop.f32.mrb[143].mxu1  ;;  %v4420_v13 = vpack.c.bf16 %v4410_v9, %v4409_v29  ;;  %4848 = vmatprep.subr.bf16.mxu1 %v12380_v18  ;;  %v14246_v16 = vld [vmem:[#allocation3 + $0x2c] sm:$0xff]  ;;  %v12378_v18 = vld [vmem:[%s15353_s3 + $0x80] ss:$8 sps:$4 sm:$0xff]   ;;  %v4390_v35 = vpack.c.bf16 %v14203_v51, %v4377_v56 }
 0x71e   : > { %v12383_v23 = vld [vmem:[%s15353_s3 + $0x94] ss:$8 sps:$4 sm:$0xff]   ;;  %v12381_v30 = vld [vmem:[%s15353_s3 + $0x90] ss:$8 sps:$4 sm:$0xff]   ;;  %v12386_v29 = vld [vmem:[%s15353_s3 + $0xa4] ss:$8 sps:$4 sm:$0xff]  }
 0x71f   : > { %v4342_v32 = vmax.f32 %v4311_v48, 0.0  ;;  %9262 = vmatmul.mubr.msk.bf16.gmra.mrb[160].mxu1 %vm4347_vm4, %v4420_v13  ;;  %v12384_v9 = vld [vmem:[%s15353_s3 + $0xa0] ss:$8 sps:$4 sm:$0xff]   ;;  %v4391_v48 = vpack.c.bf16 %v14229_v33, %v14205_v57  ;;  %v12389_v0 = vld [vmem:[%s15353_s3 + $0xb4] ss:$8 sps:$4 sm:$0xff]  }
 0x720   : > { %v4315_v41 = vpop.f32.mrb[144].mxu1  ;;  %4557 = vmatprep.mubr.bf16.mxu1 %v12709_v39  ;;  %v14248_v3 = vld [vmem:[#allocation3 + $0x34] sm:$0xff] }
 0x721   : > { %4372 = vst.msk [vmem:[#allocation3 + $0x48] sm:$0xff] %vm4347_vm4, %v4342_v32  ;;  %v4316_v31 = vadd.f32 %v4315_v41, %v4186_v37  ;;  %v4317_v36 = vpop.f32.mrb[145].mxu1  ;;  %v6075_v26 = vpack.c.bf16 %v14248_v3, %v14246_v16  ;;  %v4411_v8 = vld [vmem:[#allocation3 + $0x35] sm:$0xff]  ;;  %v12392_v32 = vld [vmem:[%s15353_s3 + $0xc4] ss:$8 sps:$4 sm:$0xff]   ;;  %v4392_v37 = vpack.c.bf16 %v14246_v16, %v14231_v1 }
 0x722   : > { %v12387_v13 = vld [vmem:[%s15353_s3 + $0xb0] ss:$8 sps:$4 sm:$0xff]   ;;  %v12473_v51 = vld [vmem:[%s15353_s3 + $0x274] ss:$8 sps:$4 sm:$0xff]   ;;  %v6072_v1 = vld [vmem:[#allocation3 + $0x6c] sm:$0x7] }
 0x723   : > { %v4343_v40 = vmax.f32 %v4316_v31, 0.0  ;;  %v12471_v57 = vld [vmem:[%s15353_s3 + $0x270] ss:$8 sps:$4 sm:$0xff]  }
 0x724   : > { %v4320_v44 = vpop.f32.mrb[146].mxu1  ;;  %v4412_v17 = vld [vmem:[#allocation3 + $0x3d] sm:$0xff]  ;;  %v6278_v16 = vld [vmem:[#allocation3 + $0x15] sm:$0xff] }
 0x725   : > { %4373 = vst.msk [vmem:[#allocation3 + $0x50] sm:$0xff] %vm4347_vm4, %v4343_v40  ;;  %v4321_v50 = vadd.f32 %v4320_v44, %v4191_v47  ;;  %v4322_v55 = vpop.f32.mrb[147].mxu1  ;;  %v4421_v49 = vpack.c.bf16 %v4412_v17, %v4411_v8  ;;  %v14260_v11 = vld [vmem:[#allocation3 + $0x3c] sm:$0xff]  ;;  %v4759_v8 = vld [vmem:[#allocation3 + $0xe] sm:$0xff]  ;;  %v4758_v17 = vld [vmem:[#allocation3 + $0x6] sm:$0xff] }
 0x726   : > { %v4393_v41 = vpack.c.bf16 %v14260_v11, %v14248_v3  ;;  %v4771_v55 = vpack.c.bf16 %v4759_v8, %v4758_v17  ;;  %v12408_v8 = vld [vmem:[%s15353_s3 + $0x120] ss:$8 sps:$4 sm:$0xff]   ;;  %v6277_v3 = vld [vmem:[#allocation3 + $0xd] sm:$0xff] }
 0x727   : > { %v4344_v60 = vmax.f32 %v4321_v50, 0.0  ;;  %9263 = vmatmul.mubr.msk.bf16.gmra.mrb[164].mxu1 %vm4347_vm4, %v4421_v49  ;;  %v12390_v50 = vld [vmem:[%s15353_s3 + $0xc0] ss:$8 sps:$4 sm:$0xff]   ;;  %v12395_v49 = vld [vmem:[%s15353_s3 + $0xd4] ss:$8 sps:$4 sm:$0xff]  }
 0x728   : > { %v4325_v38 = vpop.f32.mrb[148].mxu1  ;;  %4567 = vmatprep.mubr.bf16.mxu1 %v12709_v39  ;;  %v14262_v28 = vld [vmem:[#allocation3 + $0x44] sm:$0xff] }
 0x729   : > { %4374 = vst.msk [vmem:[#allocation3 + $0x58] sm:$0xff] %vm4347_vm4, %v4344_v60  ;;  %v4326_v5 = vadd.f32 %v4325_v38, %v4196_v6  ;;  %v4327_v58 = vpop.f32.mrb[149].mxu1  ;;  %v6076_v21 = vpack.c.bf16 %v14262_v28, %v14260_v11  ;;  %v14269_v20 = vld [vmem:[#allocation3 + $0x45] sm:$0xff]  ;;  %v12393_v60 = vld [vmem:[%s15353_s3 + $0xd0] ss:$8 sps:$4 sm:$0xff]  }
 0x72a   : > { %v12398_v6 = vld [vmem:[%s15353_s3 + $0xe4] ss:$8 sps:$4 sm:$0xff]   ;;  %v12396_v58 = vld [vmem:[%s15353_s3 + $0xe0] ss:$8 sps:$4 sm:$0xff]  }
 0x72b   : > { %v4345_v45 = vmax.f32 %v4326_v5, 0.0  ;;  %v4761_v38 = vld [vmem:[#allocation3 + $0x1e] sm:$0xff]  ;;  %v4760_v5 = vld [vmem:[#allocation3 + $0x16] sm:$0xff] }
 0x72c   : > { %v4330_v63 = vpop.f32.mrb[150].mxu1  ;;  %v14271_v34 = vld [vmem:[#allocation3 + $0x4d] sm:$0xff]  ;;  %v6280_v11 = vld [vmem:[#allocation3 + $0x25] sm:$0xff] }
 0x72d   : > { %4375 = vst.msk [vmem:[#allocation3 + $0x60] sm:$0xff] %vm4347_vm4, %v4345_v45  ;;  %v4331_v52 = vadd.f32 %v4330_v63, %v4201_v4  ;;  %v4422_v54 = vpack.c.bf16 %v14271_v34, %v14269_v20  ;;  %v4332_v14 = vpop.f32.mrb[151].mxu1  ;;  %v14280_v12 = vld [vmem:[#allocation3 + $0x4c] sm:$0xff]  ;;  %v4772_v45 = vpack.c.bf16 %v4761_v38, %v4760_v5  ;;  %v12401_v4 = vld [vmem:[%s15353_s3 + $0xf4] ss:$8 sps:$4 sm:$0xff]  }
 0x72e   : > { %v4394_v31 = vpack.c.bf16 %v14280_v12, %v14262_v28  ;;  %v12399_v63 = vld [vmem:[%s15353_s3 + $0xf0] ss:$8 sps:$4 sm:$0xff]   ;;  %v4762_v14 = vld [vmem:[#allocation3 + $0x26] sm:$0xff]  ;;  %v6279_v28 = vld [vmem:[#allocation3 + $0x1d] sm:$0xff] }
 0x72f   : > { %v4346_v10 = vmax.f32 %v4331_v52, 0.0  ;;  %9264 = vmatmul.mubr.msk.bf16.gmra.mrb[168].mxu1 %vm4347_vm4, %v4422_v54  ;;  %v12404_v52 = vld [vmem:[%s15353_s3 + $0x104] ss:$8 sps:$4 sm:$0xff]  }
 0x730   : > { %4577 = vmatprep.mubr.bf16.mxu1 %v12709_v39  ;;  %v14278_v25 = vld [vmem:[#allocation3 + $0x55] sm:$0xff]  ;;  %v4982_v5 = vld [vmem:[#allocation3 + $0x3f] sm:$0xff] }
 0x731   : > { %v14282_v42 = vld [vmem:[#allocation3 + $0x54] sm:$0xff]  ;;  %4376 = vst.msk [vmem:[#allocation3 + $0x68] sm:$0xf] %vm4362_vm2, %v4346_v10  ;;  %v6294_v59 = vpack.c.bf16 %v14278_v25, %v14271_v34 }
 0x732   : > { %v6077_v15 = vpack.c.bf16 %v14282_v42, %v14280_v12  ;;  %v4763_v54 = vld [vmem:[#allocation3 + $0x2e] sm:$0xff] }
 0x733   : > { %v4773_v10 = vpack.c.bf16 %v4763_v54, %v4762_v14  ;;  %v4767_v56 = vld [vmem:[#allocation3 + $0x4e] sm:$0xff]  ;;  %v4985_v14 = vld [vmem:[#allocation3 + $0x57] sm:$0xff] }
 0x734   : > { %v14289_v62 = vld [vmem:[#allocation3 + $0x5d] sm:$0xff]  ;;  %v4417_v22 = vld [vmem:[#allocation3 + $0x65] sm:$0x7]  ;;  %v6282_v12 = vld [vmem:[#allocation3 + $0x35] sm:$0xff] }
 0x735   : > { %v4423_v43 = vpack.c.bf16 %v14289_v62, %v14278_v25  ;;  %v4424_v24 = vpack.c.bf16 %v4417_v22, %v4417_v22  ;;  %v14340_v36 = vld [vmem:[#allocation3 + $0x5c] sm:$0xff]  ;;  %v4389_v47 = vld [vmem:[#allocation3 + $0x64] sm:$0x7] }
 0x736   : > { %v4395_v40 = vpack.c.bf16 %v14340_v36, %v14282_v42  ;;  %v4396_v44 = vpack.c.bf16 %v4389_v47, %v4389_v47  ;;  %v4764_v22 = vld [vmem:[#allocation3 + $0x36] sm:$0xff]  ;;  %v4978_v47 = vld [vmem:[#allocation3 + $0x1f] sm:$0xff]  ;;  %v6281_v42 = vld [vmem:[#allocation3 + $0x2d] sm:$0xff] }
 0x737   : > { %9265 = vmatmul.mubr.msk.bf16.gmra.mrb[172].mxu1 %vm4347_vm4, %v4423_v43  ;;  %v4765_v43 = vld [vmem:[#allocation3 + $0x3e] sm:$0xff] }
 0x738   : > { %4587 = vmatprep.mubr.bf16.mxu1 %v12709_v39  ;;  %v4986_v54 = vld [vmem:[#allocation3 + $0x5f] sm:$0xff] }
 0x73f   : > { %9266 = vmatmul.mubr.msk.bf16.gmra.mrb[176].mxu1 %vm4347_vm4, %v4424_v24  ;;  %v4774_v24 = vpack.c.bf16 %v4765_v43, %v4764_v22  ;;  %v4987_v43 = vld [vmem:[#allocation3 + $0x67] sm:$0x7] }
 0x740   : > { %4689 = vmatprep.mubr.bf16.mxu1 %v12709_v39  ;;  %v4994_v22 = vpack.c.bf16 %v4987_v43, %v4987_v43  ;;  %v5412_v43 = vld [vmem:[#allocation3 + $0x21] sm:$0xff] }
 0x747   : > { %9275 = vmatmul.mubr.msk.bf16.vlgmr.msra.gmra.mrb[152].mxu1 %vm4347_vm4, %v4390_v35 }
 0x748   : > { %4699 = vmatprep.mubr.bf16.mxu1 %v12709_v39  ;;  %4849 = vmatpush1.bf16.msra.mxu1 %v12378_v18  ;;  %v4766_v18 = vld [vmem:[#allocation3 + $0x46] sm:$0xff] }
 0x749   : > { %4850 = vmatprep.subr.bf16.mxu1 %v12383_v23  ;;  %v4775_v35 = vpack.c.bf16 %v4767_v56, %v4766_v18  ;;  %v4769_v23 = vld [vmem:[#allocation3 + $0x5e] sm:$0xff]  ;;  %v5192_v56 = vld [vmem:[#allocation3 + $0x8] sm:$0xff] }
 0x74a   : > { %v12414_v18 = vld [vmem:[%s15353_s3 + $0x140] ss:$8 sps:$4 sm:$0xff]  }
 0x74c   : > { %4851 = vmatpush1.bf16.msra.mxu1 %v12381_v30  ;;  %v4768_v30 = vld [vmem:[#allocation3 + $0x56] sm:$0xff] }
 0x74d   : > { %4852 = vmatprep.subr.bf16.mxu1 %v12386_v29  ;;  %v4776_v29 = vpack.c.bf16 %v4769_v23, %v4768_v30  ;;  %v12419_v23 = vld [vmem:[%s15353_s3 + $0x154] ss:$8 sps:$4 sm:$0xff]   ;;  %v12417_v30 = vld [vmem:[%s15353_s3 + $0x150] ss:$8 sps:$4 sm:$0xff]  }
 0x74f   : > { %9276 = vmatmul.mubr.msk.bf16.gmra.mrb[156].mxu1 %vm4347_vm4, %v4391_v48 }
 0x750   : > { %4709 = vmatprep.mubr.bf16.mxu1 %v12709_v39  ;;  %4853 = vmatpush1.bf16.msra.mxu1 %v12384_v9  ;;  %v4770_v9 = vld [vmem:[#allocation3 + $0x66] sm:$0x7] }
 0x751   : > { %4854 = vmatprep.subr.bf16.mxu1 %v12389_v0  ;;  %v4777_v48 = vpack.c.bf16 %v4770_v9, %v4770_v9  ;;  %v4976_v0 = vld [vmem:[#allocation3 + $0xf] sm:$0xff]  ;;  %v5195_v9 = vld [vmem:[#allocation3 + $0x20] sm:$0xff] }
 0x754   : > { %4855 = vmatpush1.bf16.msra.mxu1 %v12387_v13  ;;  %v4975_v13 = vld [vmem:[#allocation3 + $0x7] sm:$0xff] }
 0x755   : > { %5065 = vmatprep.subr.bf16.mxu1 %v12392_v32  ;;  %v12402_v32 = vld [vmem:[%s15353_s3 + $0x100] ss:$8 sps:$4 sm:$0xff]  }
 0x757   : > { %9277 = vmatmul.mubr.msk.bf16.gmra.mrb[160].mxu1 %vm4347_vm4, %v4392_v37  ;;  %v4988_v37 = vpack.c.bf16 %v4976_v0, %v4975_v13  ;;  %v12420_v0 = vld [vmem:[%s15353_s3 + $0x160] ss:$8 sps:$4 sm:$0xff]  }
 0x758   : > { %4719 = vmatprep.mubr.bf16.mxu1 %v12709_v39 }
 0x75f   : > { %9278 = vmatmul.mubr.msk.bf16.gmra.mrb[164].mxu1 %vm4347_vm4, %v4393_v41  ;;  %v12407_v41 = vld [vmem:[%s15353_s3 + $0x114] ss:$8 sps:$4 sm:$0xff]  }
 0x760   : > { %4729 = vmatprep.mubr.bf16.mxu1 %v12709_v39 }
 0x767   : > { %9279 = vmatmul.mubr.msk.bf16.gmra.mrb[168].mxu1 %vm4347_vm4, %v4394_v31  ;;  %v12405_v31 = vld [vmem:[%s15353_s3 + $0x110] ss:$8 sps:$4 sm:$0xff]  }
 0x768   : > { %4739 = vmatprep.mubr.bf16.mxu1 %v12709_v39 }
 0x76f   : > { %9280 = vmatmul.mubr.msk.bf16.gmra.mrb[172].mxu1 %vm4347_vm4, %v4395_v40  ;;  %v12410_v40 = vld [vmem:[%s15353_s3 + $0x124] ss:$8 sps:$4 sm:$0xff]  }
 0x770   : > { %4749 = vmatprep.mubr.bf16.mxu1 %v12709_v39 }
 0x777   : > { %9281 = vmatmul.mubr.msk.bf16.gmra.mrb[176].mxu1 %vm4347_vm4, %v4396_v44  ;;  %v4977_v44 = vld [vmem:[#allocation3 + $0x17] sm:$0xff] }
 0x778   : > { %4880 = vmatprep.mubr.bf16.mxu1 %v12709_v39  ;;  %v4989_v17 = vpack.c.bf16 %v4978_v47, %v4977_v44  ;;  %v5199_v44 = vld [vmem:[#allocation3 + $0x40] sm:$0xff] }
 0x77f   : > { %9298 = vmatmul.mubr.msk.bf16.vlgmr.msra.gmra.mrb[152].mxu1 %vm4347_vm4, %v4771_v55  ;;  %v12411_v55 = vld [vmem:[%s15353_s3 + $0x130] ss:$8 sps:$4 sm:$0xff]  }
 0x780   : > { %4890 = vmatprep.mubr.bf16.mxu1 %v12709_v39  ;;  %5066 = vmatpush1.bf16.msra.mxu1 %v12390_v50  ;;  %v12413_v50 = vld [vmem:[%s15353_s3 + $0x134] ss:$8 sps:$4 sm:$0xff]  }
 0x781   : > { %5067 = vmatprep.subr.bf16.mxu1 %v12395_v49  ;;  %v12416_v49 = vld [vmem:[%s15353_s3 + $0x144] ss:$8 sps:$4 sm:$0xff]  }
 0x784   : > { %5068 = vmatpush1.bf16.msra.mxu1 %v12393_v60  ;;  %v4980_v60 = vld [vmem:[#allocation3 + $0x2f] sm:$0xff] }
 0x785   : > { %5069 = vmatprep.subr.bf16.mxu1 %v12398_v6  ;;  %v4979_v6 = vld [vmem:[#allocation3 + $0x27] sm:$0xff] }
 0x786   : > { %v4990_v38 = vpack.c.bf16 %v4980_v60, %v4979_v6  ;;  %v5203_v60 = vld [vmem:[#allocation3 + $0x60] sm:$0xff]  ;;  %v5202_v6 = vld [vmem:[#allocation3 + $0x58] sm:$0xff] }
 0x787   : > { %9299 = vmatmul.mubr.msk.bf16.gmra.mrb[156].mxu1 %vm4347_vm4, %v4772_v45 }
 0x788   : > { %4900 = vmatprep.mubr.bf16.mxu1 %v12709_v39  ;;  %5070 = vmatpush1.bf16.msra.mxu1 %v12396_v58  ;;  %v4981_v58 = vld [vmem:[#allocation3 + $0x37] sm:$0xff] }
 0x789   : > { %5071 = vmatprep.subr.bf16.mxu1 %v12401_v4  ;;  %v4991_v45 = vpack.c.bf16 %v4982_v5, %v4981_v58  ;;  %v4984_v4 = vld [vmem:[#allocation3 + $0x4f] sm:$0xff]  ;;  %v5204_v5 = vld [vmem:[#allocation3 + $0x68] sm:$0x7] }
 0x78a   : > { %v5211_v58 = vpack.c.bf16 %v5204_v5, %v5204_v5  ;;  %v5629_v5 = vld [vmem:[#allocation3 + $0x22] sm:$0xff] }
 0x78c   : > { %5072 = vmatpush1.bf16.msra.mxu1 %v12399_v63  ;;  %v4983_v63 = vld [vmem:[#allocation3 + $0x47] sm:$0xff] }
 0x78d   : > { %5282 = vmatprep.subr.bf16.mxu1 %v12404_v52  ;;  %v4992_v52 = vpack.c.bf16 %v4984_v4, %v4983_v63  ;;  %v5409_v4 = vld [vmem:[#allocation3 + $0x9] sm:$0xff] }
 0x78e   : > { %v12426_v63 = vld [vmem:[%s15353_s3 + $0x180] ss:$8 sps:$4 sm:$0xff]  }
 0x78f   : > { %9300 = vmatmul.mubr.msk.bf16.gmra.mrb[160].mxu1 %vm4347_vm4, %v4773_v10  ;;  %v4993_v10 = vpack.c.bf16 %v4986_v54, %v4985_v14  ;;  %v12431_v54 = vld [vmem:[%s15353_s3 + $0x194] ss:$8 sps:$4 sm:$0xff]   ;;  %v12429_v14 = vld [vmem:[%s15353_s3 + $0x190] ss:$8 sps:$4 sm:$0xff]  }
 0x790   : > { %4910 = vmatprep.mubr.bf16.mxu1 %v12709_v39 }
 0x797   : > { %9301 = vmatmul.mubr.msk.bf16.gmra.mrb[164].mxu1 %vm4347_vm4, %v4774_v24  ;;  %v5193_v24 = vld [vmem:[#allocation3 + $0x10] sm:$0xff] }
 0x798   : > { %4920 = vmatprep.mubr.bf16.mxu1 %v12709_v39 }
 0x79f   : > { %9302 = vmatmul.mubr.msk.bf16.gmra.mrb[168].mxu1 %vm4347_vm4, %v4775_v35  ;;  %v5205_v35 = vpack.c.bf16 %v5193_v24, %v5192_v56  ;;  %v12432_v24 = vld [vmem:[%s15353_s3 + $0x1a0] ss:$8 sps:$4 sm:$0xff]  }
 0x7a0   : > { %4930 = vmatprep.mubr.bf16.mxu1 %v12709_v39 }
 0x7a7   : > { %9303 = vmatmul.mubr.msk.bf16.gmra.mrb[172].mxu1 %vm4347_vm4, %v4776_v29  ;;  %v12422_v29 = vld [vmem:[%s15353_s3 + $0x164] ss:$8 sps:$4 sm:$0xff]  }
 0x7a8   : > { %4940 = vmatprep.mubr.bf16.mxu1 %v12709_v39 }
 0x7af   : > { %9304 = vmatmul.mubr.msk.bf16.gmra.mrb[176].mxu1 %vm4347_vm4, %v4777_v48  ;;  %v5194_v48 = vld [vmem:[#allocation3 + $0x18] sm:$0xff] }
 0x7b0   : > { %5097 = vmatprep.mubr.bf16.mxu1 %v12709_v39  ;;  %v5206_v13 = vpack.c.bf16 %v5195_v9, %v5194_v48  ;;  %v5416_v48 = vld [vmem:[#allocation3 + $0x41] sm:$0xff] }
 0x7b7   : > { %9321 = vmatmul.mubr.msk.bf16.vlgmr.msra.gmra.mrb[152].mxu1 %vm4347_vm4, %v4988_v37  ;;  %v12423_v37 = vld [vmem:[%s15353_s3 + $0x170] ss:$8 sps:$4 sm:$0xff]  }
 0x7b8   : > { %5107 = vmatprep.mubr.bf16.mxu1 %v12709_v39  ;;  %5283 = vmatpush1.bf16.msra.mxu1 %v12402_v32  ;;  %v12425_v32 = vld [vmem:[%s15353_s3 + $0x174] ss:$8 sps:$4 sm:$0xff]  }
 0x7b9   : > { %5284 = vmatprep.subr.bf16.mxu1 %v12407_v41  ;;  %v12428_v41 = vld [vmem:[%s15353_s3 + $0x184] ss:$8 sps:$4 sm:$0xff]  }
 0x7bc   : > { %5285 = vmatpush1.bf16.msra.mxu1 %v12405_v31  ;;  %v5197_v31 = vld [vmem:[#allocation3 + $0x30] sm:$0xff] }
 0x7bd   : > { %5286 = vmatprep.subr.bf16.mxu1 %v12410_v40  ;;  %v5196_v40 = vld [vmem:[#allocation3 + $0x28] sm:$0xff] }
 0x7be   : > { %v5207_v47 = vpack.c.bf16 %v5197_v31, %v5196_v40  ;;  %v5420_v31 = vld [vmem:[#allocation3 + $0x61] sm:$0xff]  ;;  %v5419_v40 = vld [vmem:[#allocation3 + $0x59] sm:$0xff] }
 0x7bf   : > { %9322 = vmatmul.mubr.msk.bf16.gmra.mrb[156].mxu1 %vm4347_vm4, %v4989_v17 }
 0x7c0   : > { %5117 = vmatprep.mubr.bf16.mxu1 %v12709_v39  ;;  %5287 = vmatpush1.bf16.msra.mxu1 %v12408_v8  ;;  %v5198_v8 = vld [vmem:[#allocation3 + $0x38] sm:$0xff] }
 0x7c1   : > { %5288 = vmatprep.subr.bf16.mxu1 %v12413_v50  ;;  %v5208_v17 = vpack.c.bf16 %v5199_v44, %v5198_v8  ;;  %v5201_v50 = vld [vmem:[#allocation3 + $0x50] sm:$0xff]  ;;  %v5421_v44 = vld [vmem:[#allocation3 + $0x69] sm:$0x7] }
 0x7c2   : > { %v5428_v8 = vpack.c.bf16 %v5421_v44, %v5421_v44  ;;  %v5846_v44 = vld [vmem:[#allocation3 + $0x23] sm:$0xff] }
 0x7c4   : > { %5289 = vmatpush1.bf16.msra.mxu1 %v12411_v55  ;;  %v5200_v55 = vld [vmem:[#allocation3 + $0x48] sm:$0xff] }
 0x7c5   : > { %5499 = vmatprep.subr.bf16.mxu1 %v12416_v49  ;;  %v5209_v49 = vpack.c.bf16 %v5201_v50, %v5200_v55  ;;  %v5626_v50 = vld [vmem:[#allocation3 + $0xa] sm:$0xff] }
 0x7c6   : > { %v12438_v55 = vld [vmem:[%s15353_s3 + $0x1c0] ss:$8 sps:$4 sm:$0xff]  }
 0x7c7   : > { %9323 = vmatmul.mubr.msk.bf16.gmra.mrb[160].mxu1 %vm4347_vm4, %v4990_v38  ;;  %v5210_v38 = vpack.c.bf16 %v5203_v60, %v5202_v6  ;;  %v12443_v60 = vld [vmem:[%s15353_s3 + $0x1d4] ss:$8 sps:$4 sm:$0xff]   ;;  %v12441_v6 = vld [vmem:[%s15353_s3 + $0x1d0] ss:$8 sps:$4 sm:$0xff]  }
 0x7c8   : > { %5127 = vmatprep.mubr.bf16.mxu1 %v12709_v39 }
 0x7cf   : > { %9324 = vmatmul.mubr.msk.bf16.gmra.mrb[164].mxu1 %vm4347_vm4, %v4991_v45  ;;  %v5410_v45 = vld [vmem:[#allocation3 + $0x11] sm:$0xff] }
 0x7d0   : > { %5137 = vmatprep.mubr.bf16.mxu1 %v12709_v39 }
 0x7d7   : > { %9325 = vmatmul.mubr.msk.bf16.gmra.mrb[168].mxu1 %vm4347_vm4, %v4992_v52  ;;  %v5422_v52 = vpack.c.bf16 %v5410_v45, %v5409_v4  ;;  %v12444_v45 = vld [vmem:[%s15353_s3 + $0x1e0] ss:$8 sps:$4 sm:$0xff]  }
 0x7d8   : > { %5147 = vmatprep.mubr.bf16.mxu1 %v12709_v39 }
 0x7df   : > { %9326 = vmatmul.mubr.msk.bf16.gmra.mrb[172].mxu1 %vm4347_vm4, %v4993_v10  ;;  %v12434_v10 = vld [vmem:[%s15353_s3 + $0x1a4] ss:$8 sps:$4 sm:$0xff]  }
 0x7e0   : > { %5157 = vmatprep.mubr.bf16.mxu1 %v12709_v39 }
 0x7e7   : > { %9327 = vmatmul.mubr.msk.bf16.gmra.mrb[176].mxu1 %vm4347_vm4, %v4994_v22  ;;  %v5411_v22 = vld [vmem:[#allocation3 + $0x19] sm:$0xff] }
 0x7e8   : > { %5314 = vmatprep.mubr.bf16.mxu1 %v12709_v39  ;;  %v5423_v56 = vpack.c.bf16 %v5412_v43, %v5411_v22  ;;  %v5633_v22 = vld [vmem:[#allocation3 + $0x42] sm:$0xff] }
 0x7ef   : > { %9344 = vmatmul.mubr.msk.bf16.vlgmr.msra.gmra.mrb[152].mxu1 %vm4347_vm4, %v5205_v35  ;;  %v12435_v35 = vld [vmem:[%s15353_s3 + $0x1b0] ss:$8 sps:$4 sm:$0xff]  }
 0x7f0   : > { %5324 = vmatprep.mubr.bf16.mxu1 %v12709_v39  ;;  %5500 = vmatpush1.bf16.msra.mxu1 %v12414_v18  ;;  %v12437_v18 = vld [vmem:[%s15353_s3 + $0x1b4] ss:$8 sps:$4 sm:$0xff]  }
 0x7f1   : > { %5501 = vmatprep.subr.bf16.mxu1 %v12419_v23  ;;  %v12440_v23 = vld [vmem:[%s15353_s3 + $0x1c4] ss:$8 sps:$4 sm:$0xff]  }
 0x7f4   : > { %5502 = vmatpush1.bf16.msra.mxu1 %v12417_v30  ;;  %v5414_v30 = vld [vmem:[#allocation3 + $0x31] sm:$0xff] }
 0x7f5   : > { %5503 = vmatprep.subr.bf16.mxu1 %v12422_v29  ;;  %v5413_v29 = vld [vmem:[#allocation3 + $0x29] sm:$0xff] }
 0x7f6   : > { %v5424_v9 = vpack.c.bf16 %v5414_v30, %v5413_v29  ;;  %v5637_v30 = vld [vmem:[#allocation3 + $0x62] sm:$0xff]  ;;  %v5636_v29 = vld [vmem:[#allocation3 + $0x5a] sm:$0xff] }
 0x7f7   : > { %9345 = vmatmul.mubr.msk.bf16.gmra.mrb[156].mxu1 %vm4347_vm4, %v5206_v13 }
 0x7f8   : > { %5334 = vmatprep.mubr.bf16.mxu1 %v12709_v39  ;;  %5504 = vmatpush1.bf16.msra.mxu1 %v12420_v0  ;;  %v5415_v0 = vld [vmem:[#allocation3 + $0x39] sm:$0xff] }
 0x7f9   : > { %5505 = vmatprep.subr.bf16.mxu1 %v12425_v32  ;;  %v5425_v13 = vpack.c.bf16 %v5416_v48, %v5415_v0  ;;  %v5418_v32 = vld [vmem:[#allocation3 + $0x51] sm:$0xff]  ;;  %v5638_v48 = vld [vmem:[#allocation3 + $0x6a] sm:$0x7] }
 0x7fa   : > { %v5645_v0 = vpack.c.bf16 %v5638_v48, %v5638_v48 }
 0x7fc   : > { %5506 = vmatpush1.bf16.msra.mxu1 %v12423_v37  ;;  %v5417_v37 = vld [vmem:[#allocation3 + $0x49] sm:$0xff] }
 0x7fd   : > { %5716 = vmatprep.subr.bf16.mxu1 %v12428_v41  ;;  %v5426_v41 = vpack.c.bf16 %v5418_v32, %v5417_v37  ;;  %v5843_v32 = vld [vmem:[#allocation3 + $0xb] sm:$0xff] }
 0x7fe   : > { %v12450_v37 = vld [vmem:[%s15353_s3 + $0x200] ss:$8 sps:$4 sm:$0xff]  }
 0x7ff   : > { %9346 = vmatmul.mubr.msk.bf16.gmra.mrb[160].mxu1 %vm4347_vm4, %v5207_v47  ;;  %v5427_v47 = vpack.c.bf16 %v5420_v31, %v5419_v40  ;;  %v12455_v31 = vld [vmem:[%s15353_s3 + $0x214] ss:$8 sps:$4 sm:$0xff]   ;;  %v12453_v40 = vld [vmem:[%s15353_s3 + $0x210] ss:$8 sps:$4 sm:$0xff]  }
 0x800   : > { %5344 = vmatprep.mubr.bf16.mxu1 %v12709_v39 }
 0x807   : > { %9347 = vmatmul.mubr.msk.bf16.gmra.mrb[164].mxu1 %vm4347_vm4, %v5208_v17  ;;  %v5627_v17 = vld [vmem:[#allocation3 + $0x12] sm:$0xff] }
 0x808   : > { %5354 = vmatprep.mubr.bf16.mxu1 %v12709_v39 }
 0x80f   : > { %9348 = vmatmul.mubr.msk.bf16.gmra.mrb[168].mxu1 %vm4347_vm4, %v5209_v49  ;;  %v5639_v49 = vpack.c.bf16 %v5627_v17, %v5626_v50  ;;  %v12456_v17 = vld [vmem:[%s15353_s3 + $0x220] ss:$8 sps:$4 sm:$0xff]  }
 0x810   : > { %5364 = vmatprep.mubr.bf16.mxu1 %v12709_v39 }
 0x817   : > { %9349 = vmatmul.mubr.msk.bf16.gmra.mrb[172].mxu1 %vm4347_vm4, %v5210_v38  ;;  %v12446_v38 = vld [vmem:[%s15353_s3 + $0x1e4] ss:$8 sps:$4 sm:$0xff]  }
 0x818   : > { %5374 = vmatprep.mubr.bf16.mxu1 %v12709_v39 }
 0x81f   : > { %9350 = vmatmul.mubr.msk.bf16.gmra.mrb[176].mxu1 %vm4347_vm4, %v5211_v58  ;;  %v5628_v58 = vld [vmem:[#allocation3 + $0x1a] sm:$0xff] }
 0x820   : > { %5531 = vmatprep.mubr.bf16.mxu1 %v12709_v39  ;;  %v5640_v4 = vpack.c.bf16 %v5629_v5, %v5628_v58  ;;  %v5850_v58 = vld [vmem:[#allocation3 + $0x43] sm:$0xff] }
 0x827   : > { %9367 = vmatmul.mubr.msk.bf16.vlgmr.msra.gmra.mrb[152].mxu1 %vm4347_vm4, %v5422_v52  ;;  %v12447_v52 = vld [vmem:[%s15353_s3 + $0x1f0] ss:$8 sps:$4 sm:$0xff]  }
 0x828   : > { %5541 = vmatprep.mubr.bf16.mxu1 %v12709_v39  ;;  %5717 = vmatpush1.bf16.msra.mxu1 %v12426_v63  ;;  %v12449_v63 = vld [vmem:[%s15353_s3 + $0x1f4] ss:$8 sps:$4 sm:$0xff]  }
 0x829   : > { %5718 = vmatprep.subr.bf16.mxu1 %v12431_v54  ;;  %v12452_v54 = vld [vmem:[%s15353_s3 + $0x204] ss:$8 sps:$4 sm:$0xff]  }
 0x82c   : > { %5719 = vmatpush1.bf16.msra.mxu1 %v12429_v14  ;;  %v5631_v14 = vld [vmem:[#allocation3 + $0x32] sm:$0xff] }
 0x82d   : > { %5720 = vmatprep.subr.bf16.mxu1 %v12434_v10  ;;  %v5630_v10 = vld [vmem:[#allocation3 + $0x2a] sm:$0xff] }
 0x82e   : > { %v5641_v43 = vpack.c.bf16 %v5631_v14, %v5630_v10  ;;  %v5854_v14 = vld [vmem:[#allocation3 + $0x63] sm:$0xff]  ;;  %v5853_v10 = vld [vmem:[#allocation3 + $0x5b] sm:$0xff] }
 0x82f   : > { %9368 = vmatmul.mubr.msk.bf16.gmra.mrb[156].mxu1 %vm4347_vm4, %v5423_v56 }
 0x830   : > { %5551 = vmatprep.mubr.bf16.mxu1 %v12709_v39  ;;  %5721 = vmatpush1.bf16.msra.mxu1 %v12432_v24  ;;  %v5632_v24 = vld [vmem:[#allocation3 + $0x3a] sm:$0xff] }
 0x831   : > { %5722 = vmatprep.subr.bf16.mxu1 %v12437_v18  ;;  %v5642_v56 = vpack.c.bf16 %v5633_v22, %v5632_v24  ;;  %v5635_v18 = vld [vmem:[#allocation3 + $0x52] sm:$0xff]  ;;  %v5855_v22 = vld [vmem:[#allocation3 + $0x6b] sm:$0x7] }
 0x832   : > { %v5862_v24 = vpack.c.bf16 %v5855_v22, %v5855_v22 }
 0x834   : > { %5723 = vmatpush1.bf16.msra.mxu1 %v12435_v35  ;;  %v5634_v35 = vld [vmem:[#allocation3 + $0x4a] sm:$0xff] }
 0x835   : > { %5933 = vmatprep.subr.bf16.mxu1 %v12440_v23  ;;  %v5643_v23 = vpack.c.bf16 %v5635_v18, %v5634_v35  ;;  %v12467_v18 = vld [vmem:[%s15353_s3 + $0x254] ss:$8 sps:$4 sm:$0xff]   ;;  %v12465_v35 = vld [vmem:[%s15353_s3 + $0x250] ss:$8 sps:$4 sm:$0xff]  }
 0x837   : > { %9369 = vmatmul.mubr.msk.bf16.gmra.mrb[160].mxu1 %vm4347_vm4, %v5424_v9  ;;  %v5644_v9 = vpack.c.bf16 %v5637_v30, %v5636_v29  ;;  %v12468_v30 = vld [vmem:[%s15353_s3 + $0x260] ss:$8 sps:$4 sm:$0xff]  }
 0x838   : > { %5561 = vmatprep.mubr.bf16.mxu1 %v12709_v39 }
 0x83f   : > { %9370 = vmatmul.mubr.msk.bf16.gmra.mrb[164].mxu1 %vm4347_vm4, %v5425_v13  ;;  %v5844_v13 = vld [vmem:[#allocation3 + $0x13] sm:$0xff] }
 0x840   : > { %5571 = vmatprep.mubr.bf16.mxu1 %v12709_v39 }
 0x847   : > { %9371 = vmatmul.mubr.msk.bf16.gmra.mrb[168].mxu1 %vm4347_vm4, %v5426_v41  ;;  %v5856_v41 = vpack.c.bf16 %v5844_v13, %v5843_v32  ;;  %v14645_v13 = vld [vmem:[#allocation4] sm:$0xff] }
 0x848   : > { %5581 = vmatprep.mubr.bf16.mxu1 %v12709_v39 }
 0x84f   : > { %9372 = vmatmul.mubr.msk.bf16.gmra.mrb[172].mxu1 %vm4347_vm4, %v5427_v47  ;;  %v12458_v47 = vld [vmem:[%s15353_s3 + $0x224] ss:$8 sps:$4 sm:$0xff]  }
 0x850   : > { %5591 = vmatprep.mubr.bf16.mxu1 %v12709_v39 }
 0x857   : > { %9373 = vmatmul.mubr.msk.bf16.gmra.mrb[176].mxu1 %vm4347_vm4, %v5428_v8  ;;  %v5845_v8 = vld [vmem:[#allocation3 + $0x1b] sm:$0xff] }
 0x858   : > { %5748 = vmatprep.mubr.bf16.mxu1 %v12709_v39  ;;  %v5857_v50 = vpack.c.bf16 %v5846_v44, %v5845_v8 }
 0x85f   : > { %9390 = vmatmul.mubr.msk.bf16.vlgmr.msra.gmra.mrb[152].mxu1 %vm4347_vm4, %v5639_v49  ;;  %v12459_v49 = vld [vmem:[%s15353_s3 + $0x230] ss:$8 sps:$4 sm:$0xff]  }
 0x860   : > { %5758 = vmatprep.mubr.bf16.mxu1 %v12709_v39  ;;  %5934 = vmatpush1.bf16.msra.mxu1 %v12438_v55  ;;  %v12461_v55 = vld [vmem:[%s15353_s3 + $0x234] ss:$8 sps:$4 sm:$0xff]  }
 0x861   : > { %5935 = vmatprep.subr.bf16.mxu1 %v12443_v60  ;;  %v12464_v60 = vld [vmem:[%s15353_s3 + $0x244] ss:$8 sps:$4 sm:$0xff]  }
 0x864   : > { %5936 = vmatpush1.bf16.msra.mxu1 %v12441_v6  ;;  %v5848_v6 = vld [vmem:[#allocation3 + $0x33] sm:$0xff] }
 0x865   : > { %5937 = vmatprep.subr.bf16.mxu1 %v12446_v38  ;;  %v5847_v38 = vld [vmem:[#allocation3 + $0x2b] sm:$0xff] }
 0x866   : > { %v5858_v5 = vpack.c.bf16 %v5848_v6, %v5847_v38 }
 0x867   : > { %9391 = vmatmul.mubr.msk.bf16.gmra.mrb[156].mxu1 %vm4347_vm4, %v5640_v4 }
 0x868   : > { %5768 = vmatprep.mubr.bf16.mxu1 %v12709_v39  ;;  %5938 = vmatpush1.bf16.msra.mxu1 %v12444_v45  ;;  %v5849_v45 = vld [vmem:[#allocation3 + $0x3b] sm:$0xff] }
 0x869   : > { %5939 = vmatprep.subr.bf16.mxu1 %v12449_v63  ;;  %v5859_v4 = vpack.c.bf16 %v5850_v58, %v5849_v45  ;;  %v5852_v63 = vld [vmem:[#allocation3 + $0x53] sm:$0xff] }
 0x86c   : > { %5940 = vmatpush1.bf16.msra.mxu1 %v12447_v52  ;;  %v5851_v52 = vld [vmem:[#allocation3 + $0x4b] sm:$0xff] }
 0x86d   : > { %6150 = vmatprep.subr.bf16.mxu1 %v12452_v54  ;;  %v5860_v54 = vpack.c.bf16 %v5852_v63, %v5851_v52 }
 0x86f   : > { %9392 = vmatmul.mubr.msk.bf16.gmra.mrb[160].mxu1 %vm4347_vm4, %v5641_v43  ;;  %v5861_v43 = vpack.c.bf16 %v5854_v14, %v5853_v10 }
 0x870   : > { %5778 = vmatprep.mubr.bf16.mxu1 %v12709_v39 }
 0x877   : > { %9393 = vmatmul.mubr.msk.bf16.gmra.mrb[164].mxu1 %vm4347_vm4, %v5642_v56  ;;  %v12462_v56 = vld [vmem:[%s15353_s3 + $0x240] ss:$8 sps:$4 sm:$0xff]  }
 0x878   : > { %5788 = vmatprep.mubr.bf16.mxu1 %v12709_v39 }
 0x87f   : > { %9394 = vmatmul.mubr.msk.bf16.gmra.mrb[168].mxu1 %vm4347_vm4, %v5643_v23  ;;  %v12470_v23 = vld [vmem:[%s15353_s3 + $0x264] ss:$8 sps:$4 sm:$0xff]  }
 0x880   : > { %5798 = vmatprep.mubr.bf16.mxu1 %v12709_v39 }
 0x887   : > { %9395 = vmatmul.mubr.msk.bf16.gmra.mrb[172].mxu1 %vm4347_vm4, %v5644_v9  ;;  %v6288_v9 = vld [vmem:[#allocation3 + $0x65] sm:$0xff] }
 0x888   : > { %5808 = vmatprep.mubr.bf16.mxu1 %v12709_v39  ;;  %v6295_v48 = vpack.c.bf16 %v6288_v9, %v14289_v62  ;;  %v12485_v9 = vld [vmem:[%s15355_s5 + $0xa8] sm:$0xff]  }
 0x88f   : > { %9396 = vmatmul.mubr.msk.bf16.gmra.mrb[176].mxu1 %vm4347_vm4, %v5645_v0  ;;  %v6289_v0 = vld [vmem:[#allocation3 + $0x6d] sm:$0x7] }
 0x890   : > { %5965 = vmatprep.mubr.bf16.mxu1 %v12709_v39 }
 0x897   : > { %9413 = vmatmul.mubr.msk.bf16.vlgmr.msra.gmra.mrb[152].mxu1 %vm4347_vm4, %v5856_v41 }
 0x898   : > { %5975 = vmatprep.mubr.bf16.mxu1 %v12709_v39  ;;  %6151 = vmatpush1.bf16.msra.mxu1 %v12450_v37 }
 0x899   : > { %6152 = vmatprep.subr.bf16.mxu1 %v12455_v31 }
 0x89c   : > { %6153 = vmatpush1.bf16.msra.mxu1 %v12453_v40 }
 0x89d   : > { %6154 = vmatprep.subr.bf16.mxu1 %v12458_v47 }
 0x89f   : > { %9414 = vmatmul.mubr.msk.bf16.gmra.mrb[156].mxu1 %vm4347_vm4, %v5857_v50 }
 0x8a0   : > { %5985 = vmatprep.mubr.bf16.mxu1 %v12709_v39  ;;  %6155 = vmatpush1.bf16.msra.mxu1 %v12456_v17 }
 0x8a1   : > { %6156 = vmatprep.subr.bf16.mxu1 %v12461_v55 }
 0x8a4   : > { %6157 = vmatpush1.bf16.msra.mxu1 %v12459_v49 }
 0x8a5   : > { %6367 = vmatprep.subr.bf16.mxu1 %v12464_v60 }
 0x8a7   : > { %9415 = vmatmul.mubr.msk.bf16.gmra.mrb[160].mxu1 %vm4347_vm4, %v5858_v5 }
 0x8a8   : > { %5995 = vmatprep.mubr.bf16.mxu1 %v12709_v39 }
 0x8af   : > { %9416 = vmatmul.mubr.msk.bf16.gmra.mrb[164].mxu1 %vm4347_vm4, %v5859_v4 }
 0x8b0   : > { %6005 = vmatprep.mubr.bf16.mxu1 %v12709_v39 }
 0x8b7   : > { %9417 = vmatmul.mubr.msk.bf16.gmra.mrb[168].mxu1 %vm4347_vm4, %v5860_v54 }
 0x8b8   : > { %6015 = vmatprep.mubr.bf16.mxu1 %v12709_v39 }
 0x8bf   : > { %9418 = vmatmul.mubr.msk.bf16.gmra.mrb[172].mxu1 %vm4347_vm4, %v5861_v43 }
 0x8c0   : > { %6025 = vmatprep.mubr.bf16.mxu1 %v12709_v39 }
 0x8c7   : > { %9419 = vmatmul.mubr.msk.bf16.gmra.mrb[176].mxu1 %vm4347_vm4, %v5862_v24 }
 0x8c8   : > { %6182 = vmatprep.mubr.bf16.mxu1 %v12709_v39 }
 0x8cf   : > { %9436 = vmatmul.mubr.msk.bf16.vlgmr.msra.gmra.mrb[152].mxu1 %vm4347_vm4, %v6073_v53  ;;  %v6071_v53 = vld [vmem:[#allocation3 + $0x64] sm:$0xff] }
 0x8d0   : > { %6192 = vmatprep.mubr.bf16.mxu1 %v12709_v39  ;;  %6368 = vmatpush1.bf16.msra.mxu1 %v12462_v56  ;;  %v6078_v33 = vpack.c.bf16 %v6071_v53, %v14340_v36  ;;  %v6283_v36 = vld [vmem:[#allocation3 + $0x3d] sm:$0xff] }
 0x8d1   : > { %6369 = vmatprep.subr.bf16.mxu1 %v12467_v18  ;;  %v6293_v29 = vpack.c.bf16 %v14269_v20, %v6283_v36  ;;  %v6296_v20 = vpack.c.bf16 %v6289_v0, %v6289_v0  ;;  %v6494_v18 = vmul.u32 5, %v13771_v46  ;;  %v12474_v53 = vld [vmem:[%s15355_s5 + $0xc0] sm:$0xff]   ;;  %v12487_v0 = vld [vmem:[%s15355_s5 + $0xb0] sm:$0xff]  }
 0x8d2   : > { %v12483_v36 = vld [vmem:[%s15355_s5 + $0xa0] sm:$0xff]  }
 0x8d3   : > { %vm6497_vm7 = vcmp.eq.s32.totalorder %v13773_v2, %v6494_v18 }
 0x8d4   : > { %6370 = vmatpush1.bf16.msra.mxu1 %v12465_v35 }
 0x8d5   : > { %6371 = vmatprep.subr.bf16.mxu1 %v12470_v23 }
 0x8d7   : > { %9437 = vmatmul.mubr.msk.bf16.gmra.mrb[156].mxu1 %vm4347_vm4, %v6074_v27  ;;  %v6079_v27 = vpack.c.bf16 %v6072_v1, %v6072_v1  ;;  %v14655_v1 = vsel %vm6497_vm7, 1.0, %v14645_v13 }
 0x8d8   : > { %6202 = vmatprep.mubr.bf16.mxu1 %v12709_v39  ;;  %6372 = vmatpush1.bf16.msra.mxu1 %v12468_v30 }
 0x8d9   : > { %6373 = vmatprep.subr.bf16.mxu1 %v12473_v51  ;;  %v6495_v51 = vmul.u32 5, %v13881_v19  ;;  %v6496_v19 = vmul.u32 5, %v13888_v61  ;;  %v12477_v61 = vld [vmem:[%s15355_s5 + $0x88] sm:$0xff]  }
 0x8db   : > { %vm6498_vm10 = vcmp.eq.s32.totalorder %v13773_v2, %v6495_v51  ;;  %vm6499_vm11 = vcmp.eq.s32.totalorder %v13773_v2, %v6496_v19  ;;  %v12480_v2 = vld [vmem:[%s15355_s5 + $0xd8] sm:$0xff]  }
 0x8dc   : > { %6374 = vmatpush1.bf16.msra.mxu1 %v12471_v57 }
 0x8df   : > { %9438 = vmatmul.mubr.msk.bf16.gmra.mrb[160].mxu1 %vm4347_vm4, %v6075_v26  ;;  %v6290_v26 = vpack.c.bf16 %v6278_v16, %v6277_v3  ;;  %v12476_v3 = vld [vmem:[%s15355_s5 + $0xc8] sm:$0xff]  }
 0x8e0   : > { %6212 = vmatprep.mubr.bf16.mxu1 %v12709_v39 }
 0x8e7   : > { %9439 = vmatmul.mubr.msk.bf16.gmra.mrb[164].mxu1 %vm4347_vm4, %v6076_v21  ;;  %v6291_v21 = vpack.c.bf16 %v6280_v11, %v6279_v28  ;;  %v9467_v11 = vsel %vm6498_vm10, 1.0, %v14645_v13  ;;  %v9468_v28 = vsel %vm6499_vm11, 1.0, %v14645_v13 }
 0x8e8   : > { %6222 = vmatprep.mubr.bf16.mxu1 %v12709_v39 }
 0x8ef   : > { %9440 = vmatmul.mubr.msk.bf16.gmra.mrb[168].mxu1 %vm4347_vm4, %v6077_v15  ;;  %v6292_v15 = vpack.c.bf16 %v6282_v12, %v6281_v42  ;;  %v12479_v12 = vld [vmem:[%s15355_s5 + $0x90] sm:$0xff]   ;;  %v12481_v42 = vld [vmem:[%s15355_s5 + $0x98] sm:$0xff]  }
 0x8f0   : > { %6232 = vmatprep.mubr.bf16.mxu1 %v12709_v39 }
 0x8f7   : > { %9441 = vmatmul.mubr.msk.bf16.gmra.mrb[172].mxu1 %vm4347_vm4, %v6078_v33 }
 0x8f8   : > { %6242 = vmatprep.mubr.bf16.mxu1 %v12709_v39 }
 0x8ff   : > { %9442 = vmatmul.mubr.msk.bf16.gmra.mrb[176].mxu1 %vm4347_vm4, %v6079_v27  ;;  %v12475_v27 = vld [vmem:[%s15355_s5 + $0x80] sm:$0xff]  }
 0x900   : > { %6399 = vmatprep.mubr.bf16.mxu1 %v12709_v39 }
 0x907   : > { %9459 = vmatmul.mubr.msk.bf16.vlgmr.msra.gmra.mrb[152].mxu1 %vm4347_vm4, %v6290_v26 }
 0x908   : > { %6409 = vmatprep.mubr.bf16.mxu1 %v12709_v39 }
 0x90f   : > { %9460 = vmatmul.mubr.msk.bf16.gmra.mrb[156].mxu1 %vm4347_vm4, %v6291_v21  ;;  %v12478_v21 = vld [vmem:[%s15355_s5 + $0xd0] sm:$0xff]  }
 0x910   : > { %6419 = vmatprep.mubr.bf16.mxu1 %v12709_v39 }
 0x917   : > { %9461 = vmatmul.mubr.msk.bf16.gmra.mrb[160].mxu1 %vm4347_vm4, %v6292_v15  ;;  %v12482_v15 = vld [vmem:[%s15355_s5 + $0xe0] sm:$0xff]  }
 0x918   : > { %6429 = vmatprep.mubr.bf16.mxu1 %v12709_v39 }
 0x91f   : > { %9462 = vmatmul.mubr.msk.bf16.gmra.mrb[164].mxu1 %vm4347_vm4, %v6293_v29  ;;  %v12484_v29 = vld [vmem:[%s15355_s5 + $0xe8] sm:$0xff]  }
 0x920   : > { %6439 = vmatprep.mubr.bf16.mxu1 %v12709_v39 }
 0x927   : > { %9463 = vmatmul.mubr.msk.bf16.gmra.mrb[168].mxu1 %vm4347_vm4, %v6294_v59 }
 0x928   : > { %6449 = vmatprep.mubr.bf16.mxu1 %v12709_v39 }
 0x92f   : > { %9464 = vmatmul.mubr.msk.bf16.gmra.mrb[172].mxu1 %vm4347_vm4, %v6295_v48  ;;  %v12486_v48 = vld [vmem:[%s15355_s5 + $0xf0] sm:$0xff]  }
 0x930   : > { %6459 = vmatprep.mubr.bf16.mxu1 %v12709_v39 }
 0x937   : > { %9465 = vmatmul.mubr.msk.bf16.gmra.mrb[176].mxu1 %vm4347_vm4, %v6296_v20  ;;  %v12488_v20 = vld [vmem:[%s15355_s5 + $0xf8] sm:$0xff]  }
 0x938   : > { %6599 = vmatprep.mubr.f32.mxu1 %v14645_v13 }
 0x9da   : > { %v6401_v34 = vpop.f32.mrb[152].mxu1 }
 0x9db   : > { %v6403_v25 = vpop.f32.mrb[153].mxu1 }
 0x9dc   : > { %v6405_v59 = vpop.f32.mrb[154].mxu1 }
 0x9dd   : > { %v11379_v32 = vpack.c.bf16 %v6405_v59, %v6401_v34  ;;  %v6407_v37 = vpop.f32.mrb[155].mxu1  ;;  %v12490_v34 = vld [vmem:[%s15355_s5 + $0x40] sm:$0xff]  }
 0x9de   : > { %v11377_v41 = vpack.c.bf16 %v6407_v37, %v6403_v25  ;;  %v6510_v25 = vsub.s32 0, %v13771_v46  ;;  %v6506_v59 = vld [vmem:[%s15354_s4] sm:$0x3] }
 0x9e0   : > { %11378 = vmatprep.subr.bf16.mxu1 %v11377_v41  ;;  %v6511_v37 = vrot.slane %v6506_v59, %v6510_v25 }
 0x9e1   : > { %11380 = vmatpush1.bf16.msra.mxu1 %v11379_v32  ;;  %v6514_v32 = vsub.s32 1, %v13771_v46 }
 0x9e2   : > { %v6411_v62 = vpop.f32.mrb[156].mxu1 }
 0x9e3   : > { %v6413_v31 = vpop.f32.mrb[157].mxu1  ;;  %v6515_v41 = vrot.slane %v6506_v59, %v6514_v32 }
 0x9e4   : > { %v6415_v40 = vpop.f32.mrb[158].mxu1 }
 0x9e5   : > { %v11383_v39 = vpack.c.bf16 %v6415_v40, %v6411_v62  ;;  %v6417_v47 = vpop.f32.mrb[159].mxu1 }
 0x9e6   : > { %v11381_v44 = vpack.c.bf16 %v6417_v47, %v6413_v31  ;;  %v6682_v47 = vld [vmem:[#allocation4] sm:$0xe0] }
 0x9e8   : > { %11382 = vmatprep.subr.bf16.mxu1 %v11381_v44 }
 0x9e9   : > { %11384 = vmatpush1.bf16.msra.mxu1 %v11383_v39 }
 0x9ea   : > { %v6421_v8 = vpop.f32.mrb[160].mxu1 }
 0x9eb   : > { %v6423_v17 = vpop.f32.mrb[161].mxu1 }
 0x9ec   : > { %v6425_v50 = vpop.f32.mrb[162].mxu1 }
 0x9ed   : > { %v11387_v55 = vpack.c.bf16 %v6425_v50, %v6421_v8  ;;  %v6427_v49 = vpop.f32.mrb[163].mxu1  ;;  %v6683_v8 = vld [vmem:[#allocation4 + $0x8] sm:$0xe0] }
 0x9ee   : > { %v11385_v60 = vpack.c.bf16 %v6427_v49, %v6423_v17 }
 0x9f0   : > { %11386 = vmatprep.subr.bf16.mxu1 %v11385_v60 }
 0x9f1   : > { %11388 = vmatpush1.bf16.msra.mxu1 %v11387_v55 }
 0x9f2   : > { %v6431_v6 = vpop.f32.mrb[164].mxu1 }
 0x9f3   : > { %v6433_v38 = vpop.f32.mrb[165].mxu1 }
 0x9f4   : > { %v6435_v5 = vpop.f32.mrb[166].mxu1 }
 0x9f5   : > { %v11391_v58 = vpack.c.bf16 %v6435_v5, %v6431_v6  ;;  %v6437_v45 = vpop.f32.mrb[167].mxu1 }
 0x9f6   : > { %v11389_v4 = vpack.c.bf16 %v6437_v45, %v6433_v38  ;;  %v14731_v38 = vld [vmem:[#allocation4] sm:$0xc0] }
 0x9f8   : > { %11390 = vmatprep.subr.bf16.mxu1 %v11389_v4 }
 0x9f9   : > { %11392 = vmatpush1.bf16.msra.mxu1 %v11391_v58 }
 0x9fa   : > { %v6441_v63 = vpop.f32.mrb[168].mxu1 }
 0x9fb   : > { %v6443_v52 = vpop.f32.mrb[169].mxu1 }
 0x9fc   : > { %v6445_v54 = vpop.f32.mrb[170].mxu1 }
 0x9fd   : > { %v11395_v14 = vpack.c.bf16 %v6445_v54, %v6441_v63  ;;  %v6447_v10 = vpop.f32.mrb[171].mxu1 }
 0x9fe   : > { %v11393_v43 = vpack.c.bf16 %v6447_v10, %v6443_v52 }
 0xa00   : > { %11394 = vmatprep.subr.bf16.mxu1 %v11393_v43 }
 0xa01   : > { %11396 = vmatpush1.bf16.msra.mxu1 %v11395_v14 }
 0xa02   : > { %v6451_v22 = vpop.f32.mrb[172].mxu1 }
 0xa03   : > { %v6453_v24 = vpop.f32.mrb[173].mxu1 }
 0xa04   : > { %v6455_v56 = vpop.f32.mrb[174].mxu1 }
 0xa05   : > { %v11399_v35 = vpack.c.bf16 %v6455_v56, %v6451_v22  ;;  %v6457_v23 = vpop.f32.mrb[175].mxu1 }
 0xa06   : > { %v11397_v30 = vpack.c.bf16 %v6457_v23, %v6453_v24  ;;  %v6641_v23 = vld [vmem:[#allocation4 + $0x8] sm:$0xf0] }
 0xa08   : > { %11398 = vmatprep.subr.bf16.mxu1 %v11397_v30  ;;  %v7066_v30 = vld [vmem:[#allocation4 + $0x8] sm:$0xc0] }
 0xa09   : > { %11400 = vmatpush1.bf16.msra.mxu1 %v11399_v35 }
 0xa0a   : > { %v6461_v57 = vpop.f32.mrb[176].mxu1 }
 0xa0b   : > { %v6463_v33 = vpop.f32.mrb[177].mxu1 }
 0xa0c   : > { %v6465_v16 = vpop.f32.mrb[178].mxu1  ;;  %9469 = vmatprep.subr.msk.mxu1 %vm6528_vm8, %v6463_v33 }
 0xa0d   : > { %v6466_v26 = vpop.f32.mrb[179].mxu1  ;;  %9470 = vmatpush1.msk.msra.mxu1 %vm6528_vm8, %v6461_v57 }
 0xa0e   : > { %9471 = vmatmul.mubr.msk.f32.vlgmr.msra.gmra.mrb[180].mxu1 %vm6518_vm9, %v14655_v1  ;;  %10208 = vmatprep.subr.bf16.mxu1 %v12474_v53 }
 0xa0f   : > { %6605 = vmatprep.mubr.f32.mxu1 %v14645_v13  ;;  %10209 = vmatpush3.bf16.msra.mxu1 %v12475_v27  ;;  %v7273_v27 = vld [vmem:[#allocation4 + $0x8] sm:$0x80] }
 0xa10   : > { %10210 = vmatprep.subr.bf16.mxu1 %v12476_v3 }
 0xa12   : > { %9472 = vmatmul.mubr.msk.f32.gmra.mrb[182].mxu1 %vm6518_vm9, %v9467_v11 }
 0xa13   : > { %6611 = vmatprep.mubr.f32.mxu1 %v14645_v13  ;;  %10211 = vmatpush3.bf16.msra.mxu1 %v12477_v61  ;;  %v12489_v13 = vld [vmem:[%s15355_s5 + $0xb8] sm:$0xff]  }
 0xa14   : > { %10212 = vmatprep.subr.bf16.mxu1 %v12478_v21 }
 0xa16   : > { %9473 = vmatmul.mubr.msk.f32.gmra.mrb[184].mxu1 %vm6518_vm9, %v9468_v28 }
 0xa17   : > { %10213 = vmatpush3.bf16.msra.mxu1 %v12479_v12 }
 0xa18   : > { %10214 = vmatprep.subr.bf16.mxu1 %v12480_v2 }
 0xa1b   : > { %10215 = vmatpush3.bf16.msra.mxu1 %v12481_v42 }
 0xa1c   : > { %10216 = vmatprep.subr.bf16.mxu1 %v12482_v15 }
 0xa1f   : > { %10217 = vmatpush3.bf16.msra.mxu1 %v12483_v36 }
 0xa20   : > { %10218 = vmatprep.subr.bf16.mxu1 %v12484_v29  ;;  %v7272_v29 = vld [vmem:[#allocation4] sm:$0x80] }
 0xa23   : > { %10219 = vmatpush3.bf16.msra.mxu1 %v12485_v9 }
 0xa24   : > { %10220 = vmatprep.subr.bf16.mxu1 %v12486_v48 }
 0xa27   : > { %10221 = vmatpush3.bf16.msra.mxu1 %v12487_v0 }
 0xa28   : > { %10222 = vmatprep.subr.bf16.mxu1 %v12488_v20 }
 0xa2b   : > { %10223 = vmatpush3.bf16.msra.mxu1 %v12489_v13 }
 0xa2c   : > { %10236 = vmatprep.subr.bf16.mxu1 %v12490_v34 }
 0xae1   : > { %v6601_v62 = vpop.f32.mrb[180].mxu1 }
 0xae2   : > { %v6602_v31 = vadd.f32 %v6601_v62, %v6511_v37  ;;  %v6603_v40 = vpop.f32.mrb[181].mxu1 }
 0xae3   : > { %v6604_v39 = vadd.f32 %v6603_v40, %v6515_v41 }
 0xae4   : > { %v14723_v44 = vmax.f32 %v6602_v31, 0.0 }
 0xae5   : > { %v14725_v17 = vmax.f32 %v6604_v39, 0.0  ;;  %v6607_v50 = vpop.f32.mrb[182].mxu1  ;;  %v12492_v39 = vld [vmem:[%s15355_s5 + $0x48] sm:$0xff]  }
 0xae6   : > { %6634 = vst [vmem:[#allocation4 + $0x10] sm:$0xff] %v14723_v44  ;;  %v6608_v55 = vadd.f32 %v6607_v50, %v6511_v37  ;;  %v6609_v49 = vpop.f32.mrb[183].mxu1  ;;  %v6686_v60 = vpack.c.bf16 %v14723_v44, %v6682_v47  ;;  %v7073_v22 = vpack.c.bf16 %v14723_v44, %v14731_v38  ;;  %v7276_v31 = vpack.c.bf16 %v14723_v44, %v7272_v29 }
 0xae7   : > { %6635 = vst [vmem:[#allocation4 + $0x18] sm:$0xff] %v14725_v17  ;;  %v6610_v46 = vadd.f32 %v6609_v49, %v6515_v41  ;;  %v6687_v6 = vpack.c.bf16 %v14725_v17, %v6683_v8  ;;  %v6647_v12 = vpack.c.bf16 %v14725_v17, %v6641_v23  ;;  %v7074_v15 = vpack.c.bf16 %v14725_v17, %v7066_v30  ;;  %v12493_v49 = vld [vmem:[%s15355_s5 + $0x8] sm:$0xff]  }
 0xae8   : > { %v14733_v5 = vmax.f32 %v6608_v55, 0.0  ;;  %v6725_v58 = vshrl.u32 %v6686_v60, 16  ;;  %v6728_v45 = vshll.u32 %v6686_v60, 16  ;;  %v7277_v36 = vpack.c.bf16 %v14725_v17, %v7273_v27 }
 0xae9   : > { %v14735_v4 = vmax.f32 %v6610_v46, 0.0  ;;  %v6613_v63 = vpop.f32.mrb[184].mxu1  ;;  %v6742_v52 = vshrl.u32 %v6687_v6, 16  ;;  %v6745_v54 = vshll.u32 %v6687_v6, 16  ;;  %v6914_v47 = vrot.slane %v6647_v12, 2 }
 0xaea   : > { %6636 = vst [vmem:[#allocation4 + $0x20] sm:$0xff] %v14733_v5  ;;  %v6614_v14 = vadd.f32 %v6613_v63, %v6511_v37  ;;  %v6615_v10 = vpop.f32.mrb[185].mxu1  ;;  %v6688_v43 = vpack.c.bf16 %v14733_v5, %v14733_v5  ;;  %v6727_v18 = vrot.slane %v6725_v58, 2  ;;  %v6730_v35 = vrot.slane %v6728_v45, 3  ;;  %v12491_v37 = vld [vmem:[%s15355_s5] sm:$0xff]  }
 0xaeb   : > { %6637 = vst [vmem:[#allocation4 + $0x28] sm:$0xff] %v14735_v4  ;;  %v6616_v24 = vadd.f32 %v6615_v10, %v6515_v41  ;;  %v6689_v56 = vpack.c.bf16 %v14735_v4, %v14735_v4  ;;  %v6744_v57 = vrot.slane %v6742_v52, 2  ;;  %v6747_v19 = vrot.slane %v6745_v54, 3 }
 0xaec   : > { %v6622_v51 = vmax.f32 %v6614_v14, 0.0  ;;  %v6733_v53 = vshrl.u32 %v6688_v43, 16  ;;  %v6736_v33 = vshll.u32 %v6688_v43, 16  ;;  %v6731_v0 = vor.u32 %v6730_v35, %v6727_v18 }
 0xaed   : > { %v6623_v16 = vmax.f32 %v6616_v24, 0.0  ;;  %v6750_v3 = vshrl.u32 %v6689_v56, 16  ;;  %v6753_v26 = vshll.u32 %v6689_v56, 16  ;;  %v8540_v11 = vld [vmem:[#allocation4 + $0x10] sm:$0xe0]  ;;  %v6748_v13 = vor.u32 %v6747_v19, %v6744_v57 }
 0xaee   : > { %6638 = vst [vmem:[#allocation4 + $0x30] sm:$0xf] %v6622_v51  ;;  %v8544_v61 = vpack.c.bf16 %v14733_v5, %v8540_v11  ;;  %v6735_v28 = vrot.slane %v6733_v53, 2  ;;  %v6738_v21 = vrot.slane %v6736_v33, 3  ;;  %v7332_v25 = vshrl.u32 %v7277_v36, 16 }
 0xaef   : > { %6639 = vst [vmem:[#allocation4 + $0x38] sm:$0xf] %v6623_v16  ;;  %v6752_v2 = vrot.slane %v6750_v3, 2  ;;  %v6755_v42 = vrot.slane %v6753_v26, 3  ;;  %v7502_v59 = vpack.c.bf16 %v14735_v4, %v14725_v17  ;;  %v7335_v62 = vshll.u32 %v7277_v36, 16  ;;  %v12548_v17 = vld [vmem:[%s15355_s5 + $0x268] sm:$0xff]  }
 0xaf0   : > { %v8582_v9 = vshrl.u32 %v8544_v61, 16  ;;  %v8585_v48 = vshll.u32 %v8544_v61, 16  ;;  %v14749_v20 = vor.u32 %v6738_v21, %v6735_v28  ;;  %v7118_v8 = vrot.slane %v7074_v15, 3  ;;  %v12495_v61 = vld [vmem:[%s15355_s5 + $0x10] sm:$0xff]   ;;  %v12496_v21 = vld [vmem:[%s15355_s5 + $0x58] sm:$0xff]  }
 0xaf1   : > { %v6756_v34 = vor.u32 %v6755_v42, %v6752_v2  ;;  %v7115_v46 = vrot.slane %v7073_v22, 3  ;;  %v7334_v58 = vrot.slane %v7332_v25, 3  ;;  %v7501_v63 = vpack.c.bf16 %v14733_v5, %v14723_v44  ;;  %v12494_v22 = vld [vmem:[%s15355_s5 + $0x50] sm:$0xff]  }
 0xaf2   : > { %v6740_v32 = vsel %vm6723_vm12, %v6731_v0, %v14749_v20  ;;  %v6645_v41 = vld [vmem:[#allocation4 + $0x28] sm:$0x7f]  ;;  %v8584_v50 = vrot.slane %v8582_v9, 2  ;;  %v8587_v55 = vrot.slane %v8585_v48, 3  ;;  %v7337_v43 = vrot.slane %v7335_v62, 4 }
 0xaf3   : > { %v6757_v40 = vsel %vm6723_vm12, %v6748_v13, %v6756_v34  ;;  %v6649_v60 = vpack.c.bf16 %v6645_v41, %v6645_v41  ;;  %v7315_v24 = vshrl.u32 %v7276_v31, 16  ;;  %v7318_v23 = vshll.u32 %v7276_v31, 16 }
 0xaf4   : > { %6890 = vmatprep.mubr.bf16.mxu1 %v6757_v40  ;;  %v8588_v3 = vor.u32 %v8587_v55, %v8584_v50  ;;  %v7338_v13 = vor.u32 %v7337_v43, %v7334_v58  ;;  %v12499_v40 = vld [vmem:[%s15355_s5 + $0x20] sm:$0xff]   ;;  %v12502_v50 = vld [vmem:[%s15355_s5 + $0x70] sm:$0xff]  }
 0xaf5   : > { %v8542_v6 = vld [vmem:[#allocation4 + $0x30] sm:$0xff]  ;;  %6891 = vmatmul.mubr.bf16.vlgmr.msra.gmra.mrb[188].mxu1 %v6740_v32  ;;  %v14775_v57 = vrot.slane %v6649_v60, 2  ;;  %v7317_v15 = vrot.slane %v7315_v24, 3  ;;  %v7320_v29 = vrot.slane %v7318_v23, 4  ;;  %v12497_v32 = vld [vmem:[%s15355_s5 + $0x18] sm:$0xff]  }
 0xaf6   : > { %v7071_v38 = vld [vmem:[#allocation4 + $0x30] sm:$0x1]  ;;  %v8546_v52 = vpack.c.bf16 %v8542_v6, %v8542_v6  ;;  %10237 = vmatpush3.bf16.msra.mxu1 %v12491_v37  ;;  %6898 = vmatprep.mubr.bf16.mxu1 %v6756_v34  ;;  %v7072_v54 = vld [vmem:[#allocation4 + $0x38] sm:$0x1]  ;;  %v8339_v55 = vld [vmem:[#allocation4 + $0x18] sm:$0xf0] }
 0xaf7   : > { %v7274_v45 = vld [vmem:[#allocation4 + $0x30] sm:$0x3]  ;;  %v7075_v14 = vpack.c.bf16 %v7071_v38, %v14733_v5  ;;  %v7275_v10 = vld [vmem:[#allocation4 + $0x38] sm:$0x3]  ;;  %10238 = vmatprep.subr.bf16.mxu1 %v12492_v39  ;;  %v7076_v56 = vpack.c.bf16 %v7072_v54, %v14735_v4  ;;  %v6916_v0 = vsel %vm6910_vm13, %v6914_v47, %v14775_v57  ;;  %v7321_v62 = vor.u32 %v7320_v29, %v7317_v15  ;;  %v6644_v60 = vld [vmem:[#allocation4 + $0x20] sm:$0x7f] }
 0xaf8   : > { %v7279_v18 = vpack.c.bf16 %v7275_v10, %v14735_v4  ;;  %v7278_v35 = vpack.c.bf16 %v7274_v45, %v14733_v5  ;;  %v8590_v30 = vshrl.u32 %v8546_v52, 16  ;;  %v8593_v51 = vshll.u32 %v8546_v52, 16  ;;  %v12500_v47 = vld [vmem:[%s15355_s5 + $0x68] sm:$0xff]   ;;  %v12503_v38 = vld [vmem:[%s15355_s5 + $0x30] sm:$0xff]   ;;  %v12504_v45 = vld [vmem:[%s15355_s5 + $0x78] sm:$0xff]  }
 0xaf9   : > { %v14777_v53 = vrot.slane %v7075_v14, 3  ;;  %v14779_v33 = vrot.slane %v7076_v56, 3  ;;  %v8340_v6 = vld [vmem:[#allocation4 + $0x30] sm:$0x7f]  ;;  %v8541_v58 = vld [vmem:[#allocation4 + $0x18] sm:$0xe0]  ;;  %v8343_v54 = vpack.c.bf16 %v14735_v4, %v8339_v55  ;;  %v6648_v43 = vpack.c.bf16 %v6644_v60, %v6644_v60 }
 0xafa   : > { %v7340_v27 = vshrl.u32 %v7279_v18, 16  ;;  %v7343_v16 = vshll.u32 %v7279_v18, 16  ;;  %v7323_v19 = vshrl.u32 %v7278_v35, 16  ;;  %v8592_v26 = vrot.slane %v8590_v30, 2  ;;  %10239 = vmatpush3.bf16.msra.mxu1 %v12493_v49  ;;  %v8341_v49 = vld [vmem:[#allocation4 + $0x38] sm:$0x7f] }
 0xafb   : > { %v8595_v11 = vrot.slane %v8593_v51, 3  ;;  %v14786_v28 = vsel %vm7114_vm14, %v7115_v46, %v14777_v53  ;;  %10240 = vmatprep.subr.bf16.mxu1 %v12494_v22  ;;  %v14793_v12 = vsel %vm7114_vm14, %v7118_v8, %v14779_v33  ;;  %v7326_v48 = vshll.u32 %v7278_v35, 16  ;;  %v12501_v8 = vld [vmem:[%s15355_s5 + $0x28] sm:$0xff]   ;;  %v6640_v52 = vld [vmem:[#allocation4] sm:$0xf0]  ;;  %v8543_v10 = vld [vmem:[#allocation4 + $0x38] sm:$0xff] }
 0xafc   : > { %v7342_v2 = vrot.slane %v7340_v27, 3  ;;  %v7345_v42 = vrot.slane %v7343_v16, 4  ;;  %v7325_v9 = vrot.slane %v7323_v19, 3  ;;  %v8338_v46 = vld [vmem:[#allocation4 + $0x10] sm:$0xf0]  ;;  %v8345_v14 = vpack.c.bf16 %v8341_v49, %v8341_v49  ;;  %v12505_v23 = vld [vmem:[%s15355_s5 + $0x38] sm:$0xff]  }
 0xafd   : > { %v14795_v36 = vor.u32 %v8595_v11, %v8592_v26  ;;  %6899 = vmatmul.mubr.bf16.gmra.mrb[192].mxu1 %v14749_v20  ;;  %v7328_v37 = vrot.slane %v7326_v48, 4  ;;  %v12498_v20 = vld [vmem:[%s15355_s5 + $0x60] sm:$0xff]   ;;  %v8342_v24 = vpack.c.bf16 %v14733_v5, %v8338_v46  ;;  %v8344_v22 = vpack.c.bf16 %v8340_v6, %v8340_v6  ;;  %v12513_v55 = vld [vmem:[%s15355_s5 + $0x118] sm:$0xff]   ;;  %v12516_v46 = vld [vmem:[%s15355_s5 + $0x168] sm:$0xff]  }
 0xafe   : > { %v14800_v34 = vor.u32 %v7345_v42, %v7342_v2  ;;  %10241 = vmatpush3.bf16.msra.mxu1 %v12495_v61  ;;  %7049 = vmatprep.mubr.bf16.mxu1 %v6916_v0  ;;  %v8386_v56 = vrot.slane %v8343_v54, 2  ;;  %v14842_v18 = vrot.slane %v8345_v14, 2  ;;  %v8545_v35 = vpack.c.bf16 %v14735_v4, %v8541_v58  ;;  %v12506_v19 = vld [vmem:[%s15355_s5 + $0x140] sm:$0xff]   ;;  %v12518_v6 = vld [vmem:[%s15355_s5 + $0x170] sm:$0xff]   ;;  %v12520_v58 = vld [vmem:[%s15355_s5 + $0x178] sm:$0xff]  }
 0xaff   : > { %v14804_v25 = vsel %vm6723_vm12, %v8588_v3, %v14795_v36  ;;  %10242 = vmatprep.subr.bf16.mxu1 %v12496_v21  ;;  %v14816_v31 = vor.u32 %v7328_v37, %v7325_v9  ;;  %v6646_v30 = vpack.c.bf16 %v14723_v44, %v6640_v52  ;;  %v8383_v51 = vrot.slane %v8342_v24, 2  ;;  %v12507_v48 = vld [vmem:[%s15355_s5 + $0x100] sm:$0xff]   ;;  %v12524_v14 = vld [vmem:[%s15355_s5 + $0x1c8] sm:$0xff]   ;;  %v12527_v24 = vld [vmem:[%s15355_s5 + $0x190] sm:$0xff]  }
 0xb00   : > { %v14814_v41 = vsel %vm7313_vm15, %v7338_v13, %v14800_v34  ;;  %v14849_v27 = vrot.slane %v8344_v22, 2  ;;  %v8547_v16 = vpack.c.bf16 %v8543_v10, %v8543_v10  ;;  %v14856_v3 = vsel %vm6910_vm13, %v8386_v56, %v14842_v18  ;;  %v12514_v49 = vld [vmem:[%s15355_s5 + $0x160] sm:$0xff]   ;;  %v12525_v10 = vld [vmem:[%s15355_s5 + $0x188] sm:$0xff]   ;;  %v12559_v44 = vld [vmem:[%s15355_s5 + $0x290] sm:$0xff]  }
 0xb01   : > { %v14823_v39 = vsel %vm7313_vm15, %v7321_v62, %v14816_v31  ;;  %v8599_v26 = vshrl.u32 %v8545_v35, 16  ;;  %v8602_v11 = vshll.u32 %v8545_v35, 16  ;;  %v6912_v61 = vrot.slane %v6648_v43, 2  ;;  %v12515_v60 = vld [vmem:[%s15355_s5 + $0x120] sm:$0xff]   ;;  %v12526_v43 = vld [vmem:[%s15355_s5 + $0x1d0] sm:$0xff]  }
 0xb02   : > { %10243 = vmatpush3.bf16.msra.mxu1 %v12497_v32  ;;  %v14860_v21 = vsel %vm6910_vm13, %v8383_v51, %v14849_v27  ;;  %v8607_v2 = vshrl.u32 %v8547_v16, 16  ;;  %v8610_v42 = vshll.u32 %v8547_v16, 16  ;;  %v6911_v9 = vrot.slane %v6646_v30, 2  ;;  %v12508_v32 = vld [vmem:[%s15355_s5 + $0x148] sm:$0xff]   ;;  %v12522_v52 = vld [vmem:[%s15355_s5 + $0x1c0] sm:$0xff]   ;;  %v12534_v35 = vld [vmem:[%s15355_s5 + $0x1f0] sm:$0xff]  }
 0xb03   : > { %10244 = vmatprep.subr.bf16.mxu1 %v12498_v20  ;;  %v8601_v15 = vrot.slane %v8599_v26, 2  ;;  %v8604_v29 = vrot.slane %v8602_v11, 3  ;;  %v12523_v54 = vld [vmem:[%s15355_s5 + $0x180] sm:$0xff]   ;;  %v12536_v30 = vld [vmem:[%s15355_s5 + $0x1f8] sm:$0xff]   ;;  %v12540_v26 = vld [vmem:[%s15355_s5 + $0x248] sm:$0xff]  }
 0xb04   : > { %v8609_v0 = vrot.slane %v8607_v2, 2  ;;  %v8612_v13 = vrot.slane %v8610_v42, 3  ;;  %v6913_v37 = vsel %vm6910_vm13, %v6911_v9, %v6912_v61  ;;  %v12530_v22 = vld [vmem:[%s15355_s5 + $0x1e0] sm:$0xff]   ;;  %v12537_v51 = vld [vmem:[%s15355_s5 + $0x1b8] sm:$0xff]   ;;  %v12541_v11 = vld [vmem:[%s15355_s5 + $0x208] sm:$0xff]  }
 0xb05   : > { %v8605_v20 = vor.u32 %v8604_v29, %v8601_v15  ;;  %v12531_v56 = vld [vmem:[%s15355_s5 + $0x1a0] sm:$0xff]   ;;  %v12543_v2 = vld [vmem:[%s15355_s5 + $0x210] sm:$0xff]   ;;  %v12552_v9 = vld [vmem:[%s15355_s5 + $0x278] sm:$0xff]  }
 0xb06   : > { %10245 = vmatpush3.bf16.msra.mxu1 %v12499_v40  ;;  %v14869_v62 = vor.u32 %v8612_v13, %v8609_v0  ;;  %v12509_v40 = vld [vmem:[%s15355_s5 + $0x108] sm:$0xff]   ;;  %v12538_v16 = vld [vmem:[%s15355_s5 + $0x240] sm:$0xff]   ;;  %v12551_v29 = vld [vmem:[%s15355_s5 + $0x230] sm:$0xff]  }
 0xb07   : > { %10246 = vmatprep.subr.bf16.mxu1 %v12500_v47  ;;  %v12546_v42 = vld [vmem:[%s15355_s5 + $0x260] sm:$0xff]   ;;  %v12553_v0 = vld [vmem:[%s15355_s5 + $0x238] sm:$0xff]   ;;  %v7688_v13 = vld [vmem:[#allocation4 + $0x38] sm:$0xf] }
 0xb08   : > { %v14877_v47 = vsel %vm6723_vm12, %v8605_v20, %v14869_v62  ;;  %v12547_v15 = vld [vmem:[%s15355_s5 + $0x220] sm:$0xff]   ;;  %v7500_v20 = vld [vmem:[#allocation4 + $0x38] sm:$0x7] }
 0xb0a   : > { %10247 = vmatpush3.bf16.msra.mxu1 %v12501_v8  ;;  %v12510_v8 = vld [vmem:[%s15355_s5 + $0x150] sm:$0xff]  }
 0xb0b   : > { %10248 = vmatprep.subr.bf16.mxu1 %v12502_v50  ;;  %v12511_v50 = vld [vmem:[%s15355_s5 + $0x110] sm:$0xff]  }
 0xb0e   : > { %10249 = vmatpush3.bf16.msra.mxu1 %v12503_v38  ;;  %v12519_v38 = vld [vmem:[%s15355_s5 + $0x130] sm:$0xff]  }
 0xb0f   : > { %10250 = vmatprep.subr.bf16.mxu1 %v12504_v45  ;;  %v12521_v45 = vld [vmem:[%s15355_s5 + $0x138] sm:$0xff]  }
 0xb12   : > { %10251 = vmatpush3.bf16.msra.mxu1 %v12505_v23  ;;  %v12535_v23 = vld [vmem:[%s15355_s5 + $0x1b0] sm:$0xff]  }
 0xb13   : > { %10264 = vmatprep.subr.bf16.mxu1 %v12506_v19  ;;  %v12539_v19 = vld [vmem:[%s15355_s5 + $0x200] sm:$0xff]  }
 0xb15   : > { %7050 = vmatmul.mubr.bf16.vlgmr.msra.gmra.mrb[196].mxu1 %v6913_v37 }
 0xb16   : > { %7057 = vmatprep.mubr.bf16.mxu1 %v14775_v57  ;;  %10265 = vmatpush3.bf16.msra.mxu1 %v12507_v48  ;;  %v12512_v57 = vld [vmem:[%s15355_s5 + $0x158] sm:$0xff]   ;;  %v7686_v48 = vld [vmem:[#allocation4 + $0x18] sm:$0xfe] }
 0xb17   : > { %10266 = vmatprep.subr.bf16.mxu1 %v12508_v32  ;;  %v12554_v32 = vld [vmem:[%s15355_s5 + $0x2c0] sm:$0xff]   ;;  %v7690_v37 = vpack.c.bf16 %v14735_v4, %v7686_v48 }
 0xb1a   : > { %10267 = vmatpush3.bf16.msra.mxu1 %v12509_v40  ;;  %v15026_v40 = vpack.c.bf16 %v7688_v13, %v7688_v13 }
 0xb1b   : > { %10268 = vmatprep.subr.bf16.mxu1 %v12510_v8  ;;  %v12555_v8 = vld [vmem:[%s15355_s5 + $0x280] sm:$0xff]  }
 0xb1d   : > { %7058 = vmatmul.mubr.bf16.gmra.mrb[200].mxu1 %v6912_v61  ;;  %v12542_v61 = vld [vmem:[%s15355_s5 + $0x250] sm:$0xff]  }
 0xb1e   : > { %10269 = vmatpush3.bf16.msra.mxu1 %v12511_v50  ;;  %7253 = vmatprep.mubr.bf16.mxu1 %v14793_v12  ;;  %v12517_v12 = vld [vmem:[%s15355_s5 + $0x128] sm:$0xff]  }
 0xb1f   : > { %10270 = vmatprep.subr.bf16.mxu1 %v12512_v57  ;;  %v12556_v50 = vld [vmem:[%s15355_s5 + $0x2c8] sm:$0xff]   ;;  %v7742_v57 = vshll.u32 %v7690_v37, 16 }
 0xb22   : > { %10271 = vmatpush3.bf16.msra.mxu1 %v12513_v55  ;;  %v7504_v55 = vpack.c.bf16 %v7500_v20, %v7500_v20 }
 0xb23   : > { %10272 = vmatprep.subr.bf16.mxu1 %v12514_v49  ;;  %v7747_v49 = vshll.u32 %v15026_v40, 16 }
 0xb26   : > { %10273 = vmatpush3.bf16.msra.mxu1 %v12515_v60  ;;  %v12557_v60 = vld [vmem:[%s15355_s5 + $0x288] sm:$0xff]  }
 0xb27   : > { %10274 = vmatprep.subr.bf16.mxu1 %v12516_v46  ;;  %v12558_v46 = vld [vmem:[%s15355_s5 + $0x2d0] sm:$0xff]  }
 0xb2a   : > { %10275 = vmatpush3.bf16.msra.mxu1 %v12517_v12  ;;  %v7744_v12 = vrot.slane %v7742_v57, 1  ;;  %v12577_v57 = vld [vmem:[%s15355_s5 + $0x318] sm:$0xff]  }
 0xb2b   : > { %10276 = vmatprep.subr.bf16.mxu1 %v12518_v6  ;;  %v7499_v6 = vld [vmem:[#allocation4 + $0x30] sm:$0x7] }
 0xb2e   : > { %10277 = vmatpush3.bf16.msra.mxu1 %v12519_v38  ;;  %v7740_v38 = vshrl.u32 %v7690_v37, 16  ;;  %v12575_v37 = vld [vmem:[%s15355_s5 + $0x310] sm:$0xff]  }
 0xb2f   : > { %10278 = vmatprep.subr.bf16.mxu1 %v12520_v58  ;;  %v7749_v58 = vrot.slane %v7747_v49, 1  ;;  %v12579_v49 = vld [vmem:[%s15355_s5 + $0x320] sm:$0xff]  }
 0xb32   : > { %10279 = vmatpush3.bf16.msra.mxu1 %v12521_v45  ;;  %v7745_v45 = vor.u32 %v7744_v12, %v7740_v38  ;;  %v12582_v12 = vld [vmem:[%s15355_s5 + $0x370] sm:$0xff]  }
 0xb33   : > { %10292 = vmatprep.subr.bf16.mxu1 %v12522_v52  ;;  %v12560_v52 = vld [vmem:[%s15355_s5 + $0x2d8] sm:$0xff]   ;;  %v12583_v38 = vld [vmem:[%s15355_s5 + $0x330] sm:$0xff]  }
 0xb35   : > { %7254 = vmatmul.mubr.bf16.vlgmr.msra.gmra.mrb[204].mxu1 %v14786_v28  ;;  %v12529_v28 = vld [vmem:[%s15355_s5 + $0x198] sm:$0xff]  }
 0xb36   : > { %7261 = vmatprep.mubr.bf16.mxu1 %v14779_v33  ;;  %10293 = vmatpush3.bf16.msra.mxu1 %v12523_v54  ;;  %v12528_v33 = vld [vmem:[%s15355_s5 + $0x1d8] sm:$0xff]   ;;  %v7750_v54 = vsel %vm7726_vm0, %v7745_v45, %v7749_v58 }
 0xb37   : > { %10294 = vmatprep.subr.bf16.mxu1 %v12524_v14  ;;  %v12561_v14 = vld [vmem:[%s15355_s5 + $0x298] sm:$0xff]  }
 0xb3a   : > { %10295 = vmatpush3.bf16.msra.mxu1 %v12525_v10  ;;  %v12562_v10 = vld [vmem:[%s15355_s5 + $0x2e0] sm:$0xff]  }
 0xb3b   : > { %10296 = vmatprep.subr.bf16.mxu1 %v12526_v43  ;;  %v12563_v43 = vld [vmem:[%s15355_s5 + $0x2a0] sm:$0xff]  }
 0xb3d   : > { %7262 = vmatmul.mubr.bf16.gmra.mrb[208].mxu1 %v14777_v53  ;;  %v12532_v53 = vld [vmem:[%s15355_s5 + $0x1e8] sm:$0xff]  }
 0xb3e   : > { %10297 = vmatpush3.bf16.msra.mxu1 %v12527_v24  ;;  %7480 = vmatprep.mubr.bf16.mxu1 %v14814_v41  ;;  %v12533_v41 = vld [vmem:[%s15355_s5 + $0x1a8] sm:$0xff]  }
 0xb3f   : > { %10298 = vmatprep.subr.bf16.mxu1 %v12528_v33  ;;  %v12564_v24 = vld [vmem:[%s15355_s5 + $0x2e8] sm:$0xff]  }
 0xb40   : > { %v7685_v33 = vld [vmem:[#allocation4 + $0x10] sm:$0xfe] }
 0xb42   : > { %10299 = vmatpush3.bf16.msra.mxu1 %v12529_v28  ;;  %v7687_v28 = vld [vmem:[#allocation4 + $0x30] sm:$0xf] }
 0xb43   : > { %10300 = vmatprep.subr.bf16.mxu1 %v12530_v22  ;;  %v12565_v22 = vld [vmem:[%s15355_s5 + $0x2a8] sm:$0xff]  }
 0xb46   : > { %10301 = vmatpush3.bf16.msra.mxu1 %v12531_v56  ;;  %v7689_v56 = vpack.c.bf16 %v14733_v5, %v7685_v33 }
 0xb47   : > { %10302 = vmatprep.subr.bf16.mxu1 %v12532_v53  ;;  %v12566_v53 = vld [vmem:[%s15355_s5 + $0x2f0] sm:$0xff]  }
 0xb4a   : > { %10303 = vmatpush3.bf16.msra.mxu1 %v12533_v41  ;;  %v7691_v41 = vpack.c.bf16 %v7687_v28, %v7687_v28 }
 0xb4b   : > { %10304 = vmatprep.subr.bf16.mxu1 %v12534_v35  ;;  %v12567_v35 = vld [vmem:[%s15355_s5 + $0x2b0] sm:$0xff]  }
 0xb4c   : > { %v7751_v48 = vshrl.u32 %v7691_v41, 16 }
 0xb4e   : > { %10305 = vmatpush3.bf16.msra.mxu1 %v12535_v23  ;;  %v7730_v23 = vshll.u32 %v7689_v56, 16 }
 0xb4f   : > { %10306 = vmatprep.subr.bf16.mxu1 %v12536_v30  ;;  %v12568_v30 = vld [vmem:[%s15355_s5 + $0x2f8] sm:$0xff]  }
 0xb52   : > { %10307 = vmatpush3.bf16.msra.mxu1 %v12537_v51  ;;  %v7735_v51 = vshll.u32 %v7691_v41, 16  ;;  %v12588_v41 = vld [vmem:[%s15355_s5 + $0x3c8] sm:$0xff]  }
 0xb53   : > { %10320 = vmatprep.subr.bf16.mxu1 %v12538_v16  ;;  %v12569_v16 = vld [vmem:[%s15355_s5 + $0x2b8] sm:$0xff]  }
 0xb55   : > { %7481 = vmatmul.mubr.bf16.vlgmr.msra.gmra.mrb[212].mxu1 %v14823_v39  ;;  %v12545_v39 = vld [vmem:[%s15355_s5 + $0x218] sm:$0xff]  }
 0xb56   : > { %7488 = vmatprep.mubr.bf16.mxu1 %v14800_v34  ;;  %10321 = vmatpush3.bf16.msra.mxu1 %v12539_v19  ;;  %v12544_v34 = vld [vmem:[%s15355_s5 + $0x258] sm:$0xff]   ;;  %v7732_v19 = vrot.slane %v7730_v23, 1 }
 0xb57   : > { %10322 = vmatprep.subr.bf16.mxu1 %v12540_v26  ;;  %v12570_v26 = vld [vmem:[%s15355_s5 + $0x340] sm:$0xff]  }
 0xb5a   : > { %10323 = vmatpush3.bf16.msra.mxu1 %v12541_v11  ;;  %v7728_v11 = vshrl.u32 %v7689_v56, 16 }
 0xb5b   : > { %10324 = vmatprep.subr.bf16.mxu1 %v12542_v61  ;;  %v7737_v61 = vrot.slane %v7735_v51, 1 }
 0xb5d   : > { %7489 = vmatmul.mubr.bf16.gmra.mrb[216].mxu1 %v14816_v31  ;;  %v12550_v31 = vld [vmem:[%s15355_s5 + $0x270] sm:$0xff]   ;;  %v7753_v20 = vor.u32 %v7751_v48, %v7737_v61 }
 0xb5e   : > { %10325 = vmatpush3.bf16.msra.mxu1 %v12543_v2  ;;  %7666 = vmatprep.mubr.bf16.mxu1 %v7502_v59  ;;  %v12549_v59 = vld [vmem:[%s15355_s5 + $0x228] sm:$0xff]   ;;  %v7754_v2 = vshrl.u32 %v15026_v40, 16 }
 0xb5f   : > { %10326 = vmatprep.subr.bf16.mxu1 %v12544_v34  ;;  %v7733_v34 = vor.u32 %v7732_v19, %v7728_v11  ;;  %v12590_v19 = vld [vmem:[%s15355_s5 + $0x3d0] sm:$0xff]  }
 0xb62   : > { %10327 = vmatpush3.bf16.msra.mxu1 %v12545_v39  ;;  %v12571_v39 = vld [vmem:[%s15355_s5 + $0x300] sm:$0xff]  }
 0xb63   : > { %10328 = vmatprep.subr.bf16.mxu1 %v12546_v42  ;;  %v7911_v42 = vld [vmem:[#allocation4 + $0x38] sm:$0x1f] }
 0xb66   : > { %10329 = vmatpush3.bf16.msra.mxu1 %v12547_v15  ;;  %v12572_v15 = vld [vmem:[%s15355_s5 + $0x348] sm:$0xff]  }
 0xb67   : > { %10330 = vmatprep.subr.bf16.mxu1 %v12548_v17  ;;  %v7738_v17 = vsel %vm7726_vm0, %v7733_v34, %v7737_v61 }
 0xb6a   : > { %10331 = vmatpush3.bf16.msra.mxu1 %v12549_v59  ;;  %v7756_v59 = vor.u32 %v7754_v2, %v7749_v58  ;;  %v8114_v58 = vld [vmem:[#allocation4 + $0x38] sm:$0x3f] }
 0xb6b   : > { %10332 = vmatprep.subr.bf16.mxu1 %v12550_v31  ;;  %v7909_v31 = vld [vmem:[#allocation4 + $0x18] sm:$0xfc] }
 0xb6c   : > { %v7913_v13 = vpack.c.bf16 %v14735_v4, %v7909_v31  ;;  %v12591_v2 = vld [vmem:[%s15355_s5 + $0x390] sm:$0xff]   ;;  %v12595_v31 = vld [vmem:[%s15355_s5 + $0x3a0] sm:$0xff]  }
 0xb6e   : > { %10333 = vmatpush3.bf16.msra.mxu1 %v12551_v29  ;;  %v7915_v29 = vpack.c.bf16 %v7911_v42, %v7911_v42  ;;  %v7957_v40 = vrot.slane %v7913_v13, 1 }
 0xb6f   : > { %10334 = vmatprep.subr.bf16.mxu1 %v12552_v9  ;;  %v12573_v9 = vld [vmem:[%s15355_s5 + $0x308] sm:$0xff]  }
 0xb72   : > { %10335 = vmatpush3.bf16.msra.mxu1 %v12553_v0  ;;  %v12574_v0 = vld [vmem:[%s15355_s5 + $0x350] sm:$0xff]  }
 0xb73   : > { %10348 = vmatprep.subr.bf16.mxu1 %v12554_v32  ;;  %v7958_v32 = vrot.slane %v7915_v29, 1  ;;  %v12596_v29 = vld [vmem:[%s15355_s5 + $0x3e8] sm:$0xff]  }
 0xb75   : > { %7667 = vmatmul.mubr.bf16.vlgmr.msra.gmra.mrb[220].mxu1 %v7501_v63  ;;  %v7503_v63 = vpack.c.bf16 %v7499_v6, %v7499_v6  ;;  %v7910_v6 = vld [vmem:[#allocation4 + $0x30] sm:$0x1f] }
 0xb76   : > { %7674 = vmatprep.mubr.bf16.mxu1 %v7504_v55  ;;  %10349 = vmatpush3.bf16.msra.mxu1 %v12555_v8  ;;  %v12576_v8 = vld [vmem:[%s15355_s5 + $0x358] sm:$0xff]   ;;  %v12578_v55 = vld [vmem:[%s15355_s5 + $0x360] sm:$0xff]   ;;  %v7914_v45 = vpack.c.bf16 %v7910_v6, %v7910_v6 }
 0xb77   : > { %10350 = vmatprep.subr.bf16.mxu1 %v12556_v50  ;;  %v7959_v50 = vsel %vm4070_vm3, %v7957_v40, %v7958_v32 }
 0xb78   : > { %v7955_v33 = vrot.slane %v7914_v45, 1  ;;  %v12602_v45 = vld [vmem:[%s15355_s5 + $0x440] sm:$0xff]  }
 0xb7a   : > { %10351 = vmatpush3.bf16.msra.mxu1 %v12557_v60  ;;  %v12580_v60 = vld [vmem:[%s15355_s5 + $0x368] sm:$0xff]  }
 0xb7b   : > { %10352 = vmatprep.subr.bf16.mxu1 %v12558_v46  ;;  %v12581_v46 = vld [vmem:[%s15355_s5 + $0x328] sm:$0xff]  }
 0xb7d   : > { %7675 = vmatmul.mubr.bf16.gmra.mrb[224].mxu1 %v7503_v63  ;;  %v7908_v63 = vld [vmem:[#allocation4 + $0x10] sm:$0xfc] }
 0xb7e   : > { %10353 = vmatpush3.bf16.msra.mxu1 %v12559_v44  ;;  %7889 = vmatprep.mubr.bf16.mxu1 %v7750_v54  ;;  %v12584_v44 = vld [vmem:[%s15355_s5 + $0x378] sm:$0xff]   ;;  %v8118_v54 = vpack.c.bf16 %v8114_v58, %v8114_v58 }
 0xb7f   : > { %10354 = vmatprep.subr.bf16.mxu1 %v12560_v52  ;;  %v8112_v52 = vld [vmem:[#allocation4 + $0x18] sm:$0xf8]  ;;  %v12601_v58 = vld [vmem:[%s15355_s5 + $0x3b8] sm:$0xff]  }
 0xb80   : > { %v8179_v28 = vshrl.u32 %v8118_v54, 16 }
 0xb82   : > { %10355 = vmatpush3.bf16.msra.mxu1 %v12561_v14  ;;  %v12585_v14 = vld [vmem:[%s15355_s5 + $0x338] sm:$0xff]  }
 0xb83   : > { %10356 = vmatprep.subr.bf16.mxu1 %v12562_v10  ;;  %v7912_v10 = vpack.c.bf16 %v14733_v5, %v7908_v63 }
 0xb85   : > { %v7954_v56 = vrot.slane %v7912_v10, 1 }
 0xb86   : > { %10357 = vmatpush3.bf16.msra.mxu1 %v12563_v43  ;;  %v12586_v43 = vld [vmem:[%s15355_s5 + $0x3c0] sm:$0xff]  }
 0xb87   : > { %10358 = vmatprep.subr.bf16.mxu1 %v12564_v24  ;;  %v8116_v24 = vpack.c.bf16 %v14735_v4, %v8112_v52  ;;  %v8181_v4 = vrot.slane %v8179_v28, 1 }
 0xb89   : > { %v8174_v23 = vshll.u32 %v8116_v24, 16 }
 0xb8a   : > { %10359 = vmatpush3.bf16.msra.mxu1 %v12565_v22  ;;  %v8182_v22 = vshll.u32 %v8118_v54, 16 }
 0xb8b   : > { %10360 = vmatprep.subr.bf16.mxu1 %v12566_v53  ;;  %v12587_v53 = vld [vmem:[%s15355_s5 + $0x380] sm:$0xff]   ;;  %v8176_v11 = vrot.slane %v8174_v23, 2  ;;  %v12608_v23 = vld [vmem:[%s15355_s5 + $0x458] sm:$0xff]  }
 0xb8c   : > { %v8184_v51 = vrot.slane %v8182_v22, 2  ;;  %v12604_v22 = vld [vmem:[%s15355_s5 + $0x448] sm:$0xff]  }
 0xb8e   : > { %10361 = vmatpush3.bf16.msra.mxu1 %v12567_v35  ;;  %v8171_v35 = vshrl.u32 %v8116_v24, 16  ;;  %v8185_v61 = vor.u32 %v8184_v51, %v8181_v4  ;;  %v12610_v4 = vld [vmem:[%s15355_s5 + $0x460] sm:$0xff]  }
 0xb8f   : > { %10362 = vmatprep.subr.bf16.mxu1 %v12568_v30  ;;  %v7956_v30 = vsel %vm4070_vm3, %v7954_v56, %v7955_v33  ;;  %vm8152_vm3 = vsmask.f32 6400  ;;  %v12611_v51 = vld [vmem:[%s15355_s5 + $0x420] sm:$0xff]  }
 0xb92   : > { %10363 = vmatpush3.bf16.msra.mxu1 %v12569_v16  ;;  %v12589_v16 = vld [vmem:[%s15355_s5 + $0x388] sm:$0xff]  }
 0xb93   : > { %10376 = vmatprep.subr.bf16.mxu1 %v12570_v26  ;;  %v8173_v26 = vrot.slane %v8171_v35, 1  ;;  %v12607_v35 = vld [vmem:[%s15355_s5 + $0x410] sm:$0xff]  }
 0xb95   : > { %7890 = vmatmul.mubr.bf16.vlgmr.msra.gmra.mrb[228].mxu1 %v7738_v17  ;;  %v8177_v34 = vor.u32 %v8176_v11, %v8173_v26  ;;  %v12594_v17 = vld [vmem:[%s15355_s5 + $0x3e0] sm:$0xff]  }
 0xb96   : > { %7897 = vmatprep.mubr.bf16.mxu1 %v7756_v59  ;;  %10377 = vmatpush3.bf16.msra.mxu1 %v12571_v39  ;;  %v12592_v39 = vld [vmem:[%s15355_s5 + $0x3d8] sm:$0xff]   ;;  %v8113_v59 = vld [vmem:[#allocation4 + $0x30] sm:$0x3f] }
 0xb97   : > { %10378 = vmatprep.subr.bf16.mxu1 %v12572_v15  ;;  %v8186_v42 = vsel %vm8152_vm3, %v8177_v34, %v8185_v61  ;;  %v12593_v15 = vld [vmem:[%s15355_s5 + $0x398] sm:$0xff]   ;;  %v8117_v48 = vpack.c.bf16 %v8113_v59, %v8113_v59  ;;  %v12615_v34 = vld [vmem:[%s15355_s5 + $0x430] sm:$0xff]  }
 0xb99   : > { %v8165_v40 = vshll.u32 %v8117_v48, 16 }
 0xb9a   : > { %10379 = vmatpush3.bf16.msra.mxu1 %v12573_v9  ;;  %v8111_v9 = vld [vmem:[#allocation4 + $0x10] sm:$0xf8] }
 0xb9b   : > { %10380 = vmatprep.subr.bf16.mxu1 %v12574_v0  ;;  %v12597_v0 = vld [vmem:[%s15355_s5 + $0x3a8] sm:$0xff]   ;;  %v8115_v13 = vpack.c.bf16 %v14733_v5, %v8111_v9 }
 0xb9d   : > { %7898 = vmatmul.mubr.bf16.gmra.mrb[232].mxu1 %v7753_v20  ;;  %v8162_v20 = vshrl.u32 %v8117_v48, 16 }
 0xb9e   : > { %10381 = vmatpush3.bf16.msra.mxu1 %v12575_v37  ;;  %8092 = vmatprep.mubr.bf16.mxu1 %v7959_v50 }
 0xb9f   : > { %10382 = vmatprep.subr.bf16.mxu1 %v12576_v8  ;;  %v8164_v6 = vrot.slane %v8162_v20, 1  ;;  %v12620_v20 = vld [vmem:[%s15355_s5 + $0x4c8] sm:$0xff]  }
 0xba2   : > { %10383 = vmatpush3.bf16.msra.mxu1 %v12577_v57 }
 0xba3   : > { %10384 = vmatprep.subr.bf16.mxu1 %v12578_v55  ;;  %v12599_v55 = vld [vmem:[%s15355_s5 + $0x3b0] sm:$0xff]  }
 0xba6   : > { %10385 = vmatpush3.bf16.msra.mxu1 %v12579_v49  ;;  %v8154_v49 = vshrl.u32 %v8115_v13, 16 }
 0xba7   : > { %10386 = vmatprep.subr.bf16.mxu1 %v12580_v60  ;;  %v8157_v60 = vshll.u32 %v8115_v13, 16 }
 0xba9   : > { %v8159_v63 = vrot.slane %v8157_v60, 2  ;;  %v12630_v60 = vld [vmem:[%s15355_s5 + $0x4f0] sm:$0xff]  }
 0xbaa   : > { %10387 = vmatpush3.bf16.msra.mxu1 %v12581_v46  ;;  %v12600_v46 = vld [vmem:[%s15355_s5 + $0x3f8] sm:$0xff]  }
 0xbab   : > { %10388 = vmatprep.subr.bf16.mxu1 %v12582_v12 }
 0xbae   : > { %10389 = vmatpush3.bf16.msra.mxu1 %v12583_v38  ;;  %v8167_v38 = vrot.slane %v8165_v40, 2 }
 0xbaf   : > { %10390 = vmatprep.subr.bf16.mxu1 %v12584_v44  ;;  %v8156_v44 = vrot.slane %v8154_v49, 1  ;;  %v12627_v49 = vld [vmem:[%s15355_s5 + $0x4a0] sm:$0xff]  }
 0xbb0   : > { %v8168_v54 = vor.u32 %v8167_v38, %v8164_v6  ;;  %v12631_v38 = vld [vmem:[%s15355_s5 + $0x4b0] sm:$0xff]  }
 0xbb1   : > { %v8160_v24 = vor.u32 %v8159_v63, %v8156_v44  ;;  %v12632_v44 = vld [vmem:[%s15355_s5 + $0x4f8] sm:$0xff]  }
 0xbb2   : > { %10391 = vmatpush3.bf16.msra.mxu1 %v12585_v14 }
 0xbb3   : > { %10404 = vmatprep.subr.bf16.mxu1 %v12586_v43  ;;  %v8169_v56 = vsel %vm8152_vm3, %v8160_v24, %v8168_v54 }
 0xbb5   : > { %8093 = vmatmul.mubr.bf16.vlgmr.msra.gmra.mrb[236].mxu1 %v7956_v30  ;;  %v12609_v30 = vld [vmem:[%s15355_s5 + $0x418] sm:$0xff]  }
 0xbb6   : > { %8100 = vmatprep.mubr.bf16.mxu1 %v7958_v32  ;;  %10405 = vmatpush3.bf16.msra.mxu1 %v12587_v53  ;;  %v12598_v32 = vld [vmem:[%s15355_s5 + $0x3f0] sm:$0xff]   ;;  %v12605_v53 = vld [vmem:[%s15355_s5 + $0x408] sm:$0xff]  }
 0xbb7   : > { %10406 = vmatprep.subr.bf16.mxu1 %v12588_v41  ;;  %v12606_v41 = vld [vmem:[%s15355_s5 + $0x450] sm:$0xff]  }
 0xbba   : > { %10407 = vmatpush3.bf16.msra.mxu1 %v12589_v16  ;;  %v12612_v16 = vld [vmem:[%s15355_s5 + $0x468] sm:$0xff]  }
 0xbbb   : > { %10408 = vmatprep.subr.bf16.mxu1 %v12590_v19  ;;  %v12614_v19 = vld [vmem:[%s15355_s5 + $0x470] sm:$0xff]  }
 0xbbd   : > { %8101 = vmatmul.mubr.bf16.gmra.mrb[240].mxu1 %v7955_v33  ;;  %v12603_v33 = vld [vmem:[%s15355_s5 + $0x400] sm:$0xff]  }
 0xbbe   : > { %10409 = vmatpush3.bf16.msra.mxu1 %v12591_v2  ;;  %8319 = vmatprep.mubr.bf16.mxu1 %v8186_v42  ;;  %v12616_v42 = vld [vmem:[%s15355_s5 + $0x478] sm:$0xff]  }
 0xbbf   : > { %10410 = vmatprep.subr.bf16.mxu1 %v12592_v39 }
 0xbc2   : > { %10411 = vmatpush3.bf16.msra.mxu1 %v12593_v15 }
 0xbc3   : > { %10412 = vmatprep.subr.bf16.mxu1 %v12594_v17 }
 0xbc6   : > { %10413 = vmatpush3.bf16.msra.mxu1 %v12595_v31  ;;  %v12617_v31 = vld [vmem:[%s15355_s5 + $0x438] sm:$0xff]  }
 0xbc7   : > { %10414 = vmatprep.subr.bf16.mxu1 %v12596_v29  ;;  %v12618_v29 = vld [vmem:[%s15355_s5 + $0x4c0] sm:$0xff]  }
 0xbc8   : > { %v10224_v37 = vpop.f32.mrb[188].mxu1 }
 0xbc9   : > { %v10225_v8 = vpop.f32.mrb[189].mxu1 }
 0xbca   : > { %v15175_v50 = vadd.f32 %v10225_v8, %v10224_v37  ;;  %10415 = vmatpush3.bf16.msra.mxu1 %v12597_v0  ;;  %v10227_v57 = vpop.f32.mrb[190].mxu1  ;;  %v12621_v8 = vld [vmem:[%s15355_s5 + $0x488] sm:$0xff]  }
 0xbcb   : > { %v10228_v5 = vpop.f32.mrb[191].mxu1  ;;  %10416 = vmatprep.subr.bf16.mxu1 %v12598_v32  ;;  %v12619_v32 = vld [vmem:[%s15355_s5 + $0x480] sm:$0xff]  }
 0xbcc   : > { %v10229_v12 = vadd.f32 %v10228_v5, %v10227_v57  ;;  %v12623_v57 = vld [vmem:[%s15355_s5 + $0x490] sm:$0xff]  }
 0xbce   : > { %10417 = vmatpush3.bf16.msra.mxu1 %v12599_v55  ;;  %v12626_v55 = vld [vmem:[%s15355_s5 + $0x4e0] sm:$0xff]  }
 0xbcf   : > { %10418 = vmatprep.subr.bf16.mxu1 %v12600_v46 }
 0xbd0   : > { %v10230_v52 = vpop.f32.mrb[192].mxu1 }
 0xbd1   : > { %v10231_v14 = vpop.f32.mrb[193].mxu1 }
 0xbd2   : > { %v10232_v10 = vadd.f32 %v10231_v14, %v10230_v52  ;;  %10419 = vmatpush3.bf16.msra.mxu1 %v12601_v58  ;;  %v10233_v43 = vpop.f32.mrb[194].mxu1 }
 0xbd3   : > { %v10234_v28 = vpop.f32.mrb[195].mxu1  ;;  %10432 = vmatprep.subr.bf16.mxu1 %v12602_v45 }
 0xbd5   : > { %8320 = vmatmul.mubr.bf16.vlgmr.msra.gmra.mrb[244].mxu1 %v8169_v56 }
 0xbd6   : > { %8327 = vmatprep.mubr.bf16.mxu1 %v8185_v61  ;;  %10433 = vmatpush3.bf16.msra.mxu1 %v12603_v33 }
 0xbd7   : > { %10434 = vmatprep.subr.bf16.mxu1 %v12604_v22  ;;  %v15293_v22 = vld [vmem:[#allocation4] sm:$0xff] }
 0xbda   : > { %10435 = vmatpush3.bf16.msra.mxu1 %v12605_v53 }
 0xbdb   : > { %10436 = vmatprep.subr.bf16.mxu1 %v12606_v41 }
 0xbdd   : > { %8328 = vmatmul.mubr.bf16.gmra.mrb[248].mxu1 %v8168_v54  ;;  %v12633_v54 = vld [vmem:[%s15355_s5 + $0x4b8] sm:$0xff]  }
 0xbde   : > { %10437 = vmatpush3.bf16.msra.mxu1 %v12607_v35  ;;  %8521 = vmatprep.mubr.bf16.mxu1 %v14856_v3  ;;  %v12613_v3 = vld [vmem:[%s15355_s5 + $0x428] sm:$0xff]  }
 0xbdf   : > { %10438 = vmatprep.subr.bf16.mxu1 %v12608_v23 }
 0xbe2   : > { %10439 = vmatpush3.bf16.msra.mxu1 %v12609_v30 }
 0xbe3   : > { %10440 = vmatprep.subr.bf16.mxu1 %v12610_v4 }
 0xbe6   : > { %10441 = vmatpush3.bf16.msra.mxu1 %v12611_v51 }
 0xbe7   : > { %10442 = vmatprep.subr.bf16.mxu1 %v12612_v16 }
 0xbe8   : > { %v10252_v26 = vpop.f32.mrb[196].mxu1 }
 0xbe9   : > { %v10253_v11 = vpop.f32.mrb[197].mxu1 }
 0xbea   : > { %v10254_v61 = vadd.f32 %v10253_v11, %v10252_v26  ;;  %v10255_v2 = vpop.f32.mrb[198].mxu1  ;;  %10443 = vmatpush3.bf16.msra.mxu1 %v12613_v3 }
 0xbeb   : > { %v10256_v39 = vpop.f32.mrb[199].mxu1  ;;  %10444 = vmatprep.subr.bf16.mxu1 %v12614_v19 }
 0xbec   : > { %v7052_v15 = vadd.f32 %v10254_v61, %v15175_v50  ;;  %v10257_v17 = vadd.f32 %v10256_v39, %v10255_v2  ;;  %v12622_v50 = vld [vmem:[%s15355_s5 + $0x4d0] sm:$0xff]  }
 0xbee   : > { %v7055_v59 = vadd.f32 %v10257_v17, %v10229_v12  ;;  %10445 = vmatpush3.bf16.msra.mxu1 %v12615_v34 }
 0xbef   : > { %10446 = vmatprep.subr.bf16.mxu1 %v12616_v42 }
 0xbf0   : > { %v10258_v9 = vpop.f32.mrb[200].mxu1 }
 0xbf1   : > { %v10259_v48 = vpop.f32.mrb[201].mxu1 }
 0xbf2   : > { %v10260_v0 = vadd.f32 %v10259_v48, %v10258_v9  ;;  %v10261_v13 = vpop.f32.mrb[202].mxu1  ;;  %10447 = vmatpush3.bf16.msra.mxu1 %v12617_v31 }
 0xbf3   : > { %v10262_v37 = vpop.f32.mrb[203].mxu1  ;;  %10460 = vmatprep.subr.bf16.mxu1 %v12618_v29 }
 0xbf4   : > { %v7060_v40 = vadd.f32 %v10260_v0, %v10232_v10 }
 0xbf5   : > { %8522 = vmatmul.mubr.bf16.vlgmr.msra.gmra.mrb[252].mxu1 %v14860_v21  ;;  %v12625_v21 = vld [vmem:[%s15355_s5 + $0x498] sm:$0xff]  }
 0xbf6   : > { %8529 = vmatprep.mubr.bf16.mxu1 %v14842_v18  ;;  %10461 = vmatpush3.bf16.msra.mxu1 %v12619_v32  ;;  %v12624_v18 = vld [vmem:[%s15355_s5 + $0x4d8] sm:$0xff]  }
 0xbf7   : > { %10462 = vmatprep.subr.bf16.mxu1 %v12620_v20 }
 0xbfa   : > { %10463 = vmatpush3.bf16.msra.mxu1 %v12621_v8 }
 0xbfb   : > { %10464 = vmatprep.subr.bf16.mxu1 %v12622_v50 }
 0xbfd   : > { %8530 = vmatmul.mubr.bf16.gmra.mrb[0].mxu1 %v14849_v27  ;;  %v12628_v27 = vld [vmem:[%s15355_s5 + $0x4e8] sm:$0xff]  }
 0xbfe   : > { %10465 = vmatpush3.bf16.msra.mxu1 %v12623_v57  ;;  %8747 = vmatprep.mubr.bf16.mxu1 %v14877_v47  ;;  %v12629_v47 = vld [vmem:[%s15355_s5 + $0x4a8] sm:$0xff]  }
 0xbff   : > { %10466 = vmatprep.subr.bf16.mxu1 %v12624_v18 }
 0xc02   : > { %10467 = vmatpush3.bf16.msra.mxu1 %v12625_v21 }
 0xc03   : > { %10468 = vmatprep.subr.bf16.mxu1 %v12626_v55 }
 0xc06   : > { %10469 = vmatpush3.bf16.msra.mxu1 %v12627_v49 }
 0xc07   : > { %10470 = vmatprep.subr.bf16.mxu1 %v12628_v27 }
 0xc08   : > { %v10280_v5 = vpop.f32.mrb[204].mxu1 }
 0xc09   : > { %v10281_v46 = vpop.f32.mrb[205].mxu1 }
 0xc0a   : > { %v10282_v12 = vadd.f32 %v10281_v46, %v10280_v5  ;;  %v10283_v6 = vpop.f32.mrb[206].mxu1  ;;  %10471 = vmatpush3.bf16.msra.mxu1 %v12629_v47 }
 0xc0b   : > { %v10284_v58 = vpop.f32.mrb[207].mxu1  ;;  %10472 = vmatprep.subr.bf16.mxu1 %v12630_v60 }
 0xc0c   : > { %v7269_v63 = vadd.f32 %v10282_v12, %v7052_v15  ;;  %v10285_v45 = vadd.f32 %v10284_v58, %v10283_v6 }
 0xc0e   : > { %v7270_v52 = vadd.f32 %v10285_v45, %v7055_v59  ;;  %10473 = vmatpush3.bf16.msra.mxu1 %v12631_v38 }
 0xc0f   : > { %10474 = vmatprep.subr.bf16.mxu1 %v12632_v44 }
 0xc10   : > { %v10286_v14 = vpop.f32.mrb[208].mxu1 }
 0xc11   : > { %v10287_v10 = vpop.f32.mrb[209].mxu1 }
 0xc12   : > { %v10288_v43 = vadd.f32 %v10287_v10, %v10286_v14  ;;  %v10289_v24 = vpop.f32.mrb[210].mxu1  ;;  %10475 = vmatpush3.bf16.msra.mxu1 %v12633_v54 }
 0xc13   : > { %v10290_v33 = vpop.f32.mrb[211].mxu1  ;;  %11401 = vmatprep.subr.bf16.mxu1 %v12707_v7 }
 0xc14   : > { %v7271_v28 = vadd.f32 %v10288_v43, %v7060_v40 }
 0xc15   : > { %8748 = vmatmul.mubr.bf16.vlgmr.msra.gmra.mrb[4].mxu1 %v14804_v25 }
 0xc16   : > { %8755 = vmatprep.mubr.bf16.mxu1 %v14869_v62 }
 0xc1d   : > { %8756 = vmatmul.mubr.bf16.gmra.mrb[8].mxu1 %v14795_v36 }
 0xc1e   : > { %11314 = vmatprep.mubr.msk.f32.mxu1 %vm12705_vm1, %v15293_v22  ;;  %vm8773_vm1 = vcmask 154624  }
 0xc28   : > { %v10308_v56 = vpop.f32.mrb[212].mxu1 }
 0xc29   : > { %v10309_v53 = vpop.f32.mrb[213].mxu1 }
 0xc2a   : > { %v10310_v41 = vadd.f32 %v10309_v53, %v10308_v56  ;;  %v10311_v35 = vpop.f32.mrb[214].mxu1 }
 0xc2b   : > { %v10312_v23 = vpop.f32.mrb[215].mxu1 }
 0xc2c   : > { %v7496_v30 = vadd.f32 %v10310_v41, %v7269_v63  ;;  %v10313_v4 = vadd.f32 %v10312_v23, %v10311_v35 }
 0xc2e   : > { %v7497_v7 = vadd.f32 %v10313_v4, %v7270_v52 }
 0xc30   : > { %v10314_v51 = vpop.f32.mrb[216].mxu1 }
 0xc31   : > { %v10315_v16 = vpop.f32.mrb[217].mxu1 }
 0xc32   : > { %v10316_v25 = vadd.f32 %v10315_v16, %v10314_v51  ;;  %v10317_v3 = vpop.f32.mrb[218].mxu1 }
 0xc33   : > { %v10318_v62 = vpop.f32.mrb[219].mxu1 }
 0xc34   : > { %v7498_v19 = vadd.f32 %v10316_v25, %v7271_v28 }
 0xc48   : > { %v10336_v36 = vpop.f32.mrb[220].mxu1 }
 0xc49   : > { %v10337_v26 = vpop.f32.mrb[221].mxu1 }
 0xc4a   : > { %v10338_v11 = vadd.f32 %v10337_v26, %v10336_v36  ;;  %v10339_v61 = vpop.f32.mrb[222].mxu1 }
 0xc4b   : > { %v10340_v2 = vpop.f32.mrb[223].mxu1 }
 0xc4c   : > { %v7682_v34 = vadd.f32 %v10338_v11, %v7496_v30  ;;  %v10341_v39 = vadd.f32 %v10340_v2, %v10339_v61 }
 0xc4e   : > { %v7683_v42 = vadd.f32 %v10341_v39, %v7497_v7 }
 0xc50   : > { %v10342_v15 = vpop.f32.mrb[224].mxu1 }
 0xc51   : > { %v10343_v17 = vpop.f32.mrb[225].mxu1 }
 0xc52   : > { %v10344_v59 = vadd.f32 %v10343_v17, %v10342_v15  ;;  %v10345_v31 = vpop.f32.mrb[226].mxu1 }
 0xc53   : > { %v10346_v29 = vpop.f32.mrb[227].mxu1 }
 0xc54   : > { %v7684_v9 = vadd.f32 %v10344_v59, %v7498_v19 }
 0xc68   : > { %v10364_v48 = vpop.f32.mrb[228].mxu1 }
 0xc69   : > { %v10365_v0 = vpop.f32.mrb[229].mxu1 }
 0xc6a   : > { %v10366_v13 = vadd.f32 %v10365_v0, %v10364_v48  ;;  %v10367_v32 = vpop.f32.mrb[230].mxu1 }
 0xc6b   : > { %v10368_v37 = vpop.f32.mrb[231].mxu1 }
 0xc6c   : > { %v7905_v20 = vadd.f32 %v10366_v13, %v7682_v34  ;;  %v10369_v40 = vadd.f32 %v10368_v37, %v10367_v32 }
 0xc6e   : > { %v7906_v8 = vadd.f32 %v10369_v40, %v7683_v42 }
 0xc70   : > { %v10370_v50 = vpop.f32.mrb[232].mxu1 }
 0xc71   : > { %v10371_v57 = vpop.f32.mrb[233].mxu1 }
 0xc72   : > { %v10372_v18 = vadd.f32 %v10371_v57, %v10370_v50  ;;  %v10373_v21 = vpop.f32.mrb[234].mxu1  ;;  %v9922_v57 = vld [vmem:[%s15356_s6] ss:$0 sm:$0xff] }
 0xc73   : > { %v10374_v55 = vpop.f32.mrb[235].mxu1 }
 0xc74   : > { %v7907_v49 = vadd.f32 %v10372_v18, %v7684_v9 }
 0xc88   : > { %v10392_v27 = vpop.f32.mrb[236].mxu1 }
 0xc89   : > { %v10393_v47 = vpop.f32.mrb[237].mxu1 }
 0xc8a   : > { %v10394_v60 = vadd.f32 %v10393_v47, %v10392_v27  ;;  %v10395_v5 = vpop.f32.mrb[238].mxu1 }
 0xc8b   : > { %v10396_v46 = vpop.f32.mrb[239].mxu1 }
 0xc8c   : > { %v8108_v12 = vadd.f32 %v10394_v60, %v7905_v20  ;;  %v10397_v6 = vadd.f32 %v10396_v46, %v10395_v5 }
 0xc8e   : > { %v8109_v38 = vadd.f32 %v10397_v6, %v7906_v8 }
 0xc90   : > { %v10398_v58 = vpop.f32.mrb[240].mxu1 }
 0xc91   : > { %v10399_v44 = vpop.f32.mrb[241].mxu1 }
 0xc92   : > { %v10400_v63 = vadd.f32 %v10399_v44, %v10398_v58  ;;  %v10401_v45 = vpop.f32.mrb[242].mxu1 }
 0xc93   : > { %v10402_v52 = vpop.f32.mrb[243].mxu1 }
 0xc94   : > { %v8110_v54 = vadd.f32 %v10400_v63, %v7907_v49 }
 0xca8   : > { %v10420_v14 = vpop.f32.mrb[244].mxu1 }
 0xca9   : > { %v10421_v10 = vpop.f32.mrb[245].mxu1 }
 0xcaa   : > { %v10422_v43 = vadd.f32 %v10421_v10, %v10420_v14  ;;  %v10423_v24 = vpop.f32.mrb[246].mxu1 }
 0xcab   : > { %v10424_v33 = vpop.f32.mrb[247].mxu1 }
 0xcac   : > { %v8335_v28 = vadd.f32 %v10422_v43, %v8108_v12  ;;  %v10425_v56 = vadd.f32 %v10424_v33, %v10423_v24 }
 0xcae   : > { %v8336_v53 = vadd.f32 %v10425_v56, %v8109_v38 }
 0xcb0   : > { %v10426_v41 = vpop.f32.mrb[248].mxu1 }
 0xcb1   : > { %v10427_v35 = vpop.f32.mrb[249].mxu1 }
 0xcb2   : > { %v10428_v23 = vadd.f32 %v10427_v35, %v10426_v41  ;;  %v10429_v30 = vpop.f32.mrb[250].mxu1 }
 0xcb3   : > { %v10430_v4 = vpop.f32.mrb[251].mxu1 }
 0xcb4   : > { %v8337_v7 = vadd.f32 %v10428_v23, %v8110_v54 }
 0xcc8   : > { %v10448_v51 = vpop.f32.mrb[252].mxu1 }
 0xcc9   : > { %v10449_v16 = vpop.f32.mrb[253].mxu1 }
 0xcca   : > { %v10450_v25 = vadd.f32 %v10449_v16, %v10448_v51  ;;  %v10451_v3 = vpop.f32.mrb[254].mxu1 }
 0xccb   : > { %v10452_v62 = vpop.f32.mrb[255].mxu1 }
 0xccc   : > { %v8537_v19 = vadd.f32 %v10450_v25, %v8335_v28  ;;  %v10453_v36 = vadd.f32 %v10452_v62, %v10451_v3 }
 0xcce   : > { %v8538_v26 = vadd.f32 %v10453_v36, %v8336_v53 }
 0xcd0   : > { %v10454_v11 = vpop.f32.mrb[0].mxu1 }
 0xcd1   : > { %v10455_v61 = vpop.f32.mrb[1].mxu1 }
 0xcd2   : > { %v10456_v2 = vadd.f32 %v10455_v61, %v10454_v11  ;;  %v10457_v34 = vpop.f32.mrb[2].mxu1 }
 0xcd3   : > { %v10458_v39 = vpop.f32.mrb[3].mxu1 }
 0xcd4   : > { %v8539_v42 = vadd.f32 %v10456_v2, %v8337_v7 }
 0xce8   : > { %v10476_v15 = vpop.f32.mrb[4].mxu1 }
 0xce9   : > { %v10477_v17 = vpop.f32.mrb[5].mxu1 }
 0xcea   : > { %v10478_v59 = vadd.f32 %v10477_v17, %v10476_v15  ;;  %v10479_v31 = vpop.f32.mrb[6].mxu1 }
 0xceb   : > { %v10480_v29 = vpop.f32.mrb[7].mxu1 }
 0xcec   : > { %v8763_v9 = vadd.f32 %v10478_v59, %v8537_v19  ;;  %v10481_v48 = vadd.f32 %v10480_v29, %v10479_v31 }
 0xcee   : > { %v8764_v0 = vadd.f32 %v10481_v48, %v8538_v26 }
 0xcf0   : > { %v11402_v13 = vpack.c.bf16 %v8764_v0, %v8763_v9  ;;  %v10482_v32 = vpop.f32.mrb[8].mxu1 }
 0xcf1   : > { %v10483_v37 = vpop.f32.mrb[9].mxu1 }
 0xcf2   : > { %v10484_v20 = vadd.f32 %v10483_v37, %v10482_v32  ;;  %v10485_v40 = vpop.f32.mrb[10].mxu1  ;;  %11403 = vmatpush3.bf16.msra.mxu1 %v11402_v13 }
 0xcf3   : > { %v10486_v8 = vpop.f32.mrb[11].mxu1  ;;  %11312 = vmatprep.subr.mxu1 %v15293_v22 }
 0xcf4   : > { %v8765_v50 = vadd.f32 %v10484_v20, %v8539_v42 }
 0xcf6   : > { %11313 = vmatpush3.msk.msra.mxu1 %vm6528_vm8, %v8765_v50 }
 0xcf7   : > { %11315 = vmatmul.mubr.msk.f32.vlgmr.msra.gmra.mrb[186].mxu1 %vm8773_vm1, %v14655_v1 }
 0xdca   : > { %v8845_v18 = vpop.f32.mrb[186].mxu1 }
 0xdcb   : > { %v8846_v21 = vadd.f32 %v9922_v57, %v8845_v18  ;;  %v11316_v55 = vpop.f32.mrb[187].mxu1 }
 0xdcd   : > { %v8849_v22 = vmax.f32 %v8846_v21, 0.0 }
 0xdcf   : > { %8851 = vst.msk [vmem:[%s271_s19] sm:$0xf] %vm8850_vm5, %v8849_v22 }
 0xdd0   : > { %12653 = shalt.err (!%p12650_p3)
}
 0xdd1   : > { %s12654_s14 = scalar_lea.hbm %s15308_s23, 64  ;;  %s12658_s17 = scalar_lea.hbm %s15357_s7, 128 }
 0xdd2   : > { %p12655_p4 = scmp.ne.s32.totalorder %s15308_s23, %s12654_s14  ;;  %p12659_p9 = scmp.lt.u32.totalorder %s15308_s23, %s15357_s7 }
 0xdd3   : > { %p12660_p10 = scmp.lt.u32.totalorder %s12658_s17, %s12654_s14  ;;  %p12662_p12 = scmp.lt.u32.totalorder %s12654_s14, %s15308_s23 }
 0xdd4   : > { %p12656_p7 = pnand %p12655_p4, %p12789_p5 }
 0xdd5   : > { %p12661_p11 = por %p12660_p10, %p12659_p9 }
 0xdd6   : > { %p12657_p8 = pneg %p12656_p7 }
 0xdd7   : > { %p12663_p13 = por %p12662_p12, %p12661_p11 }
 0xdd9   : > { %p12664_p0 = pnand %p12663_p13, %p12657_p8 }
 0xddb   : > { %12667 = shalt.err (!%p12664_p0)
}
 0xddc   : > { %12309 = dma.vmem_to_hbm [thread:$0]  (%p12789_p5), %s15310_s20, 64, %s15308_s23, %s8853_s29  }
 0xddd PF: > { %p12315_p1 = scmp.ge.s32.totalorder %s12702_s27, 2  ;;  %s8878_s21 = sand.u32 1, %s12690_s24  }
 0xdde   : > { %s8879_s22 = scalar_lea.sflag [#allocation6], %s8878_s21 }
 0xddf   : > { %p12312_p2 = pnand %p12315_p1, %p12793_p6 }
 0xde1   : > { %12685 = dma.done.wait (!%p12312_p2), %s8879_s22, 64  }
 0xde2   : > { %12687 = vsyncadd (!%p12312_p2), %s8879_s22, 4294967232  ;;  %p17_p3 = scmp.ge.s32.totalorder %s12776_s30, 4   ;;  %s15374_s24 = smov %s12694_s25 }
 0xde3   : > { %s15375_s25 = smov %s12698_s26  ;;  %s15376_s26 = smov %s12787_s10 }
 0xde4   : > { %s15377_s27 = smov %s12776_s30  ;;  %19 = sbr.rel (!%p17_p3) target bundleno = 3 (0x3), region = 108 }
 0xdeb   :  { %8884 = vsyncpa [#allocation6], 1 }
 0xdec   :  { %8886 = vsyncpa [#allocation6 + $0x1], 1 }

</bundles_post_ra>
